<compile_context>
chip_gen: v6e
topology: v6e:2x2x1
jax: 0.10.0
libtpu: 0.0.40
codegen_flags: <defaults>
</compile_context>

<pallas_src>
import functools

import jax
import jax.numpy as jnp
from jax.experimental import pallas as pl
from jax.experimental.pallas import tpu as pltpu

EPS = 1e-5          # PyTorch BatchNorm2d default eps
NEG_SLOPE = 0.1     # LeakyReLU(0.1) as in WideResNet util/net.py


# ------------------------------- helpers -------------------------------------

def _round_up(x, m):
    return ((x + m - 1) // m) * m


def _cpad(c):
    # pad channel dims to a multiple of 128 -> lane-dense MXU operands/stores
    return _round_up(c, 128)


def _pad_last(a, target):
    c = a.shape[-1]
    if c == target:
        return a
    return jnp.pad(a, [(0, 0)] * (a.ndim - 1) + [(0, target - c)])


def _bn_affine(gamma, beta, mean, var, cpad):
    scale = gamma / jnp.sqrt(var + EPS)
    shift = beta - mean * scale
    return (_pad_last(scale, cpad).reshape(1, cpad).astype(jnp.float32),
            _pad_last(shift, cpad).reshape(1, cpad).astype(jnp.float32))


def _prep_conv3x3(w, cip, cop):
    # PyTorch (Cout, Cin, 3, 3) -> (9, Cip, Cop) bf16, zero-padded channels
    cout, cin, kh, kw = w.shape
    w = jnp.transpose(w, (2, 3, 1, 0)).reshape(kh * kw, cin, cout)
    w = jnp.pad(w, ((0, 0), (0, cip - cin), (0, cop - cout)))
    return w.astype(jnp.bfloat16)


def _prep_conv1x1(w, cip, cop):
    cout, cin = w.shape[0], w.shape[1]
    w = jnp.transpose(w.reshape(cout, cin), (1, 0))      # (Cin, Cout)
    w = jnp.pad(w, ((0, cip - cin), (0, cop - cout)))
    return w.astype(jnp.bfloat16)


def _interior_mask(H, W, Hs, Ws, s):
    # 1.0 on original (unpadded) pixels, 0.0 on the conv zero-padding, laid out
    # in the same (s*s, Hs, Ws) phase-plane order as the input.
    hh = jnp.arange(Hs)[None, :] * s + jnp.arange(s)[:, None]      # (s, Hs)
    ww = jnp.arange(Ws)[None, :] * s + jnp.arange(s)[:, None]      # (s, Ws)
    mh = ((hh >= 1) & (hh <= H)).astype(jnp.float32)
    mw = ((ww >= 1) & (ww <= W)).astype(jnp.float32)
    m = mh[:, None, :, None] * mw[None, :, None, :]                # (s, s, Hs, Ws)
    return m.reshape(s * s, Hs, Ws, 1)


# --------------------------- fused BasicBlock kernel --------------------------

def _make_block_kernel(*, s, Ho, Wo, Cip, Cop, equal, abr, out_dtype):
    use_act1 = equal or abr
    taps = [(dy, dx) for dy in range(3) for dx in range(3)]

    def kernel(x_ref, mask_ref, s1_ref, t1_ref, s2_ref, t2_ref,
               w1_ref, w2_ref, *rest):
        if equal:
            o_ref, hpad_ref = rest
            ws_ref = None
        else:
            ws_ref, o_ref, hpad_ref = rest

        xv = x_ref[0].astype(jnp.float32)            # (s*s, Hs, Ws, Cip)

        # --- BN1 + LeakyReLU prologue (fused); conv zero-padding restored
        #     exactly via the precomputed interior mask -----------------------
        if use_act1:
            a = xv * s1_ref[0] + t1_ref[0]
            a = jnp.where(a > 0, a, NEG_SLOPE * a)
            a = a * mask_ref[...]
        else:
            a = xv                                    # raw x (already zero-padded)

        def window(src, dy, dx):                      # static phase-plane tap window
            ph = (dy % s) * s + (dx % s)
            return src[ph, dy // s:dy // s + Ho, dx // s:dx // s + Wo, :]

        # --- conv1: 3x3 / stride s as 9 accumulating bf16 MXU matmuls (f32 acc)
        acc = jnp.zeros((Ho * Wo, Cop), jnp.float32)
        for t, (dy, dx) in enumerate(taps):
            win = window(a, dy, dx).reshape(Ho * Wo, Cip).astype(jnp.bfloat16)
            acc = acc + jnp.dot(win, w1_ref[t],
                                preferred_element_type=jnp.float32)

        # --- BN2 + LeakyReLU epilogue on the accumulator (no HBM round trip) --
        h = acc * s2_ref[...] + t2_ref[...]
        h = jnp.where(h > 0, h, NEG_SLOPE * h)
        # TODO(synk): training-mode F.dropout (dropRate>0) not implemented (eval path).

        # --- conv2 input: zero-padded entirely inside a VMEM scratch ----------
        hpad_ref[...] = jnp.zeros((Ho + 2, Wo + 2, Cop), jnp.float32)
        hpad_ref[1:Ho + 1, 1:Wo + 1, :] = h.reshape(Ho, Wo, Cop)
        hv = hpad_ref[...]

        # --- conv2: 3x3 / stride 1, 9 accumulating matmuls --------------------
        acc2 = jnp.zeros((Ho * Wo, Cop), jnp.float32)
        for dy, dx in taps:
            win = hv[dy:dy + Ho, dx:dx + Wo, :].reshape(Ho * Wo, Cop)
            acc2 = acc2 + jnp.dot(win.astype(jnp.bfloat16), w2_ref[dy * 3 + dx],
                                  preferred_element_type=jnp.float32)

        # --- residual, fused: identity or strided 1x1 shortcut conv -----------
        if equal:
            res = window(xv, 1, 1).reshape(Ho * Wo, Cop)          # raw x
        else:
            rwin = window(a, 1, 1).reshape(Ho * Wo, Cip).astype(jnp.bfloat16)
            res = jnp.dot(rwin, ws_ref[...], preferred_element_type=jnp.float32)

        o_ref[0] = (acc2 + res).reshape(Ho, Wo, Cop).astype(out_dtype)

    return kernel


def basic_block_fwd(x, p, stride, in_planes, out_planes, drop_rate,
                    activate_before_residual):
    """x: NHWC, channels already zero-padded to _cpad(in_planes)."""
    N, H, W, Cip = x.shape
    Cop = _cpad(out_planes)
    equal = in_planes == out_planes
    s = stride
    Ho = (H - 1) // s + 1
    Wo = (W - 1) // s + 1
    Hp = _round_up(max(H + 2, (Ho - 1) * s + 3), s)
    Wp = _round_up(max(W + 2, (Wo - 1) * s + 3), s)
    Hs, Ws = Hp // s, Wp // s

    # zero pad (conv padding=1) + same-size space-to-batch (phase plane) layout
    # so the kernel reads strided tap windows with static slices only.
    # This is NOT a 9x im2col materialisation.
    xpad = jnp.pad(x, ((0, 0), (1, Hp - H - 1), (1, Wp - W - 1), (0, 0)))
    xph = (xpad.reshape(N, Hs, s, Ws, s, Cip)
               .transpose(0, 2, 4, 1, 3, 5)
               .reshape(N, s * s, Hs, Ws, Cip))
    mask = _interior_mask(H, W, Hs, Ws, s)

    scale1, shift1 = _bn_affine(p["bn1_gamma"], p["bn1_beta"],
                                p["bn1_mean"], p["bn1_var"], Cip)
    scale2, shift2 = _bn_affine(p["bn2_gamma"], p["bn2_beta"],
                                p["bn2_mean"], p["bn2_var"], Cop)
    w1 = _prep_conv3x3(p["conv1_w"], Cip, Cop)
    w2 = _prep_conv3x3(p["conv2_w"], Cop, Cop)

    inputs = [xph, mask, scale1, shift1, scale2, shift2, w1, w2]
    in_specs = [
        pl.BlockSpec((1, s * s, Hs, Ws, Cip), lambda n: (n, 0, 0, 0, 0)),
        pl.BlockSpec((s * s, Hs, Ws, 1), lambda n: (0, 0, 0, 0)),
        pl.BlockSpec((1, Cip), lambda n: (0, 0)),
        pl.BlockSpec((1, Cip), lambda n: (0, 0)),
        pl.BlockSpec((1, Cop), lambda n: (0, 0)),
        pl.BlockSpec((1, Cop), lambda n: (0, 0)),
        pl.BlockSpec((9, Cip, Cop), lambda n: (0, 0, 0)),
        pl.BlockSpec((9, Cop, Cop), lambda n: (0, 0, 0)),
    ]
    if not equal:
        inputs.append(_prep_conv1x1(p["convShortcut_w"], Cip, Cop))
        in_specs.append(pl.BlockSpec((Cip, Cop), lambda n: (0, 0)))

    kernel = _make_block_kernel(s=s, Ho=Ho, Wo=Wo, Cip=Cip, Cop=Cop,
                                equal=equal, abr=activate_before_residual,
                                out_dtype=x.dtype)

    flops = 2 * N * Ho * Wo * (9 * Cip * Cop + 9 * Cop * Cop
                               + (0 if equal else Cip * Cop))
    bytes_accessed = (xph.size * xph.dtype.itemsize + w1.size * 2 + w2.size * 2
                      + N * Ho * Wo * Cop * x.dtype.itemsize)

    return pl.pallas_call(
        kernel,
        out_shape=jax.ShapeDtypeStruct((N, Ho, Wo, Cop), x.dtype),
        grid=(N,),
        in_specs=in_specs,
        out_specs=pl.BlockSpec((1, Ho, Wo, Cop), lambda n: (n, 0, 0, 0)),
        scratch_shapes=[pltpu.VMEM((Ho + 2, Wo + 2, Cop), jnp.float32)],
        compiler_params=pltpu.CompilerParams(
            dimension_semantics=("parallel",),
            vmem_limit_bytes=64 * 1024 * 1024),
        cost_estimate=pl.CostEstimate(flops=flops, transcendentals=0,
                                      bytes_accessed=bytes_accessed),
    )(*inputs)


# ------------------------------- parameters ----------------------------------

def init_basic_block(key, in_planes, out_planes):
    ks = jax.random.split(key, 7)

    def conv_w(k, cout, cin, kh, kw):
        fan = cin * kh * kw
        return jax.random.normal(k, (cout, cin, kh, kw), jnp.float32) * jnp.sqrt(2.0 / fan)

    p = {
        "bn1_gamma": 1.0 + 0.1 * jax.random.normal(ks[0], (in_planes,), jnp.float32),
        "bn1_beta": 0.1 * jax.random.normal(ks[1], (in_planes,), jnp.float32),
        "bn1_mean": 0.05 * jax.random.normal(ks[2], (in_planes,), jnp.float32),
        "bn1_var": 1.0 + 0.1 * jax.random.uniform(ks[3], (in_planes,), jnp.float32),
        "conv1_w": conv_w(ks[4], out_planes, in_planes, 3, 3),
        "bn2_gamma": jnp.ones((out_planes,), jnp.float32),
        "bn2_beta": jnp.zeros((out_planes,), jnp.float32),
        "bn2_mean": jnp.zeros((out_planes,), jnp.float32),
        "bn2_var": jnp.ones((out_planes,), jnp.float32),
        "conv2_w": conv_w(ks[5], out_planes, out_planes, 3, 3),
    }
    if in_planes != out_planes:
        p["convShortcut_w"] = conv_w(ks[6], out_planes, in_planes, 1, 1)
    return p


def init_network_block(key, nb_layers, in_planes, out_planes):
    keys = jax.random.split(key, nb_layers)
    params = []
    for i in range(nb_layers):
        cin = in_planes if i == 0 else out_planes
        params.append(init_basic_block(keys[i], cin, out_planes))
    return params


# ------------------------------ NetworkBlock ----------------------------------

def network_block_fwd(x_nchw, params, nb_layers, in_planes, out_planes, stride,
                      drop_rate=0.0, activate_before_residual=False):
    # NCHW (PyTorch) -> NHWC, pad channels once to 128 lanes (zeros propagate
    # as exact zeros through every block), slice once at the end.
    x = jnp.transpose(x_nchw, (0, 2, 3, 1))
    x = _pad_last(x, _cpad(in_planes))
    for i in range(nb_layers):
        cin = in_planes if i == 0 else out_planes
        s = stride if i == 0 else 1
        x = basic_block_fwd(x, params[i], s, cin, out_planes, drop_rate,
                            activate_before_residual)
    x = x[..., :out_planes]
    return jnp.transpose(x, (0, 3, 1, 2))


# ----------------------------------- main --------------------------------------

if __name__ == "__main__":
    key = jax.random.PRNGKey(0)
    k_x, k_p = jax.random.split(key)

    # NetworkBlock(nb_layers=2, in_planes=4, out_planes=8, block=BasicBlock,
    #              stride=2, dropRate=0.0, activate_before_residual=True)
    nb_layers, in_planes, out_planes, stride = 2, 4, 8, 2
    x = jax.random.normal(k_x, (2, in_planes, 16, 16), jnp.float32)   # NCHW

    params = init_network_block(k_p, nb_layers, in_planes, out_planes)

    fwd = jax.jit(functools.partial(
        network_block_fwd, nb_layers=nb_layers, in_planes=in_planes,
        out_planes=out_planes, stride=stride, drop_rate=0.0,
        activate_before_residual=True))

    y = fwd(x, params)
    jax.block_until_ready(y)
    assert y.shape == (2, out_planes, 8, 8), y.shape
    print("KERNEL_OK")
</pallas_src>

<mosaic_0001>
module attributes {stable_mosaic.version = 11 : i64} {
  func.func @kernel(%arg0: i32, %arg1: memref<1x4x9x9x128xf32, #tpu.memory_space<vmem>>, %arg2: memref<4x9x9x1xf32, #tpu.memory_space<vmem>>, %arg3: memref<1x128xf32, #tpu.memory_space<vmem>>, %arg4: memref<1x128xf32, #tpu.memory_space<vmem>>, %arg5: memref<1x128xf32, #tpu.memory_space<vmem>>, %arg6: memref<1x128xf32, #tpu.memory_space<vmem>>, %arg7: memref<9x128x128xbf16, #tpu.memory_space<vmem>>, %arg8: memref<9x128x128xbf16, #tpu.memory_space<vmem>>, %arg9: memref<128x128xbf16, #tpu.memory_space<vmem>>, %arg10: memref<1x8x8x128xf32, #tpu.memory_space<vmem>>, %arg11: memref<10x10x128xf32, #tpu.memory_space<vmem>>) attributes {dimension_semantics = [#tpu.dimension_semantics<parallel>], iteration_bounds = array<i64: 2>, scalar_prefetch = 0 : i64, scratch_operands = 1 : i64, tpu.core_type = #tpu.core_type<tc>, window_params = [{transform_indices = @transform_0, window_bounds = array<i64: 1, 4, 9, 9, 128>}, {pipeline_mode = #tpu.pipeline_mode<synchronous>, transform_indices = @transform_1, window_bounds = array<i64: 4, 9, 9, 1>}, {pipeline_mode = #tpu.pipeline_mode<synchronous>, transform_indices = @transform_2, window_bounds = array<i64: 1, 128>}, {pipeline_mode = #tpu.pipeline_mode<synchronous>, transform_indices = @transform_3, window_bounds = array<i64: 1, 128>}, {pipeline_mode = #tpu.pipeline_mode<synchronous>, transform_indices = @transform_4, window_bounds = array<i64: 1, 128>}, {pipeline_mode = #tpu.pipeline_mode<synchronous>, transform_indices = @transform_5, window_bounds = array<i64: 1, 128>}, {pipeline_mode = #tpu.pipeline_mode<synchronous>, transform_indices = @transform_6, window_bounds = array<i64: 9, 128, 128>}, {pipeline_mode = #tpu.pipeline_mode<synchronous>, transform_indices = @transform_7, window_bounds = array<i64: 9, 128, 128>}, {pipeline_mode = #tpu.pipeline_mode<synchronous>, transform_indices = @transform_8, window_bounds = array<i64: 128, 128>}, {transform_indices = @transform_9, window_bounds = array<i64: 1, 8, 8, 128>}]} {
    %c0 = arith.constant 0 : index
    %c0_0 = arith.constant 0 : index
    %c0_1 = arith.constant 0 : index
    %c0_2 = arith.constant 0 : index
    %c0_3 = arith.constant 0 : index
    %0 = vector.load %arg1[%c0, %c0_0, %c0_1, %c0_2, %c0_3] : memref<1x4x9x9x128xf32, #tpu.memory_space<vmem>>, vector<1x4x9x9x128xf32>
    %1 = vector.shape_cast %0 : vector<1x4x9x9x128xf32> to vector<4x9x9x128xf32>
    %c0_4 = arith.constant 0 : index
    %c0_5 = arith.constant 0 : index
    %2 = vector.load %arg3[%c0_4, %c0_5] : memref<1x128xf32, #tpu.memory_space<vmem>>, vector<1x128xf32>
    %3 = vector.shape_cast %2 : vector<1x128xf32> to vector<128xf32>
    %4 = vector.shape_cast %3 : vector<128xf32> to vector<1x1x1x128xf32>
    %5 = vector.broadcast %4 : vector<1x1x1x128xf32> to vector<4x9x9x128xf32>
    %6 = arith.mulf %1, %5 : vector<4x9x9x128xf32>
    %c0_6 = arith.constant 0 : index
    %c0_7 = arith.constant 0 : index
    %7 = vector.load %arg4[%c0_6, %c0_7] : memref<1x128xf32, #tpu.memory_space<vmem>>, vector<1x128xf32>
    %8 = vector.shape_cast %7 : vector<1x128xf32> to vector<128xf32>
    %9 = vector.shape_cast %8 : vector<128xf32> to vector<1x1x1x128xf32>
    %10 = vector.broadcast %9 : vector<1x1x1x128xf32> to vector<4x9x9x128xf32>
    %11 = arith.addf %6, %10 : vector<4x9x9x128xf32>
    %cst = arith.constant 0.000000e+00 : f32
    %12 = vector.broadcast %cst : f32 to vector<4x9x9x128xf32>
    %13 = arith.cmpf ogt, %11, %12 : vector<4x9x9x128xf32>
    %cst_8 = arith.constant 1.000000e-01 : f32
    %14 = vector.broadcast %cst_8 : f32 to vector<4x9x9x128xf32>
    %15 = arith.mulf %14, %11 : vector<4x9x9x128xf32>
    %16 = arith.select %13, %11, %15 : vector<4x9x9x128xi1>, vector<4x9x9x128xf32>
    %c0_9 = arith.constant 0 : index
    %c0_10 = arith.constant 0 : index
    %c0_11 = arith.constant 0 : index
    %c0_12 = arith.constant 0 : index
    %17 = vector.load %arg2[%c0_9, %c0_10, %c0_11, %c0_12] : memref<4x9x9x1xf32, #tpu.memory_space<vmem>>, vector<4x9x9x1xf32>
    %18 = vector.broadcast %17 : vector<4x9x9x1xf32> to vector<4x9x9x128xf32>
    %19 = arith.mulf %16, %18 : vector<4x9x9x128xf32>
    %cst_13 = arith.constant 0.000000e+00 : f32
    %20 = vector.broadcast %cst_13 : f32 to vector<64x128xf32>
    %21 = vector.extract_strided_slice %19 {offsets = [0, 0, 0, 0], sizes = [1, 8, 8, 128], strides = [1, 1, 1, 1]} : vector<4x9x9x128xf32> to vector<1x8x8x128xf32>
    %22 = vector.shape_cast %21 : vector<1x8x8x128xf32> to vector<8x8x128xf32>
    %23 = vector.shape_cast %22 : vector<8x8x128xf32> to vector<64x128xf32>
    %24 = arith.truncf %23 : vector<64x128xf32> to vector<64x128xbf16>
    %c0_14 = arith.constant 0 : index
    %c0_15 = arith.constant 0 : index
    %c0_16 = arith.constant 0 : index
    %25 = vector.load %arg7[%c0_14, %c0_15, %c0_16] : memref<9x128x128xbf16, #tpu.memory_space<vmem>>, vector<1x128x128xbf16>
    %26 = vector.shape_cast %25 : vector<1x128x128xbf16> to vector<128x128xbf16>
    %cst_17 = arith.constant dense<0.000000e+00> : vector<64x128xf32>
    %27 = tpu.matmul %24, %26, %cst_17 {dimension_numbers = #tpu.dot_dimension_numbers<[1], [0], [0], [1], [0, 0, 1, 1], [], []>} : vector<64x128xbf16>, vector<128x128xbf16>, vector<64x128xf32> -> vector<64x128xf32>
    %28 = arith.addf %20, %27 : vector<64x128xf32>
    %29 = vector.extract_strided_slice %19 {offsets = [1, 0, 0, 0], sizes = [1, 8, 8, 128], strides = [1, 1, 1, 1]} : vector<4x9x9x128xf32> to vector<1x8x8x128xf32>
    %30 = vector.shape_cast %29 : vector<1x8x8x128xf32> to vector<8x8x128xf32>
    %31 = vector.shape_cast %30 : vector<8x8x128xf32> to vector<64x128xf32>
    %32 = arith.truncf %31 : vector<64x128xf32> to vector<64x128xbf16>
    %c1 = arith.constant 1 : index
    %c0_18 = arith.constant 0 : index
    %c0_19 = arith.constant 0 : index
    %33 = vector.load %arg7[%c1, %c0_18, %c0_19] : memref<9x128x128xbf16, #tpu.memory_space<vmem>>, vector<1x128x128xbf16>
    %34 = vector.shape_cast %33 : vector<1x128x128xbf16> to vector<128x128xbf16>
    %cst_20 = arith.constant dense<0.000000e+00> : vector<64x128xf32>
    %35 = tpu.matmul %32, %34, %cst_20 {dimension_numbers = #tpu.dot_dimension_numbers<[1], [0], [0], [1], [0, 0, 1, 1], [], []>} : vector<64x128xbf16>, vector<128x128xbf16>, vector<64x128xf32> -> vector<64x128xf32>
    %36 = arith.addf %28, %35 : vector<64x128xf32>
    %37 = vector.extract_strided_slice %19 {offsets = [0, 0, 1, 0], sizes = [1, 8, 8, 128], strides = [1, 1, 1, 1]} : vector<4x9x9x128xf32> to vector<1x8x8x128xf32>
    %38 = vector.shape_cast %37 : vector<1x8x8x128xf32> to vector<8x8x128xf32>
    %39 = vector.shape_cast %38 : vector<8x8x128xf32> to vector<64x128xf32>
    %40 = arith.truncf %39 : vector<64x128xf32> to vector<64x128xbf16>
    %c2 = arith.constant 2 : index
    %c0_21 = arith.constant 0 : index
    %c0_22 = arith.constant 0 : index
    %41 = vector.load %arg7[%c2, %c0_21, %c0_22] : memref<9x128x128xbf16, #tpu.memory_space<vmem>>, vector<1x128x128xbf16>
    %42 = vector.shape_cast %41 : vector<1x128x128xbf16> to vector<128x128xbf16>
    %cst_23 = arith.constant dense<0.000000e+00> : vector<64x128xf32>
    %43 = tpu.matmul %40, %42, %cst_23 {dimension_numbers = #tpu.dot_dimension_numbers<[1], [0], [0], [1], [0, 0, 1, 1], [], []>} : vector<64x128xbf16>, vector<128x128xbf16>, vector<64x128xf32> -> vector<64x128xf32>
    %44 = arith.addf %36, %43 : vector<64x128xf32>
    %45 = vector.extract_strided_slice %19 {offsets = [2, 0, 0, 0], sizes = [1, 8, 8, 128], strides = [1, 1, 1, 1]} : vector<4x9x9x128xf32> to vector<1x8x8x128xf32>
    %46 = vector.shape_cast %45 : vector<1x8x8x128xf32> to vector<8x8x128xf32>
    %47 = vector.shape_cast %46 : vector<8x8x128xf32> to vector<64x128xf32>
    %48 = arith.truncf %47 : vector<64x128xf32> to vector<64x128xbf16>
    %c3 = arith.constant 3 : index
    %c0_24 = arith.constant 0 : index
    %c0_25 = arith.constant 0 : index
    %49 = vector.load %arg7[%c3, %c0_24, %c0_25] : memref<9x128x128xbf16, #tpu.memory_space<vmem>>, vector<1x128x128xbf16>
    %50 = vector.shape_cast %49 : vector<1x128x128xbf16> to vector<128x128xbf16>
    %cst_26 = arith.constant dense<0.000000e+00> : vector<64x128xf32>
    %51 = tpu.matmul %48, %50, %cst_26 {dimension_numbers = #tpu.dot_dimension_numbers<[1], [0], [0], [1], [0, 0, 1, 1], [], []>} : vector<64x128xbf16>, vector<128x128xbf16>, vector<64x128xf32> -> vector<64x128xf32>
    %52 = arith.addf %44, %51 : vector<64x128xf32>
    %53 = vector.extract_strided_slice %19 {offsets = [3, 0, 0, 0], sizes = [1, 8, 8, 128], strides = [1, 1, 1, 1]} : vector<4x9x9x128xf32> to vector<1x8x8x128xf32>
    %54 = vector.shape_cast %53 : vector<1x8x8x128xf32> to vector<8x8x128xf32>
    %55 = vector.shape_cast %54 : vector<8x8x128xf32> to vector<64x128xf32>
    %56 = arith.truncf %55 : vector<64x128xf32> to vector<64x128xbf16>
    %c4 = arith.constant 4 : index
    %c0_27 = arith.constant 0 : index
    %c0_28 = arith.constant 0 : index
    %57 = vector.load %arg7[%c4, %c0_27, %c0_28] : memref<9x128x128xbf16, #tpu.memory_space<vmem>>, vector<1x128x128xbf16>
    %58 = vector.shape_cast %57 : vector<1x128x128xbf16> to vector<128x128xbf16>
    %cst_29 = arith.constant dense<0.000000e+00> : vector<64x128xf32>
    %59 = tpu.matmul %56, %58, %cst_29 {dimension_numbers = #tpu.dot_dimension_numbers<[1], [0], [0], [1], [0, 0, 1, 1], [], []>} : vector<64x128xbf16>, vector<128x128xbf16>, vector<64x128xf32> -> vector<64x128xf32>
    %60 = arith.addf %52, %59 : vector<64x128xf32>
    %61 = vector.extract_strided_slice %19 {offsets = [2, 0, 1, 0], sizes = [1, 8, 8, 128], strides = [1, 1, 1, 1]} : vector<4x9x9x128xf32> to vector<1x8x8x128xf32>
    %62 = vector.shape_cast %61 : vector<1x8x8x128xf32> to vector<8x8x128xf32>
    %63 = vector.shape_cast %62 : vector<8x8x128xf32> to vector<64x128xf32>
    %64 = arith.truncf %63 : vector<64x128xf32> to vector<64x128xbf16>
    %c5 = arith.constant 5 : index
    %c0_30 = arith.constant 0 : index
    %c0_31 = arith.constant 0 : index
    %65 = vector.load %arg7[%c5, %c0_30, %c0_31] : memref<9x128x128xbf16, #tpu.memory_space<vmem>>, vector<1x128x128xbf16>
    %66 = vector.shape_cast %65 : vector<1x128x128xbf16> to vector<128x128xbf16>
    %cst_32 = arith.constant dense<0.000000e+00> : vector<64x128xf32>
    %67 = tpu.matmul %64, %66, %cst_32 {dimension_numbers = #tpu.dot_dimension_numbers<[1], [0], [0], [1], [0, 0, 1, 1], [], []>} : vector<64x128xbf16>, vector<128x128xbf16>, vector<64x128xf32> -> vector<64x128xf32>
    %68 = arith.addf %60, %67 : vector<64x128xf32>
    %69 = vector.extract_strided_slice %19 {offsets = [0, 1, 0, 0], sizes = [1, 8, 8, 128], strides = [1, 1, 1, 1]} : vector<4x9x9x128xf32> to vector<1x8x8x128xf32>
    %70 = vector.shape_cast %69 : vector<1x8x8x128xf32> to vector<8x8x128xf32>
    %71 = vector.shape_cast %70 : vector<8x8x128xf32> to vector<64x128xf32>
    %72 = arith.truncf %71 : vector<64x128xf32> to vector<64x128xbf16>
    %c6 = arith.constant 6 : index
    %c0_33 = arith.constant 0 : index
    %c0_34 = arith.constant 0 : index
    %73 = vector.load %arg7[%c6, %c0_33, %c0_34] : memref<9x128x128xbf16, #tpu.memory_space<vmem>>, vector<1x128x128xbf16>
    %74 = vector.shape_cast %73 : vector<1x128x128xbf16> to vector<128x128xbf16>
    %cst_35 = arith.constant dense<0.000000e+00> : vector<64x128xf32>
    %75 = tpu.matmul %72, %74, %cst_35 {dimension_numbers = #tpu.dot_dimension_numbers<[1], [0], [0], [1], [0, 0, 1, 1], [], []>} : vector<64x128xbf16>, vector<128x128xbf16>, vector<64x128xf32> -> vector<64x128xf32>
    %76 = arith.addf %68, %75 : vector<64x128xf32>
    %77 = vector.extract_strided_slice %19 {offsets = [1, 1, 0, 0], sizes = [1, 8, 8, 128], strides = [1, 1, 1, 1]} : vector<4x9x9x128xf32> to vector<1x8x8x128xf32>
    %78 = vector.shape_cast %77 : vector<1x8x8x128xf32> to vector<8x8x128xf32>
    %79 = vector.shape_cast %78 : vector<8x8x128xf32> to vector<64x128xf32>
    %80 = arith.truncf %79 : vector<64x128xf32> to vector<64x128xbf16>
    %c7 = arith.constant 7 : index
    %c0_36 = arith.constant 0 : index
    %c0_37 = arith.constant 0 : index
    %81 = vector.load %arg7[%c7, %c0_36, %c0_37] : memref<9x128x128xbf16, #tpu.memory_space<vmem>>, vector<1x128x128xbf16>
    %82 = vector.shape_cast %81 : vector<1x128x128xbf16> to vector<128x128xbf16>
    %cst_38 = arith.constant dense<0.000000e+00> : vector<64x128xf32>
    %83 = tpu.matmul %80, %82, %cst_38 {dimension_numbers = #tpu.dot_dimension_numbers<[1], [0], [0], [1], [0, 0, 1, 1], [], []>} : vector<64x128xbf16>, vector<128x128xbf16>, vector<64x128xf32> -> vector<64x128xf32>
    %84 = arith.addf %76, %83 : vector<64x128xf32>
    %85 = vector.extract_strided_slice %19 {offsets = [0, 1, 1, 0], sizes = [1, 8, 8, 128], strides = [1, 1, 1, 1]} : vector<4x9x9x128xf32> to vector<1x8x8x128xf32>
    %86 = vector.shape_cast %85 : vector<1x8x8x128xf32> to vector<8x8x128xf32>
    %87 = vector.shape_cast %86 : vector<8x8x128xf32> to vector<64x128xf32>
    %88 = arith.truncf %87 : vector<64x128xf32> to vector<64x128xbf16>
    %c8 = arith.constant 8 : index
    %c0_39 = arith.constant 0 : index
    %c0_40 = arith.constant 0 : index
    %89 = vector.load %arg7[%c8, %c0_39, %c0_40] : memref<9x128x128xbf16, #tpu.memory_space<vmem>>, vector<1x128x128xbf16>
    %90 = vector.shape_cast %89 : vector<1x128x128xbf16> to vector<128x128xbf16>
    %cst_41 = arith.constant dense<0.000000e+00> : vector<64x128xf32>
    %91 = tpu.matmul %88, %90, %cst_41 {dimension_numbers = #tpu.dot_dimension_numbers<[1], [0], [0], [1], [0, 0, 1, 1], [], []>} : vector<64x128xbf16>, vector<128x128xbf16>, vector<64x128xf32> -> vector<64x128xf32>
    %92 = arith.addf %84, %91 : vector<64x128xf32>
    %c0_42 = arith.constant 0 : index
    %c0_43 = arith.constant 0 : index
    %93 = vector.load %arg5[%c0_42, %c0_43] : memref<1x128xf32, #tpu.memory_space<vmem>>, vector<1x128xf32>
    %94 = vector.broadcast %93 : vector<1x128xf32> to vector<64x128xf32>
    %95 = arith.mulf %92, %94 : vector<64x128xf32>
    %c0_44 = arith.constant 0 : index
    %c0_45 = arith.constant 0 : index
    %96 = vector.load %arg6[%c0_44, %c0_45] : memref<1x128xf32, #tpu.memory_space<vmem>>, vector<1x128xf32>
    %97 = vector.broadcast %96 : vector<1x128xf32> to vector<64x128xf32>
    %98 = arith.addf %95, %97 : vector<64x128xf32>
    %cst_46 = arith.constant 0.000000e+00 : f32
    %99 = vector.broadcast %cst_46 : f32 to vector<64x128xf32>
    %100 = arith.cmpf ogt, %98, %99 : vector<64x128xf32>
    %cst_47 = arith.constant 1.000000e-01 : f32
    %101 = vector.broadcast %cst_47 : f32 to vector<64x128xf32>
    %102 = arith.mulf %101, %98 : vector<64x128xf32>
    %103 = arith.select %100, %98, %102 : vector<64x128xi1>, vector<64x128xf32>
    %cst_48 = arith.constant 0.000000e+00 : f32
    %104 = vector.broadcast %cst_48 : f32 to vector<10x10x128xf32>
    %c0_49 = arith.constant 0 : index
    %c0_50 = arith.constant 0 : index
    %c0_51 = arith.constant 0 : index
    %105 = vector.load %arg11[%c0_49, %c0_50, %c0_51] : memref<10x10x128xf32, #tpu.memory_space<vmem>>, vector<10x10x128xf32>
    tpu.vector_store %arg11[%c0_49, %c0_50, %c0_51], %104 {strides = array<i32>} : memref<10x10x128xf32, #tpu.memory_space<vmem>>, vector<10x10x128xf32>,
    %106 = vector.shape_cast %103 : vector<64x128xf32> to vector<8x8x128xf32>
    %c1_52 = arith.constant 1 : index
    %c1_53 = arith.constant 1 : index
    %c0_54 = arith.constant 0 : index
    %107 = vector.load %arg11[%c1_52, %c1_53, %c0_54] : memref<10x10x128xf32, #tpu.memory_space<vmem>>, vector<8x8x128xf32>
    tpu.vector_store %arg11[%c1_52, %c1_53, %c0_54], %106 {strides = array<i32>} : memref<10x10x128xf32, #tpu.memory_space<vmem>>, vector<8x8x128xf32>,
    %c0_55 = arith.constant 0 : index
    %c0_56 = arith.constant 0 : index
    %c0_57 = arith.constant 0 : index
    %108 = vector.load %arg11[%c0_55, %c0_56, %c0_57] : memref<10x10x128xf32, #tpu.memory_space<vmem>>, vector<10x10x128xf32>
    %cst_58 = arith.constant 0.000000e+00 : f32
    %109 = vector.broadcast %cst_58 : f32 to vector<64x128xf32>
    %110 = vector.extract_strided_slice %108 {offsets = [0, 0, 0], sizes = [8, 8, 128], strides = [1, 1, 1]} : vector<10x10x128xf32> to vector<8x8x128xf32>
    %111 = vector.shape_cast %110 : vector<8x8x128xf32> to vector<64x128xf32>
    %112 = arith.truncf %111 : vector<64x128xf32> to vector<64x128xbf16>
    %c0_59 = arith.constant 0 : index
    %c0_60 = arith.constant 0 : index
    %c0_61 = arith.constant 0 : index
    %113 = vector.load %arg8[%c0_59, %c0_60, %c0_61] : memref<9x128x128xbf16, #tpu.memory_space<vmem>>, vector<1x128x128xbf16>
    %114 = vector.shape_cast %113 : vector<1x128x128xbf16> to vector<128x128xbf16>
    %cst_62 = arith.constant dense<0.000000e+00> : vector<64x128xf32>
    %115 = tpu.matmul %112, %114, %cst_62 {dimension_numbers = #tpu.dot_dimension_numbers<[1], [0], [0], [1], [0, 0, 1, 1], [], []>} : vector<64x128xbf16>, vector<128x128xbf16>, vector<64x128xf32> -> vector<64x128xf32>
    %116 = arith.addf %109, %115 : vector<64x128xf32>
    %117 = vector.extract_strided_slice %108 {offsets = [0, 1, 0], sizes = [8, 8, 128], strides = [1, 1, 1]} : vector<10x10x128xf32> to vector<8x8x128xf32>
    %118 = vector.shape_cast %117 : vector<8x8x128xf32> to vector<64x128xf32>
    %119 = arith.truncf %118 : vector<64x128xf32> to vector<64x128xbf16>
    %c1_63 = arith.constant 1 : index
    %c0_64 = arith.constant 0 : index
    %c0_65 = arith.constant 0 : index
    %120 = vector.load %arg8[%c1_63, %c0_64, %c0_65] : memref<9x128x128xbf16, #tpu.memory_space<vmem>>, vector<1x128x128xbf16>
    %121 = vector.shape_cast %120 : vector<1x128x128xbf16> to vector<128x128xbf16>
    %cst_66 = arith.constant dense<0.000000e+00> : vector<64x128xf32>
    %122 = tpu.matmul %119, %121, %cst_66 {dimension_numbers = #tpu.dot_dimension_numbers<[1], [0], [0], [1], [0, 0, 1, 1], [], []>} : vector<64x128xbf16>, vector<128x128xbf16>, vector<64x128xf32> -> vector<64x128xf32>
    %123 = arith.addf %116, %122 : vector<64x128xf32>
    %124 = vector.extract_strided_slice %108 {offsets = [0, 2, 0], sizes = [8, 8, 128], strides = [1, 1, 1]} : vector<10x10x128xf32> to vector<8x8x128xf32>
    %125 = vector.shape_cast %124 : vector<8x8x128xf32> to vector<64x128xf32>
    %126 = arith.truncf %125 : vector<64x128xf32> to vector<64x128xbf16>
    %c2_67 = arith.constant 2 : index
    %c0_68 = arith.constant 0 : index
    %c0_69 = arith.constant 0 : index
    %127 = vector.load %arg8[%c2_67, %c0_68, %c0_69] : memref<9x128x128xbf16, #tpu.memory_space<vmem>>, vector<1x128x128xbf16>
    %128 = vector.shape_cast %127 : vector<1x128x128xbf16> to vector<128x128xbf16>
    %cst_70 = arith.constant dense<0.000000e+00> : vector<64x128xf32>
    %129 = tpu.matmul %126, %128, %cst_70 {dimension_numbers = #tpu.dot_dimension_numbers<[1], [0], [0], [1], [0, 0, 1, 1], [], []>} : vector<64x128xbf16>, vector<128x128xbf16>, vector<64x128xf32> -> vector<64x128xf32>
    %130 = arith.addf %123, %129 : vector<64x128xf32>
    %131 = vector.extract_strided_slice %108 {offsets = [1, 0, 0], sizes = [8, 8, 128], strides = [1, 1, 1]} : vector<10x10x128xf32> to vector<8x8x128xf32>
    %132 = vector.shape_cast %131 : vector<8x8x128xf32> to vector<64x128xf32>
    %133 = arith.truncf %132 : vector<64x128xf32> to vector<64x128xbf16>
    %c3_71 = arith.constant 3 : index
    %c0_72 = arith.constant 0 : index
    %c0_73 = arith.constant 0 : index
    %134 = vector.load %arg8[%c3_71, %c0_72, %c0_73] : memref<9x128x128xbf16, #tpu.memory_space<vmem>>, vector<1x128x128xbf16>
    %135 = vector.shape_cast %134 : vector<1x128x128xbf16> to vector<128x128xbf16>
    %cst_74 = arith.constant dense<0.000000e+00> : vector<64x128xf32>
    %136 = tpu.matmul %133, %135, %cst_74 {dimension_numbers = #tpu.dot_dimension_numbers<[1], [0], [0], [1], [0, 0, 1, 1], [], []>} : vector<64x128xbf16>, vector<128x128xbf16>, vector<64x128xf32> -> vector<64x128xf32>
    %137 = arith.addf %130, %136 : vector<64x128xf32>
    %138 = vector.extract_strided_slice %108 {offsets = [1, 1, 0], sizes = [8, 8, 128], strides = [1, 1, 1]} : vector<10x10x128xf32> to vector<8x8x128xf32>
    %139 = vector.shape_cast %138 : vector<8x8x128xf32> to vector<64x128xf32>
    %140 = arith.truncf %139 : vector<64x128xf32> to vector<64x128xbf16>
    %c4_75 = arith.constant 4 : index
    %c0_76 = arith.constant 0 : index
    %c0_77 = arith.constant 0 : index
    %141 = vector.load %arg8[%c4_75, %c0_76, %c0_77] : memref<9x128x128xbf16, #tpu.memory_space<vmem>>, vector<1x128x128xbf16>
    %142 = vector.shape_cast %141 : vector<1x128x128xbf16> to vector<128x128xbf16>
    %cst_78 = arith.constant dense<0.000000e+00> : vector<64x128xf32>
    %143 = tpu.matmul %140, %142, %cst_78 {dimension_numbers = #tpu.dot_dimension_numbers<[1], [0], [0], [1], [0, 0, 1, 1], [], []>} : vector<64x128xbf16>, vector<128x128xbf16>, vector<64x128xf32> -> vector<64x128xf32>
    %144 = arith.addf %137, %143 : vector<64x128xf32>
    %145 = vector.extract_strided_slice %108 {offsets = [1, 2, 0], sizes = [8, 8, 128], strides = [1, 1, 1]} : vector<10x10x128xf32> to vector<8x8x128xf32>
    %146 = vector.shape_cast %145 : vector<8x8x128xf32> to vector<64x128xf32>
    %147 = arith.truncf %146 : vector<64x128xf32> to vector<64x128xbf16>
    %c5_79 = arith.constant 5 : index
    %c0_80 = arith.constant 0 : index
    %c0_81 = arith.constant 0 : index
    %148 = vector.load %arg8[%c5_79, %c0_80, %c0_81] : memref<9x128x128xbf16, #tpu.memory_space<vmem>>, vector<1x128x128xbf16>
    %149 = vector.shape_cast %148 : vector<1x128x128xbf16> to vector<128x128xbf16>
    %cst_82 = arith.constant dense<0.000000e+00> : vector<64x128xf32>
    %150 = tpu.matmul %147, %149, %cst_82 {dimension_numbers = #tpu.dot_dimension_numbers<[1], [0], [0], [1], [0, 0, 1, 1], [], []>} : vector<64x128xbf16>, vector<128x128xbf16>, vector<64x128xf32> -> vector<64x128xf32>
    %151 = arith.addf %144, %150 : vector<64x128xf32>
    %152 = vector.extract_strided_slice %108 {offsets = [2, 0, 0], sizes = [8, 8, 128], strides = [1, 1, 1]} : vector<10x10x128xf32> to vector<8x8x128xf32>
    %153 = vector.shape_cast %152 : vector<8x8x128xf32> to vector<64x128xf32>
    %154 = arith.truncf %153 : vector<64x128xf32> to vector<64x128xbf16>
    %c6_83 = arith.constant 6 : index
    %c0_84 = arith.constant 0 : index
    %c0_85 = arith.constant 0 : index
    %155 = vector.load %arg8[%c6_83, %c0_84, %c0_85] : memref<9x128x128xbf16, #tpu.memory_space<vmem>>, vector<1x128x128xbf16>
    %156 = vector.shape_cast %155 : vector<1x128x128xbf16> to vector<128x128xbf16>
    %cst_86 = arith.constant dense<0.000000e+00> : vector<64x128xf32>
    %157 = tpu.matmul %154, %156, %cst_86 {dimension_numbers = #tpu.dot_dimension_numbers<[1], [0], [0], [1], [0, 0, 1, 1], [], []>} : vector<64x128xbf16>, vector<128x128xbf16>, vector<64x128xf32> -> vector<64x128xf32>
    %158 = arith.addf %151, %157 : vector<64x128xf32>
    %159 = vector.extract_strided_slice %108 {offsets = [2, 1, 0], sizes = [8, 8, 128], strides = [1, 1, 1]} : vector<10x10x128xf32> to vector<8x8x128xf32>
    %160 = vector.shape_cast %159 : vector<8x8x128xf32> to vector<64x128xf32>
    %161 = arith.truncf %160 : vector<64x128xf32> to vector<64x128xbf16>
    %c7_87 = arith.constant 7 : index
    %c0_88 = arith.constant 0 : index
    %c0_89 = arith.constant 0 : index
    %162 = vector.load %arg8[%c7_87, %c0_88, %c0_89] : memref<9x128x128xbf16, #tpu.memory_space<vmem>>, vector<1x128x128xbf16>
    %163 = vector.shape_cast %162 : vector<1x128x128xbf16> to vector<128x128xbf16>
    %cst_90 = arith.constant dense<0.000000e+00> : vector<64x128xf32>
    %164 = tpu.matmul %161, %163, %cst_90 {dimension_numbers = #tpu.dot_dimension_numbers<[1], [0], [0], [1], [0, 0, 1, 1], [], []>} : vector<64x128xbf16>, vector<128x128xbf16>, vector<64x128xf32> -> vector<64x128xf32>
    %165 = arith.addf %158, %164 : vector<64x128xf32>
    %166 = vector.extract_strided_slice %108 {offsets = [2, 2, 0], sizes = [8, 8, 128], strides = [1, 1, 1]} : vector<10x10x128xf32> to vector<8x8x128xf32>
    %167 = vector.shape_cast %166 : vector<8x8x128xf32> to vector<64x128xf32>
    %168 = arith.truncf %167 : vector<64x128xf32> to vector<64x128xbf16>
    %c8_91 = arith.constant 8 : index
    %c0_92 = arith.constant 0 : index
    %c0_93 = arith.constant 0 : index
    %169 = vector.load %arg8[%c8_91, %c0_92, %c0_93] : memref<9x128x128xbf16, #tpu.memory_space<vmem>>, vector<1x128x128xbf16>
    %170 = vector.shape_cast %169 : vector<1x128x128xbf16> to vector<128x128xbf16>
    %cst_94 = arith.constant dense<0.000000e+00> : vector<64x128xf32>
    %171 = tpu.matmul %168, %170, %cst_94 {dimension_numbers = #tpu.dot_dimension_numbers<[1], [0], [0], [1], [0, 0, 1, 1], [], []>} : vector<64x128xbf16>, vector<128x128xbf16>, vector<64x128xf32> -> vector<64x128xf32>
    %172 = arith.addf %165, %171 : vector<64x128xf32>
    %173 = vector.extract_strided_slice %19 {offsets = [3, 0, 0, 0], sizes = [1, 8, 8, 128], strides = [1, 1, 1, 1]} : vector<4x9x9x128xf32> to vector<1x8x8x128xf32>
    %174 = vector.shape_cast %173 : vector<1x8x8x128xf32> to vector<8x8x128xf32>
    %175 = vector.shape_cast %174 : vector<8x8x128xf32> to vector<64x128xf32>
    %176 = arith.truncf %175 : vector<64x128xf32> to vector<64x128xbf16>
    %c0_95 = arith.constant 0 : index
    %c0_96 = arith.constant 0 : index
    %177 = vector.load %arg9[%c0_95, %c0_96] : memref<128x128xbf16, #tpu.memory_space<vmem>>, vector<128x128xbf16>
    %cst_97 = arith.constant dense<0.000000e+00> : vector<64x128xf32>
    %178 = tpu.matmul %176, %177, %cst_97 {dimension_numbers = #tpu.dot_dimension_numbers<[1], [0], [0], [1], [0, 0, 1, 1], [], []>} : vector<64x128xbf16>, vector<128x128xbf16>, vector<64x128xf32> -> vector<64x128xf32>
    %179 = arith.addf %172, %178 : vector<64x128xf32>
    %180 = vector.shape_cast %179 : vector<64x128xf32> to vector<8x8x128xf32>
    %c0_98 = arith.constant 0 : index
    %c0_99 = arith.constant 0 : index
    %c0_100 = arith.constant 0 : index
    %c0_101 = arith.constant 0 : index
    %181 = vector.load %arg10[%c0_98, %c0_99, %c0_100, %c0_101] : memref<1x8x8x128xf32, #tpu.memory_space<vmem>>, vector<1x8x8x128xf32>
    %182 = vector.shape_cast %181 : vector<1x8x8x128xf32> to vector<8x8x128xf32>
    %183 = vector.shape_cast %180 : vector<8x8x128xf32> to vector<1x8x8x128xf32>
    tpu.vector_store %arg10[%c0_98, %c0_99, %c0_100, %c0_101], %183 {strides = array<i32>} : memref<1x8x8x128xf32, #tpu.memory_space<vmem>>, vector<1x8x8x128xf32>,
    return
  }
  func.func @transform_0(%arg0: i32) -> (i32, i32, i32, i32, i32) {
    %c0_i32 = arith.constant 0 : i32
    %c0_i32_0 = arith.constant 0 : i32
    %c0_i32_1 = arith.constant 0 : i32
    %c0_i32_2 = arith.constant 0 : i32
    %c0_i32_3 = arith.constant 0 : i32
    return %arg0, %c0_i32, %c0_i32_0, %c0_i32_1, %c0_i32_2 : i32, i32, i32, i32, i32
  }
  func.func @transform_1(%arg0: i32) -> (i32, i32, i32, i32) {
    %c0_i32 = arith.constant 0 : i32
    %c0_i32_0 = arith.constant 0 : i32
    %c0_i32_1 = arith.constant 0 : i32
    %c0_i32_2 = arith.constant 0 : i32
    %c0_i32_3 = arith.constant 0 : i32
    return %c0_i32, %c0_i32_0, %c0_i32_1, %c0_i32_2 : i32, i32, i32, i32
  }
  func.func @transform_2(%arg0: i32) -> (i32, i32) {
    %c0_i32 = arith.constant 0 : i32
    %c0_i32_0 = arith.constant 0 : i32
    %c0_i32_1 = arith.constant 0 : i32
    return %c0_i32, %c0_i32_0 : i32, i32
  }
  func.func @transform_3(%arg0: i32) -> (i32, i32) {
    %c0_i32 = arith.constant 0 : i32
    %c0_i32_0 = arith.constant 0 : i32
    %c0_i32_1 = arith.constant 0 : i32
    return %c0_i32, %c0_i32_0 : i32, i32
  }
  func.func @transform_4(%arg0: i32) -> (i32, i32) {
    %c0_i32 = arith.constant 0 : i32
    %c0_i32_0 = arith.constant 0 : i32
    %c0_i32_1 = arith.constant 0 : i32
    return %c0_i32, %c0_i32_0 : i32, i32
  }
  func.func @transform_5(%arg0: i32) -> (i32, i32) {
    %c0_i32 = arith.constant 0 : i32
    %c0_i32_0 = arith.constant 0 : i32
    %c0_i32_1 = arith.constant 0 : i32
    return %c0_i32, %c0_i32_0 : i32, i32
  }
  func.func @transform_6(%arg0: i32) -> (i32, i32, i32) {
    %c0_i32 = arith.constant 0 : i32
    %c0_i32_0 = arith.constant 0 : i32
    %c0_i32_1 = arith.constant 0 : i32
    %c0_i32_2 = arith.constant 0 : i32
    return %c0_i32, %c0_i32_0, %c0_i32_1 : i32, i32, i32
  }
  func.func @transform_7(%arg0: i32) -> (i32, i32, i32) {
    %c0_i32 = arith.constant 0 : i32
    %c0_i32_0 = arith.constant 0 : i32
    %c0_i32_1 = arith.constant 0 : i32
    %c0_i32_2 = arith.constant 0 : i32
    return %c0_i32, %c0_i32_0, %c0_i32_1 : i32, i32, i32
  }
  func.func @transform_8(%arg0: i32) -> (i32, i32) {
    %c0_i32 = arith.constant 0 : i32
    %c0_i32_0 = arith.constant 0 : i32
    %c0_i32_1 = arith.constant 0 : i32
    return %c0_i32, %c0_i32_0 : i32, i32
  }
  func.func @transform_9(%arg0: i32) -> (i32, i32, i32, i32) {
    %c0_i32 = arith.constant 0 : i32
    %c0_i32_0 = arith.constant 0 : i32
    %c0_i32_1 = arith.constant 0 : i32
    %c0_i32_2 = arith.constant 0 : i32
    return %arg0, %c0_i32, %c0_i32_0, %c0_i32_1 : i32, i32, i32, i32
  }
}

module attributes {stable_mosaic.version = 11 : i64} {
  func.func @kernel(%arg0: i32, %arg1: memref<1x1x10x10x128xf32, #tpu.memory_space<vmem>>, %arg2: memref<1x10x10x1xf32, #tpu.memory_space<vmem>>, %arg3: memref<1x128xf32, #tpu.memory_space<vmem>>, %arg4: memref<1x128xf32, #tpu.memory_space<vmem>>, %arg5: memref<1x128xf32, #tpu.memory_space<vmem>>, %arg6: memref<1x128xf32, #tpu.memory_space<vmem>>, %arg7: memref<9x128x128xbf16, #tpu.memory_space<vmem>>, %arg8: memref<9x128x128xbf16, #tpu.memory_space<vmem>>, %arg9: memref<1x8x8x128xf32, #tpu.memory_space<vmem>>, %arg10: memref<10x10x128xf32, #tpu.memory_space<vmem>>) attributes {dimension_semantics = [#tpu.dimension_semantics<parallel>], iteration_bounds = array<i64: 2>, scalar_prefetch = 0 : i64, scratch_operands = 1 : i64, tpu.core_type = #tpu.core_type<tc>, window_params = [{transform_indices = @transform_0, window_bounds = array<i64: 1, 1, 10, 10, 128>}, {pipeline_mode = #tpu.pipeline_mode<synchronous>, transform_indices = @transform_1, window_bounds = array<i64: 1, 10, 10, 1>}, {pipeline_mode = #tpu.pipeline_mode<synchronous>, transform_indices = @transform_2, window_bounds = array<i64: 1, 128>}, {pipeline_mode = #tpu.pipeline_mode<synchronous>, transform_indices = @transform_3, window_bounds = array<i64: 1, 128>}, {pipeline_mode = #tpu.pipeline_mode<synchronous>, transform_indices = @transform_4, window_bounds = array<i64: 1, 128>}, {pipeline_mode = #tpu.pipeline_mode<synchronous>, transform_indices = @transform_5, window_bounds = array<i64: 1, 128>}, {pipeline_mode = #tpu.pipeline_mode<synchronous>, transform_indices = @transform_6, window_bounds = array<i64: 9, 128, 128>}, {pipeline_mode = #tpu.pipeline_mode<synchronous>, transform_indices = @transform_7, window_bounds = array<i64: 9, 128, 128>}, {transform_indices = @transform_8, window_bounds = array<i64: 1, 8, 8, 128>}]} {
    %c0 = arith.constant 0 : index
    %c0_0 = arith.constant 0 : index
    %c0_1 = arith.constant 0 : index
    %c0_2 = arith.constant 0 : index
    %c0_3 = arith.constant 0 : index
    %0 = vector.load %arg1[%c0, %c0_0, %c0_1, %c0_2, %c0_3] : memref<1x1x10x10x128xf32, #tpu.memory_space<vmem>>, vector<1x1x10x10x128xf32>
    %1 = vector.shape_cast %0 : vector<1x1x10x10x128xf32> to vector<1x10x10x128xf32>
    %c0_4 = arith.constant 0 : index
    %c0_5 = arith.constant 0 : index
    %2 = vector.load %arg3[%c0_4, %c0_5] : memref<1x128xf32, #tpu.memory_space<vmem>>, vector<1x128xf32>
    %3 = vector.shape_cast %2 : vector<1x128xf32> to vector<128xf32>
    %4 = vector.shape_cast %3 : vector<128xf32> to vector<1x1x1x128xf32>
    %5 = vector.broadcast %4 : vector<1x1x1x128xf32> to vector<1x10x10x128xf32>
    %6 = arith.mulf %1, %5 : vector<1x10x10x128xf32>
    %c0_6 = arith.constant 0 : index
    %c0_7 = arith.constant 0 : index
    %7 = vector.load %arg4[%c0_6, %c0_7] : memref<1x128xf32, #tpu.memory_space<vmem>>, vector<1x128xf32>
    %8 = vector.shape_cast %7 : vector<1x128xf32> to vector<128xf32>
    %9 = vector.shape_cast %8 : vector<128xf32> to vector<1x1x1x128xf32>
    %10 = vector.broadcast %9 : vector<1x1x1x128xf32> to vector<1x10x10x128xf32>
    %11 = arith.addf %6, %10 : vector<1x10x10x128xf32>
    %cst = arith.constant 0.000000e+00 : f32
    %12 = vector.broadcast %cst : f32 to vector<1x10x10x128xf32>
    %13 = arith.cmpf ogt, %11, %12 : vector<1x10x10x128xf32>
    %cst_8 = arith.constant 1.000000e-01 : f32
    %14 = vector.broadcast %cst_8 : f32 to vector<1x10x10x128xf32>
    %15 = arith.mulf %14, %11 : vector<1x10x10x128xf32>
    %16 = arith.select %13, %11, %15 : vector<1x10x10x128xi1>, vector<1x10x10x128xf32>
    %c0_9 = arith.constant 0 : index
    %c0_10 = arith.constant 0 : index
    %c0_11 = arith.constant 0 : index
    %c0_12 = arith.constant 0 : index
    %17 = vector.load %arg2[%c0_9, %c0_10, %c0_11, %c0_12] : memref<1x10x10x1xf32, #tpu.memory_space<vmem>>, vector<1x10x10x1xf32>
    %18 = vector.broadcast %17 : vector<1x10x10x1xf32> to vector<1x10x10x128xf32>
    %19 = arith.mulf %16, %18 : vector<1x10x10x128xf32>
    %cst_13 = arith.constant 0.000000e+00 : f32
    %20 = vector.broadcast %cst_13 : f32 to vector<64x128xf32>
    %21 = vector.extract_strided_slice %19 {offsets = [0, 0, 0, 0], sizes = [1, 8, 8, 128], strides = [1, 1, 1, 1]} : vector<1x10x10x128xf32> to vector<1x8x8x128xf32>
    %22 = vector.shape_cast %21 : vector<1x8x8x128xf32> to vector<8x8x128xf32>
    %23 = vector.shape_cast %22 : vector<8x8x128xf32> to vector<64x128xf32>
    %24 = arith.truncf %23 : vector<64x128xf32> to vector<64x128xbf16>
    %c0_14 = arith.constant 0 : index
    %c0_15 = arith.constant 0 : index
    %c0_16 = arith.constant 0 : index
    %25 = vector.load %arg7[%c0_14, %c0_15, %c0_16] : memref<9x128x128xbf16, #tpu.memory_space<vmem>>, vector<1x128x128xbf16>
    %26 = vector.shape_cast %25 : vector<1x128x128xbf16> to vector<128x128xbf16>
    %cst_17 = arith.constant dense<0.000000e+00> : vector<64x128xf32>
    %27 = tpu.matmul %24, %26, %cst_17 {dimension_numbers = #tpu.dot_dimension_numbers<[1], [0], [0], [1], [0, 0, 1, 1], [], []>} : vector<64x128xbf16>, vector<128x128xbf16>, vector<64x128xf32> -> vector<64x128xf32>
    %28 = arith.addf %20, %27 : vector<64x128xf32>
    %29 = vector.extract_strided_slice %19 {offsets = [0, 0, 1, 0], sizes = [1, 8, 8, 128], strides = [1, 1, 1, 1]} : vector<1x10x10x128xf32> to vector<1x8x8x128xf32>
    %30 = vector.shape_cast %29 : vector<1x8x8x128xf32> to vector<8x8x128xf32>
    %31 = vector.shape_cast %30 : vector<8x8x128xf32> to vector<64x128xf32>
    %32 = arith.truncf %31 : vector<64x128xf32> to vector<64x128xbf16>
    %c1 = arith.constant 1 : index
    %c0_18 = arith.constant 0 : index
    %c0_19 = arith.constant 0 : index
    %33 = vector.load %arg7[%c1, %c0_18, %c0_19] : memref<9x128x128xbf16, #tpu.memory_space<vmem>>, vector<1x128x128xbf16>
    %34 = vector.shape_cast %33 : vector<1x128x128xbf16> to vector<128x128xbf16>
    %cst_20 = arith.constant dense<0.000000e+00> : vector<64x128xf32>
    %35 = tpu.matmul %32, %34, %cst_20 {dimension_numbers = #tpu.dot_dimension_numbers<[1], [0], [0], [1], [0, 0, 1, 1], [], []>} : vector<64x128xbf16>, vector<128x128xbf16>, vector<64x128xf32> -> vector<64x128xf32>
    %36 = arith.addf %28, %35 : vector<64x128xf32>
    %37 = vector.extract_strided_slice %19 {offsets = [0, 0, 2, 0], sizes = [1, 8, 8, 128], strides = [1, 1, 1, 1]} : vector<1x10x10x128xf32> to vector<1x8x8x128xf32>
    %38 = vector.shape_cast %37 : vector<1x8x8x128xf32> to vector<8x8x128xf32>
    %39 = vector.shape_cast %38 : vector<8x8x128xf32> to vector<64x128xf32>
    %40 = arith.truncf %39 : vector<64x128xf32> to vector<64x128xbf16>
    %c2 = arith.constant 2 : index
    %c0_21 = arith.constant 0 : index
    %c0_22 = arith.constant 0 : index
    %41 = vector.load %arg7[%c2, %c0_21, %c0_22] : memref<9x128x128xbf16, #tpu.memory_space<vmem>>, vector<1x128x128xbf16>
    %42 = vector.shape_cast %41 : vector<1x128x128xbf16> to vector<128x128xbf16>
    %cst_23 = arith.constant dense<0.000000e+00> : vector<64x128xf32>
    %43 = tpu.matmul %40, %42, %cst_23 {dimension_numbers = #tpu.dot_dimension_numbers<[1], [0], [0], [1], [0, 0, 1, 1], [], []>} : vector<64x128xbf16>, vector<128x128xbf16>, vector<64x128xf32> -> vector<64x128xf32>
    %44 = arith.addf %36, %43 : vector<64x128xf32>
    %45 = vector.extract_strided_slice %19 {offsets = [0, 1, 0, 0], sizes = [1, 8, 8, 128], strides = [1, 1, 1, 1]} : vector<1x10x10x128xf32> to vector<1x8x8x128xf32>
    %46 = vector.shape_cast %45 : vector<1x8x8x128xf32> to vector<8x8x128xf32>
    %47 = vector.shape_cast %46 : vector<8x8x128xf32> to vector<64x128xf32>
    %48 = arith.truncf %47 : vector<64x128xf32> to vector<64x128xbf16>
    %c3 = arith.constant 3 : index
    %c0_24 = arith.constant 0 : index
    %c0_25 = arith.constant 0 : index
    %49 = vector.load %arg7[%c3, %c0_24, %c0_25] : memref<9x128x128xbf16, #tpu.memory_space<vmem>>, vector<1x128x128xbf16>
    %50 = vector.shape_cast %49 : vector<1x128x128xbf16> to vector<128x128xbf16>
    %cst_26 = arith.constant dense<0.000000e+00> : vector<64x128xf32>
    %51 = tpu.matmul %48, %50, %cst_26 {dimension_numbers = #tpu.dot_dimension_numbers<[1], [0], [0], [1], [0, 0, 1, 1], [], []>} : vector<64x128xbf16>, vector<128x128xbf16>, vector<64x128xf32> -> vector<64x128xf32>
    %52 = arith.addf %44, %51 : vector<64x128xf32>
    %53 = vector.extract_strided_slice %19 {offsets = [0, 1, 1, 0], sizes = [1, 8, 8, 128], strides = [1, 1, 1, 1]} : vector<1x10x10x128xf32> to vector<1x8x8x128xf32>
    %54 = vector.shape_cast %53 : vector<1x8x8x128xf32> to vector<8x8x128xf32>
    %55 = vector.shape_cast %54 : vector<8x8x128xf32> to vector<64x128xf32>
    %56 = arith.truncf %55 : vector<64x128xf32> to vector<64x128xbf16>
    %c4 = arith.constant 4 : index
    %c0_27 = arith.constant 0 : index
    %c0_28 = arith.constant 0 : index
    %57 = vector.load %arg7[%c4, %c0_27, %c0_28] : memref<9x128x128xbf16, #tpu.memory_space<vmem>>, vector<1x128x128xbf16>
    %58 = vector.shape_cast %57 : vector<1x128x128xbf16> to vector<128x128xbf16>
    %cst_29 = arith.constant dense<0.000000e+00> : vector<64x128xf32>
    %59 = tpu.matmul %56, %58, %cst_29 {dimension_numbers = #tpu.dot_dimension_numbers<[1], [0], [0], [1], [0, 0, 1, 1], [], []>} : vector<64x128xbf16>, vector<128x128xbf16>, vector<64x128xf32> -> vector<64x128xf32>
    %60 = arith.addf %52, %59 : vector<64x128xf32>
    %61 = vector.extract_strided_slice %19 {offsets = [0, 1, 2, 0], sizes = [1, 8, 8, 128], strides = [1, 1, 1, 1]} : vector<1x10x10x128xf32> to vector<1x8x8x128xf32>
    %62 = vector.shape_cast %61 : vector<1x8x8x128xf32> to vector<8x8x128xf32>
    %63 = vector.shape_cast %62 : vector<8x8x128xf32> to vector<64x128xf32>
    %64 = arith.truncf %63 : vector<64x128xf32> to vector<64x128xbf16>
    %c5 = arith.constant 5 : index
    %c0_30 = arith.constant 0 : index
    %c0_31 = arith.constant 0 : index
    %65 = vector.load %arg7[%c5, %c0_30, %c0_31] : memref<9x128x128xbf16, #tpu.memory_space<vmem>>, vector<1x128x128xbf16>
    %66 = vector.shape_cast %65 : vector<1x128x128xbf16> to vector<128x128xbf16>
    %cst_32 = arith.constant dense<0.000000e+00> : vector<64x128xf32>
    %67 = tpu.matmul %64, %66, %cst_32 {dimension_numbers = #tpu.dot_dimension_numbers<[1], [0], [0], [1], [0, 0, 1, 1], [], []>} : vector<64x128xbf16>, vector<128x128xbf16>, vector<64x128xf32> -> vector<64x128xf32>
    %68 = arith.addf %60, %67 : vector<64x128xf32>
    %69 = vector.extract_strided_slice %19 {offsets = [0, 2, 0, 0], sizes = [1, 8, 8, 128], strides = [1, 1, 1, 1]} : vector<1x10x10x128xf32> to vector<1x8x8x128xf32>
    %70 = vector.shape_cast %69 : vector<1x8x8x128xf32> to vector<8x8x128xf32>
    %71 = vector.shape_cast %70 : vector<8x8x128xf32> to vector<64x128xf32>
    %72 = arith.truncf %71 : vector<64x128xf32> to vector<64x128xbf16>
    %c6 = arith.constant 6 : index
    %c0_33 = arith.constant 0 : index
    %c0_34 = arith.constant 0 : index
    %73 = vector.load %arg7[%c6, %c0_33, %c0_34] : memref<9x128x128xbf16, #tpu.memory_space<vmem>>, vector<1x128x128xbf16>
    %74 = vector.shape_cast %73 : vector<1x128x128xbf16> to vector<128x128xbf16>
    %cst_35 = arith.constant dense<0.000000e+00> : vector<64x128xf32>
    %75 = tpu.matmul %72, %74, %cst_35 {dimension_numbers = #tpu.dot_dimension_numbers<[1], [0], [0], [1], [0, 0, 1, 1], [], []>} : vector<64x128xbf16>, vector<128x128xbf16>, vector<64x128xf32> -> vector<64x128xf32>
    %76 = arith.addf %68, %75 : vector<64x128xf32>
    %77 = vector.extract_strided_slice %19 {offsets = [0, 2, 1, 0], sizes = [1, 8, 8, 128], strides = [1, 1, 1, 1]} : vector<1x10x10x128xf32> to vector<1x8x8x128xf32>
    %78 = vector.shape_cast %77 : vector<1x8x8x128xf32> to vector<8x8x128xf32>
    %79 = vector.shape_cast %78 : vector<8x8x128xf32> to vector<64x128xf32>
    %80 = arith.truncf %79 : vector<64x128xf32> to vector<64x128xbf16>
    %c7 = arith.constant 7 : index
    %c0_36 = arith.constant 0 : index
    %c0_37 = arith.constant 0 : index
    %81 = vector.load %arg7[%c7, %c0_36, %c0_37] : memref<9x128x128xbf16, #tpu.memory_space<vmem>>, vector<1x128x128xbf16>
    %82 = vector.shape_cast %81 : vector<1x128x128xbf16> to vector<128x128xbf16>
    %cst_38 = arith.constant dense<0.000000e+00> : vector<64x128xf32>
    %83 = tpu.matmul %80, %82, %cst_38 {dimension_numbers = #tpu.dot_dimension_numbers<[1], [0], [0], [1], [0, 0, 1, 1], [], []>} : vector<64x128xbf16>, vector<128x128xbf16>, vector<64x128xf32> -> vector<64x128xf32>
    %84 = arith.addf %76, %83 : vector<64x128xf32>
    %85 = vector.extract_strided_slice %19 {offsets = [0, 2, 2, 0], sizes = [1, 8, 8, 128], strides = [1, 1, 1, 1]} : vector<1x10x10x128xf32> to vector<1x8x8x128xf32>
    %86 = vector.shape_cast %85 : vector<1x8x8x128xf32> to vector<8x8x128xf32>
    %87 = vector.shape_cast %86 : vector<8x8x128xf32> to vector<64x128xf32>
    %88 = arith.truncf %87 : vector<64x128xf32> to vector<64x128xbf16>
    %c8 = arith.constant 8 : index
    %c0_39 = arith.constant 0 : index
    %c0_40 = arith.constant 0 : index
    %89 = vector.load %arg7[%c8, %c0_39, %c0_40] : memref<9x128x128xbf16, #tpu.memory_space<vmem>>, vector<1x128x128xbf16>
    %90 = vector.shape_cast %89 : vector<1x128x128xbf16> to vector<128x128xbf16>
    %cst_41 = arith.constant dense<0.000000e+00> : vector<64x128xf32>
    %91 = tpu.matmul %88, %90, %cst_41 {dimension_numbers = #tpu.dot_dimension_numbers<[1], [0], [0], [1], [0, 0, 1, 1], [], []>} : vector<64x128xbf16>, vector<128x128xbf16>, vector<64x128xf32> -> vector<64x128xf32>
    %92 = arith.addf %84, %91 : vector<64x128xf32>
    %c0_42 = arith.constant 0 : index
    %c0_43 = arith.constant 0 : index
    %93 = vector.load %arg5[%c0_42, %c0_43] : memref<1x128xf32, #tpu.memory_space<vmem>>, vector<1x128xf32>
    %94 = vector.broadcast %93 : vector<1x128xf32> to vector<64x128xf32>
    %95 = arith.mulf %92, %94 : vector<64x128xf32>
    %c0_44 = arith.constant 0 : index
    %c0_45 = arith.constant 0 : index
    %96 = vector.load %arg6[%c0_44, %c0_45] : memref<1x128xf32, #tpu.memory_space<vmem>>, vector<1x128xf32>
    %97 = vector.broadcast %96 : vector<1x128xf32> to vector<64x128xf32>
    %98 = arith.addf %95, %97 : vector<64x128xf32>
    %cst_46 = arith.constant 0.000000e+00 : f32
    %99 = vector.broadcast %cst_46 : f32 to vector<64x128xf32>
    %100 = arith.cmpf ogt, %98, %99 : vector<64x128xf32>
    %cst_47 = arith.constant 1.000000e-01 : f32
    %101 = vector.broadcast %cst_47 : f32 to vector<64x128xf32>
    %102 = arith.mulf %101, %98 : vector<64x128xf32>
    %103 = arith.select %100, %98, %102 : vector<64x128xi1>, vector<64x128xf32>
    %cst_48 = arith.constant 0.000000e+00 : f32
    %104 = vector.broadcast %cst_48 : f32 to vector<10x10x128xf32>
    %c0_49 = arith.constant 0 : index
    %c0_50 = arith.constant 0 : index
    %c0_51 = arith.constant 0 : index
    %105 = vector.load %arg10[%c0_49, %c0_50, %c0_51] : memref<10x10x128xf32, #tpu.memory_space<vmem>>, vector<10x10x128xf32>
    tpu.vector_store %arg10[%c0_49, %c0_50, %c0_51], %104 {strides = array<i32>} : memref<10x10x128xf32, #tpu.memory_space<vmem>>, vector<10x10x128xf32>,
    %106 = vector.shape_cast %103 : vector<64x128xf32> to vector<8x8x128xf32>
    %c1_52 = arith.constant 1 : index
    %c1_53 = arith.constant 1 : index
    %c0_54 = arith.constant 0 : index
    %107 = vector.load %arg10[%c1_52, %c1_53, %c0_54] : memref<10x10x128xf32, #tpu.memory_space<vmem>>, vector<8x8x128xf32>
    tpu.vector_store %arg10[%c1_52, %c1_53, %c0_54], %106 {strides = array<i32>} : memref<10x10x128xf32, #tpu.memory_space<vmem>>, vector<8x8x128xf32>,
    %c0_55 = arith.constant 0 : index
    %c0_56 = arith.constant 0 : index
    %c0_57 = arith.constant 0 : index
    %108 = vector.load %arg10[%c0_55, %c0_56, %c0_57] : memref<10x10x128xf32, #tpu.memory_space<vmem>>, vector<10x10x128xf32>
    %cst_58 = arith.constant 0.000000e+00 : f32
    %109 = vector.broadcast %cst_58 : f32 to vector<64x128xf32>
    %110 = vector.extract_strided_slice %108 {offsets = [0, 0, 0], sizes = [8, 8, 128], strides = [1, 1, 1]} : vector<10x10x128xf32> to vector<8x8x128xf32>
    %111 = vector.shape_cast %110 : vector<8x8x128xf32> to vector<64x128xf32>
    %112 = arith.truncf %111 : vector<64x128xf32> to vector<64x128xbf16>
    %c0_59 = arith.constant 0 : index
    %c0_60 = arith.constant 0 : index
    %c0_61 = arith.constant 0 : index
    %113 = vector.load %arg8[%c0_59, %c0_60, %c0_61] : memref<9x128x128xbf16, #tpu.memory_space<vmem>>, vector<1x128x128xbf16>
    %114 = vector.shape_cast %113 : vector<1x128x128xbf16> to vector<128x128xbf16>
    %cst_62 = arith.constant dense<0.000000e+00> : vector<64x128xf32>
    %115 = tpu.matmul %112, %114, %cst_62 {dimension_numbers = #tpu.dot_dimension_numbers<[1], [0], [0], [1], [0, 0, 1, 1], [], []>} : vector<64x128xbf16>, vector<128x128xbf16>, vector<64x128xf32> -> vector<64x128xf32>
    %116 = arith.addf %109, %115 : vector<64x128xf32>
    %117 = vector.extract_strided_slice %108 {offsets = [0, 1, 0], sizes = [8, 8, 128], strides = [1, 1, 1]} : vector<10x10x128xf32> to vector<8x8x128xf32>
    %118 = vector.shape_cast %117 : vector<8x8x128xf32> to vector<64x128xf32>
    %119 = arith.truncf %118 : vector<64x128xf32> to vector<64x128xbf16>
    %c1_63 = arith.constant 1 : index
    %c0_64 = arith.constant 0 : index
    %c0_65 = arith.constant 0 : index
    %120 = vector.load %arg8[%c1_63, %c0_64, %c0_65] : memref<9x128x128xbf16, #tpu.memory_space<vmem>>, vector<1x128x128xbf16>
    %121 = vector.shape_cast %120 : vector<1x128x128xbf16> to vector<128x128xbf16>
    %cst_66 = arith.constant dense<0.000000e+00> : vector<64x128xf32>
    %122 = tpu.matmul %119, %121, %cst_66 {dimension_numbers = #tpu.dot_dimension_numbers<[1], [0], [0], [1], [0, 0, 1, 1], [], []>} : vector<64x128xbf16>, vector<128x128xbf16>, vector<64x128xf32> -> vector<64x128xf32>
    %123 = arith.addf %116, %122 : vector<64x128xf32>
    %124 = vector.extract_strided_slice %108 {offsets = [0, 2, 0], sizes = [8, 8, 128], strides = [1, 1, 1]} : vector<10x10x128xf32> to vector<8x8x128xf32>
    %125 = vector.shape_cast %124 : vector<8x8x128xf32> to vector<64x128xf32>
    %126 = arith.truncf %125 : vector<64x128xf32> to vector<64x128xbf16>
    %c2_67 = arith.constant 2 : index
    %c0_68 = arith.constant 0 : index
    %c0_69 = arith.constant 0 : index
    %127 = vector.load %arg8[%c2_67, %c0_68, %c0_69] : memref<9x128x128xbf16, #tpu.memory_space<vmem>>, vector<1x128x128xbf16>
    %128 = vector.shape_cast %127 : vector<1x128x128xbf16> to vector<128x128xbf16>
    %cst_70 = arith.constant dense<0.000000e+00> : vector<64x128xf32>
    %129 = tpu.matmul %126, %128, %cst_70 {dimension_numbers = #tpu.dot_dimension_numbers<[1], [0], [0], [1], [0, 0, 1, 1], [], []>} : vector<64x128xbf16>, vector<128x128xbf16>, vector<64x128xf32> -> vector<64x128xf32>
    %130 = arith.addf %123, %129 : vector<64x128xf32>
    %131 = vector.extract_strided_slice %108 {offsets = [1, 0, 0], sizes = [8, 8, 128], strides = [1, 1, 1]} : vector<10x10x128xf32> to vector<8x8x128xf32>
    %132 = vector.shape_cast %131 : vector<8x8x128xf32> to vector<64x128xf32>
    %133 = arith.truncf %132 : vector<64x128xf32> to vector<64x128xbf16>
    %c3_71 = arith.constant 3 : index
    %c0_72 = arith.constant 0 : index
    %c0_73 = arith.constant 0 : index
    %134 = vector.load %arg8[%c3_71, %c0_72, %c0_73] : memref<9x128x128xbf16, #tpu.memory_space<vmem>>, vector<1x128x128xbf16>
    %135 = vector.shape_cast %134 : vector<1x128x128xbf16> to vector<128x128xbf16>
    %cst_74 = arith.constant dense<0.000000e+00> : vector<64x128xf32>
    %136 = tpu.matmul %133, %135, %cst_74 {dimension_numbers = #tpu.dot_dimension_numbers<[1], [0], [0], [1], [0, 0, 1, 1], [], []>} : vector<64x128xbf16>, vector<128x128xbf16>, vector<64x128xf32> -> vector<64x128xf32>
    %137 = arith.addf %130, %136 : vector<64x128xf32>
    %138 = vector.extract_strided_slice %108 {offsets = [1, 1, 0], sizes = [8, 8, 128], strides = [1, 1, 1]} : vector<10x10x128xf32> to vector<8x8x128xf32>
    %139 = vector.shape_cast %138 : vector<8x8x128xf32> to vector<64x128xf32>
    %140 = arith.truncf %139 : vector<64x128xf32> to vector<64x128xbf16>
    %c4_75 = arith.constant 4 : index
    %c0_76 = arith.constant 0 : index
    %c0_77 = arith.constant 0 : index
    %141 = vector.load %arg8[%c4_75, %c0_76, %c0_77] : memref<9x128x128xbf16, #tpu.memory_space<vmem>>, vector<1x128x128xbf16>
    %142 = vector.shape_cast %141 : vector<1x128x128xbf16> to vector<128x128xbf16>
    %cst_78 = arith.constant dense<0.000000e+00> : vector<64x128xf32>
    %143 = tpu.matmul %140, %142, %cst_78 {dimension_numbers = #tpu.dot_dimension_numbers<[1], [0], [0], [1], [0, 0, 1, 1], [], []>} : vector<64x128xbf16>, vector<128x128xbf16>, vector<64x128xf32> -> vector<64x128xf32>
    %144 = arith.addf %137, %143 : vector<64x128xf32>
    %145 = vector.extract_strided_slice %108 {offsets = [1, 2, 0], sizes = [8, 8, 128], strides = [1, 1, 1]} : vector<10x10x128xf32> to vector<8x8x128xf32>
    %146 = vector.shape_cast %145 : vector<8x8x128xf32> to vector<64x128xf32>
    %147 = arith.truncf %146 : vector<64x128xf32> to vector<64x128xbf16>
    %c5_79 = arith.constant 5 : index
    %c0_80 = arith.constant 0 : index
    %c0_81 = arith.constant 0 : index
    %148 = vector.load %arg8[%c5_79, %c0_80, %c0_81] : memref<9x128x128xbf16, #tpu.memory_space<vmem>>, vector<1x128x128xbf16>
    %149 = vector.shape_cast %148 : vector<1x128x128xbf16> to vector<128x128xbf16>
    %cst_82 = arith.constant dense<0.000000e+00> : vector<64x128xf32>
    %150 = tpu.matmul %147, %149, %cst_82 {dimension_numbers = #tpu.dot_dimension_numbers<[1], [0], [0], [1], [0, 0, 1, 1], [], []>} : vector<64x128xbf16>, vector<128x128xbf16>, vector<64x128xf32> -> vector<64x128xf32>
    %151 = arith.addf %144, %150 : vector<64x128xf32>
    %152 = vector.extract_strided_slice %108 {offsets = [2, 0, 0], sizes = [8, 8, 128], strides = [1, 1, 1]} : vector<10x10x128xf32> to vector<8x8x128xf32>
    %153 = vector.shape_cast %152 : vector<8x8x128xf32> to vector<64x128xf32>
    %154 = arith.truncf %153 : vector<64x128xf32> to vector<64x128xbf16>
    %c6_83 = arith.constant 6 : index
    %c0_84 = arith.constant 0 : index
    %c0_85 = arith.constant 0 : index
    %155 = vector.load %arg8[%c6_83, %c0_84, %c0_85] : memref<9x128x128xbf16, #tpu.memory_space<vmem>>, vector<1x128x128xbf16>
    %156 = vector.shape_cast %155 : vector<1x128x128xbf16> to vector<128x128xbf16>
    %cst_86 = arith.constant dense<0.000000e+00> : vector<64x128xf32>
    %157 = tpu.matmul %154, %156, %cst_86 {dimension_numbers = #tpu.dot_dimension_numbers<[1], [0], [0], [1], [0, 0, 1, 1], [], []>} : vector<64x128xbf16>, vector<128x128xbf16>, vector<64x128xf32> -> vector<64x128xf32>
    %158 = arith.addf %151, %157 : vector<64x128xf32>
    %159 = vector.extract_strided_slice %108 {offsets = [2, 1, 0], sizes = [8, 8, 128], strides = [1, 1, 1]} : vector<10x10x128xf32> to vector<8x8x128xf32>
    %160 = vector.shape_cast %159 : vector<8x8x128xf32> to vector<64x128xf32>
    %161 = arith.truncf %160 : vector<64x128xf32> to vector<64x128xbf16>
    %c7_87 = arith.constant 7 : index
    %c0_88 = arith.constant 0 : index
    %c0_89 = arith.constant 0 : index
    %162 = vector.load %arg8[%c7_87, %c0_88, %c0_89] : memref<9x128x128xbf16, #tpu.memory_space<vmem>>, vector<1x128x128xbf16>
    %163 = vector.shape_cast %162 : vector<1x128x128xbf16> to vector<128x128xbf16>
    %cst_90 = arith.constant dense<0.000000e+00> : vector<64x128xf32>
    %164 = tpu.matmul %161, %163, %cst_90 {dimension_numbers = #tpu.dot_dimension_numbers<[1], [0], [0], [1], [0, 0, 1, 1], [], []>} : vector<64x128xbf16>, vector<128x128xbf16>, vector<64x128xf32> -> vector<64x128xf32>
    %165 = arith.addf %158, %164 : vector<64x128xf32>
    %166 = vector.extract_strided_slice %108 {offsets = [2, 2, 0], sizes = [8, 8, 128], strides = [1, 1, 1]} : vector<10x10x128xf32> to vector<8x8x128xf32>
    %167 = vector.shape_cast %166 : vector<8x8x128xf32> to vector<64x128xf32>
    %168 = arith.truncf %167 : vector<64x128xf32> to vector<64x128xbf16>
    %c8_91 = arith.constant 8 : index
    %c0_92 = arith.constant 0 : index
    %c0_93 = arith.constant 0 : index
    %169 = vector.load %arg8[%c8_91, %c0_92, %c0_93] : memref<9x128x128xbf16, #tpu.memory_space<vmem>>, vector<1x128x128xbf16>
    %170 = vector.shape_cast %169 : vector<1x128x128xbf16> to vector<128x128xbf16>
    %cst_94 = arith.constant dense<0.000000e+00> : vector<64x128xf32>
    %171 = tpu.matmul %168, %170, %cst_94 {dimension_numbers = #tpu.dot_dimension_numbers<[1], [0], [0], [1], [0, 0, 1, 1], [], []>} : vector<64x128xbf16>, vector<128x128xbf16>, vector<64x128xf32> -> vector<64x128xf32>
    %172 = arith.addf %165, %171 : vector<64x128xf32>
    %173 = vector.extract_strided_slice %1 {offsets = [0, 1, 1, 0], sizes = [1, 8, 8, 128], strides = [1, 1, 1, 1]} : vector<1x10x10x128xf32> to vector<1x8x8x128xf32>
    %174 = vector.shape_cast %173 : vector<1x8x8x128xf32> to vector<8x8x128xf32>
    %175 = vector.shape_cast %174 : vector<8x8x128xf32> to vector<64x128xf32>
    %176 = arith.addf %172, %175 : vector<64x128xf32>
    %177 = vector.shape_cast %176 : vector<64x128xf32> to vector<8x8x128xf32>
    %c0_95 = arith.constant 0 : index
    %c0_96 = arith.constant 0 : index
    %c0_97 = arith.constant 0 : index
    %c0_98 = arith.constant 0 : index
    %178 = vector.load %arg9[%c0_95, %c0_96, %c0_97, %c0_98] : memref<1x8x8x128xf32, #tpu.memory_space<vmem>>, vector<1x8x8x128xf32>
    %179 = vector.shape_cast %178 : vector<1x8x8x128xf32> to vector<8x8x128xf32>
    %180 = vector.shape_cast %177 : vector<8x8x128xf32> to vector<1x8x8x128xf32>
    tpu.vector_store %arg9[%c0_95, %c0_96, %c0_97, %c0_98], %180 {strides = array<i32>} : memref<1x8x8x128xf32, #tpu.memory_space<vmem>>, vector<1x8x8x128xf32>,
    return
  }
  func.func @transform_0(%arg0: i32) -> (i32, i32, i32, i32, i32) {
    %c0_i32 = arith.constant 0 : i32
    %c0_i32_0 = arith.constant 0 : i32
    %c0_i32_1 = arith.constant 0 : i32
    %c0_i32_2 = arith.constant 0 : i32
    %c0_i32_3 = arith.constant 0 : i32
    return %arg0, %c0_i32, %c0_i32_0, %c0_i32_1, %c0_i32_2 : i32, i32, i32, i32, i32
  }
  func.func @transform_1(%arg0: i32) -> (i32, i32, i32, i32) {
    %c0_i32 = arith.constant 0 : i32
    %c0_i32_0 = arith.constant 0 : i32
    %c0_i32_1 = arith.constant 0 : i32
    %c0_i32_2 = arith.constant 0 : i32
    %c0_i32_3 = arith.constant 0 : i32
    return %c0_i32, %c0_i32_0, %c0_i32_1, %c0_i32_2 : i32, i32, i32, i32
  }
  func.func @transform_2(%arg0: i32) -> (i32, i32) {
    %c0_i32 = arith.constant 0 : i32
    %c0_i32_0 = arith.constant 0 : i32
    %c0_i32_1 = arith.constant 0 : i32
    return %c0_i32, %c0_i32_0 : i32, i32
  }
  func.func @transform_3(%arg0: i32) -> (i32, i32) {
    %c0_i32 = arith.constant 0 : i32
    %c0_i32_0 = arith.constant 0 : i32
    %c0_i32_1 = arith.constant 0 : i32
    return %c0_i32, %c0_i32_0 : i32, i32
  }
  func.func @transform_4(%arg0: i32) -> (i32, i32) {
    %c0_i32 = arith.constant 0 : i32
    %c0_i32_0 = arith.constant 0 : i32
    %c0_i32_1 = arith.constant 0 : i32
    return %c0_i32, %c0_i32_0 : i32, i32
  }
  func.func @transform_5(%arg0: i32) -> (i32, i32) {
    %c0_i32 = arith.constant 0 : i32
    %c0_i32_0 = arith.constant 0 : i32
    %c0_i32_1 = arith.constant 0 : i32
    return %c0_i32, %c0_i32_0 : i32, i32
  }
  func.func @transform_6(%arg0: i32) -> (i32, i32, i32) {
    %c0_i32 = arith.constant 0 : i32
    %c0_i32_0 = arith.constant 0 : i32
    %c0_i32_1 = arith.constant 0 : i32
    %c0_i32_2 = arith.constant 0 : i32
    return %c0_i32, %c0_i32_0, %c0_i32_1 : i32, i32, i32
  }
  func.func @transform_7(%arg0: i32) -> (i32, i32, i32) {
    %c0_i32 = arith.constant 0 : i32
    %c0_i32_0 = arith.constant 0 : i32
    %c0_i32_1 = arith.constant 0 : i32
    %c0_i32_2 = arith.constant 0 : i32
    return %c0_i32, %c0_i32_0, %c0_i32_1 : i32, i32, i32
  }
  func.func @transform_8(%arg0: i32) -> (i32, i32, i32, i32) {
    %c0_i32 = arith.constant 0 : i32
    %c0_i32_0 = arith.constant 0 : i32
    %c0_i32_1 = arith.constant 0 : i32
    %c0_i32_2 = arith.constant 0 : i32
    return %arg0, %c0_i32, %c0_i32_0, %c0_i32_1 : i32, i32, i32, i32
  }
}

</mosaic_0001>

<bundles_post_ra>
// kernel: network_block_fwd.3
= control target key start
LH: loop header
LB: loop body
LE: loop exit
PB: predicated region body
PF: predicated region fallthrough
CT: control target
= control target key end

     0   :  { %s4800_s27 = smov 0   ;;  %s6055_s0 = inlined_call_operand.vmem [shape: f32[2,1,10,10,128], index: 0, kind: input, shape index: {}]   ;;  %s6056_s1 = inlined_call_operand.vmem [shape: f32[1,10,10,1], index: 1, kind: input, shape index: {}]   ;;  %s6057_s2 = inlined_call_operand.vmem [shape: f32[1,128], index: 2, kind: input, shape index: {}]   ;;  %s6058_s3 = inlined_call_operand.vmem [shape: f32[1,128], index: 3, kind: input, shape index: {}]   ;;  %s6059_s4 = inlined_call_operand.vmem [shape: f32[1,128], index: 4, kind: input, shape index: {}]   ;;  %s6060_s5 = inlined_call_operand.vmem [shape: f32[1,128], index: 5, kind: input, shape index: {}]   ;;  %s6061_s6 = inlined_call_operand.vmem [shape: bf16[9,128,128], index: 6, kind: input, shape index: {}]   ;;  %s6062_s7 = inlined_call_operand.vmem [shape: bf16[9,128,128], index: 7, kind: input, shape index: {}]   ;;  %s6063_s8 = inlined_call_operand.vmem [shape: f32[2,8,8,128], index: 8, kind: output, shape index: {}]  }
   0x1 LB: > { %s3509_s28 = sadd.s32 4294967295, %s4751_s27   ;;  %p3513_p0 = scmp.ge.s32.totalorder %s4751_s27, 1  ;;  %s4751_s27 = sphi %s4800_s27, %s18_s27  }
   0x2   : > { %p262_p1 = scmp.lt.s32.totalorder %s4751_s27, 3 }
   0x4   : > { %p263_p2 = pnand %p3513_p0, %p262_p1 }
   0x6   : > { %266 = sbr.rel (%p263_p2) target bundleno = 846 (0x34e), region = 52 }
   0xb   : > { %v443_v0 = vld [vmem:[%s6056_s1 + $0x10] sm:$0xff]  ;;  %v441_v1 = vld [vmem:[%s6056_s1] sm:$0xff]  ;;  %v4753_v2 = vmov 0   ;;  %v444_v3 = vld [vmem:[%s6056_s1 + $0x18] sm:$0x3]  ;;  %p296_p3 = scmp.lt.s32.totalorder %s3509_s28, 1 }
   0xc   : > { %4584 = vset.pattern.permute.xlu1 %v4753_v2  ;;  %4583 = vset.pattern.permute.xlu0 %v4753_v2  ;;  %v442_v4 = vld [vmem:[%s6056_s1 + $0x8] sm:$0x3]  ;;  %v445_v6 = vld [vmem:[%s6056_s1 + $0x20] sm:$0xff]  ;;  %v4585_v7 = vld [vmem:[%s6061_s6 + $0x38] sm:$0xff]   ;;  %vm617_vm6 = vcmask 1046528  }
   0xd   : > { %473 = vperm.xlu1 %4584, %v443_v0   ;;  %463 = vperm.xlu0 %4583, %v441_v1   ;;  %v446_v5 = vld [vmem:[%s6056_s1 + $0x28] sm:$0x3]  ;;  %v4586_v8 = vld [vmem:[%s6061_s6 + $0x78] sm:$0xff]   ;;  %v4587_v10 = vld [vmem:[%s6061_s6 + $0x30] sm:$0xff]   ;;  %s6088_s28 = smov (!%p296_p3, %s3509_s28), 1 }
   0xe   : > { %v448_v9 = vld [vmem:[%s6056_s1 + $0x38] sm:$0x3]  ;;  %4164 = vmatprep.subr.bf16.mxu1 %v4585_v7  ;;  %v4588_v11 = vld [vmem:[%s6061_s6 + $0x70] sm:$0xff]   ;;  %4140 = vmatprep.subr.bf16.mxu0 %v4586_v8  ;;  %v4589_v13 = vld [vmem:[%s6061_s6 + $0x28] sm:$0xff]   ;;  %s4572_s21 = smul.u32 160, %s6088_s28  ;;  %s3923_s20 = sshll.u32 %s6088_s28, 6 }
   0xf   : > { %v447_v12 = vld [vmem:[%s6056_s1 + $0x30] sm:$0xff]  ;;  %4165 = vmatpush3.bf16.msra.mxu1 %v4585_v7  ;;  %4141 = vmatpush3.bf16.msra.mxu0 %v4586_v8  ;;  %v4590_v14 = vld [vmem:[%s6061_s6 + $0x68] sm:$0xff]   ;;  %v449_v16 = vld [vmem:[%s6056_s1 + $0x40] sm:$0xff]  ;;  %s6020_s22 = scalar_lea.vmem %s6063_s8, %s3923_s20 }
  0x10   : > { %4166 = vmatprep.subr.bf16.mxu1 %v4587_v10  ;;  %4142 = vmatprep.subr.bf16.mxu0 %v4588_v11  ;;  %v450_v15 = vld [vmem:[%s6056_s1 + $0x48] sm:$0x3]  ;;  %v4591_v17 = vld [vmem:[%s6061_s6 + $0x20] sm:$0xff]   ;;  %v452_v19 = vld [vmem:[%s6056_s1 + $0x58] sm:$0x3]  ;;  %s4937_s26 = scalar_lea.vmem %s6055_s0, %s4572_s21 }
  0x11   : > { %478 = vperm.xlu1 %4584, %v444_v3   ;;  %468 = vperm.xlu0 %4583, %v442_v4   ;;  %v4592_v18 = vld [vmem:[%s6061_s6 + $0x60] sm:$0xff]   ;;  %v451_v20 = vld [vmem:[%s6056_s1 + $0x50] sm:$0xff]  ;;  %v4593_v21 = vld [vmem:[%s6061_s6 + $0x18] sm:$0xff]  }
  0x12   : > { %v4594_v22 = vld [vmem:[%s6061_s6 + $0x58] sm:$0xff]   ;;  %v454_v23 = vld [vmem:[%s6056_s1 + $0x68] sm:$0x3]  ;;  %v453_v24 = vld [vmem:[%s6056_s1 + $0x60] sm:$0xff] }
  0x13   : > { %4167 = vmatpush3.bf16.msra.mxu1 %v4587_v10  ;;  %4143 = vmatpush3.bf16.msra.mxu0 %v4588_v11  ;;  %v4595_v25 = vld [vmem:[%s6061_s6 + $0x10] sm:$0xff]   ;;  %v456_v27 = vld [vmem:[%s6056_s1 + $0x78] sm:$0x3]  ;;  %v4597_v29 = vld [vmem:[%s6061_s6 + $0x8] sm:$0xff]  }
  0x14   : > { %4168 = vmatprep.subr.bf16.mxu1 %v4589_v13  ;;  %4144 = vmatprep.subr.bf16.mxu0 %v4590_v14  ;;  %v4596_v26 = vld [vmem:[%s6061_s6 + $0x50] sm:$0xff]   ;;  %v4598_v30 = vld [vmem:[%s6061_s6 + $0x48] sm:$0xff]   ;;  %v457_v32 = vld [vmem:[%s6056_s1 + $0x80] sm:$0xff] }
  0x15   : > { %488 = vperm.xlu1 %4584, %v446_v5   ;;  %483 = vperm.xlu0 %4583, %v445_v6   ;;  %v455_v28 = vld [vmem:[%s6056_s1 + $0x70] sm:$0xff]  ;;  %v458_v31 = vld [vmem:[%s6056_s1 + $0x88] sm:$0x3]  ;;  %v4599_v33 = vld [vmem:[%s6061_s6] sm:$0xff]  }
  0x16   : > { %v4600_v34 = vld [vmem:[%s6061_s6 + $0x40] sm:$0xff]   ;;  %v460_v35 = vld [vmem:[%s6056_s1 + $0x98] sm:$0x3]  ;;  %v459_v36 = vld [vmem:[%s6056_s1 + $0x90] sm:$0xff] }
  0x17   : > { %4169 = vmatpush3.bf16.msra.mxu1 %v4589_v13  ;;  %4145 = vmatpush3.bf16.msra.mxu0 %v4590_v14  ;;  %v4925_v37 = vld [vmem:[%s6061_s6 + $0xf8] sm:$0xff]   ;;  %v4943_v39 = vld [vmem:[%s6057_s2] ss:$0 sm:$0xff]  ;;  %v324_v40 = vld [vmem:[%s4937_s26 + $0x88] sm:$0x3] }
  0x18   : > { %4170 = vmatprep.subr.bf16.mxu1 %v4591_v17  ;;  %4146 = vmatprep.subr.bf16.mxu0 %v4592_v18  ;;  %v4931_v38 = vld [vmem:[%s6061_s6 + $0xb8] sm:$0xff]   ;;  %v351_v41 = vmul.f32 %v4943_v39, %v324_v40  ;;  %v4950_v42 = vld [vmem:[%s6058_s3] ss:$0 sm:$0xff]  ;;  %v325_v45 = vld [vmem:[%s4937_s26 + $0x90] sm:$0xff] }
  0x19   : > { %498 = vperm.xlu1 %4584, %v448_v9   ;;  %493 = vperm.xlu0 %4583, %v447_v12   ;;  %v326_v44 = vld [vmem:[%s4937_s26 + $0x98] sm:$0x3]  ;;  %v352_v47 = vmul.f32 %v4943_v39, %v325_v45  ;;  %v309_v50 = vld [vmem:[%s4937_s26 + $0x10] sm:$0xff]  ;;  %v307_v52 = vld [vmem:[%s4937_s26] sm:$0xff] }
  0x1a   : > { %v4953_v43 = vadd.f32 %v4950_v42, %v351_v41  ;;  %v353_v46 = vmul.f32 %v4943_v39, %v326_v44  ;;  %v336_v51 = vmul.f32 %v4943_v39, %v309_v50  ;;  %v334_v53 = vmul.f32 %v4943_v39, %v307_v52  ;;  %v310_v55 = vld [vmem:[%s4937_s26 + $0x18] sm:$0x3]  ;;  %v308_v57 = vld [vmem:[%s4937_s26 + $0x8] sm:$0x3]  ;;  %v311_v1 = vld [vmem:[%s4937_s26 + $0x20] sm:$0xff] }
  0x1b   : > { %4171 = vmatpush3.bf16.msra.mxu1 %v4591_v17  ;;  %4147 = vmatpush3.bf16.msra.mxu0 %v4592_v18  ;;  %v4963_v49 = vadd.f32 %v4950_v42, %v352_v47  ;;  %v337_v60 = vmul.f32 %v4943_v39, %v310_v55  ;;  %v335_v61 = vmul.f32 %v4943_v39, %v308_v57  ;;  %v312_v62 = vld [vmem:[%s4937_s26 + $0x28] sm:$0x3]  ;;  %v314_v3 = vld [vmem:[%s4937_s26 + $0x38] sm:$0x3]  ;;  %v313_v9 = vld [vmem:[%s4937_s26 + $0x30] sm:$0xff] }
  0x1c   : > { %4172 = vmatprep.subr.bf16.mxu1 %v4593_v21  ;;  %4148 = vmatprep.subr.bf16.mxu0 %v4594_v22  ;;  %v4960_v48 = vadd.f32 %v4950_v42, %v353_v46  ;;  %v363_v54 = vadd.f32 %v4950_v42, %v336_v51  ;;  %v361_v56 = vadd.f32 %v4950_v42, %v334_v53  ;;  %v315_v17 = vld [vmem:[%s4937_s26 + $0x40] sm:$0xff] }
  0x1d   : > { %508 = vperm.xlu1 %4584, %v450_v15   ;;  %503 = vperm.xlu0 %4583, %v449_v16   ;;  %v364_v63 = vadd.f32 %v4950_v42, %v337_v60  ;;  %v339_v0 = vmul.f32 %v4943_v39, %v312_v62  ;;  %v362_v2 = vadd.f32 %v4950_v42, %v335_v61  ;;  %v316_v15 = vld [vmem:[%s4937_s26 + $0x48] sm:$0x3]  ;;  %v319_v50 = vld [vmem:[%s4937_s26 + $0x60] sm:$0xff] }
  0x1e   : > { %v403_v58 = vmul.f32 0.1, %v363_v54  ;;  %v401_v59 = vmul.f32 0.1, %v361_v56  ;;  %v338_v6 = vmul.f32 %v4943_v39, %v311_v1  ;;  %v341_v8 = vmul.f32 %v4943_v39, %v314_v3 }
  0x1f   : > { %4173 = vmatpush3.bf16.msra.mxu1 %v4593_v21  ;;  %4149 = vmatpush3.bf16.msra.mxu0 %v4594_v22  ;;  %v404_v4 = vmul.f32 0.1, %v364_v63  ;;  %v366_v5 = vadd.f32 %v4950_v42, %v339_v0  ;;  %v402_v7 = vmul.f32 0.1, %v362_v2  ;;  %vm383_vm0 = vcmp.gt.f32.partialorder %v363_v54, 0.0 }
  0x20   : > { %4174 = vmatprep.subr.bf16.mxu1 %v4595_v25  ;;  %4150 = vmatprep.subr.bf16.mxu0 %v4596_v26  ;;  %v365_v11 = vadd.f32 %v4950_v42, %v338_v6  ;;  %v4987_v12 = vadd.f32 %v4950_v42, %v341_v8  ;;  %vm381_vm1 = vcmp.gt.f32.partialorder %v361_v56, 0.0  ;;  %v340_v14 = vmul.f32 %v4943_v39, %v313_v9  ;;  %v321_v8 = vld [vmem:[%s4937_s26 + $0x70] sm:$0xff] }
  0x21   : > { %518 = vperm.xlu1 %4584, %v452_v19   ;;  %513 = vperm.xlu0 %4583, %v451_v20   ;;  %v406_v10 = vmul.f32 0.1, %v366_v5  ;;  %vm384_vm2 = vcmp.gt.f32.partialorder %v364_v63, 0.0  ;;  %vm382_vm3 = vcmp.gt.f32.partialorder %v362_v2, 0.0  ;;  %v318_v19 = vld [vmem:[%s4937_s26 + $0x58] sm:$0x3]  ;;  %v343_v21 = vmul.f32 %v4943_v39, %v316_v15 }
  0x22   : > { %v405_v13 = vmul.f32 0.1, %v365_v11  ;;  %v4992_v16 = vmul.f32 0.1, %v4987_v12  ;;  %v367_v18 = vadd.f32 %v4950_v42, %v340_v14  ;;  %v317_v20 = vld [vmem:[%s4937_s26 + $0x50] sm:$0xff]  ;;  %vm386_vm4 = vcmp.gt.f32.partialorder %v366_v5, 0.0 }
  0x23   : > { %4175 = vmatpush3.bf16.msra.mxu1 %v4595_v25  ;;  %4151 = vmatpush3.bf16.msra.mxu0 %v4596_v26  ;;  %vm385_vm5 = vcmp.gt.f32.partialorder %v365_v11, 0.0  ;;  %v5002_v25 = vadd.f32 %v4950_v42, %v343_v21  ;;  %v344_v26 = vmul.f32 %v4943_v39, %v317_v20  ;;  %vm388_vm7 = vcmp.gt.f32.partialorder %v4987_v12, 0.0  ;;  %v323_v15 = vld [vmem:[%s4937_s26 + $0x80] sm:$0xff] }
  0x24   : > { %4176 = vmatprep.subr.bf16.mxu1 %v4597_v29  ;;  %4152 = vmatprep.subr.bf16.mxu0 %v4598_v30  ;;  %v407_v22 = vmul.f32 0.1, %v367_v18  ;;  %vm387_vm8 = vcmp.gt.f32.partialorder %v367_v18, 0.0  ;;  %v424_v41 = vsel %vm384_vm2, %v364_v63, %v404_v4  ;;  %v422_v44 = vsel %vm382_vm3, %v362_v2, %v402_v7  ;;  %v322_v7 = vld [vmem:[%s4937_s26 + $0x78] sm:$0x3] }
  0x25   : > { %528 = vperm.xlu1 %4584, %v454_v23   ;;  %523 = vperm.xlu0 %4583, %v453_v24   ;;  %v342_v23 = vmul.f32 %v4943_v39, %v315_v17  ;;  %v345_v24 = vmul.f32 %v4943_v39, %v318_v19  ;;  %v5019_v40 = vadd.f32 %v4950_v42, %v344_v26  ;;  %vm390_vm9 = vcmp.gt.f32.partialorder %v5002_v25, 0.0 }
  0x26   : > { %v426_v57 = vsel %vm386_vm4, %v366_v5, %v406_v10  ;;  %v346_v60 = vmul.f32 %v4943_v39, %v319_v50  ;;  %v428_v9 = vsel %vm388_vm7, %v4987_v12, %v4992_v16  ;;  %v427_v10 = vsel %vm387_vm8, %v367_v18, %v407_v22  ;;  %v4603_v22 = vld [vmem:[%s6061_s6 + $0xf0] sm:$0xff]  }
  0x27   : > { %4177 = vmatpush3.bf16.msra.mxu1 %v4597_v29  ;;  %4153 = vmatpush3.bf16.msra.mxu0 %v4598_v30  ;;  %v421_v29 = vsel %vm381_vm1, %v361_v56, %v401_v59  ;;  %v369_v30 = vadd.f32 %v4950_v42, %v342_v23  ;;  %v411_v56 = vmul.f32 0.1, %v5019_v40  ;;  %vm391_vm12 = vcmp.gt.f32.partialorder %v5019_v40, 0.0 }
  0x28   : > { %4178 = vmatprep.subr.bf16.mxu1 %v4599_v33  ;;  %4154 = vmatprep.subr.bf16.mxu0 %v4600_v34  ;;  %v373_v14 = vadd.f32 %v4950_v42, %v346_v60  ;;  %v348_v26 = vmul.f32 %v4943_v39, %v321_v8  ;;  %vm398_vm1 = vcmp.gt.f32.partialorder %v4953_v43, 0.0  ;;  %v418_v8 = vmul.f32 0.1, %v4953_v43 }
  0x29   : > { %538 = vperm.xlu1 %4584, %v456_v27   ;;  %533 = vperm.xlu0 %4583, %v455_v28   ;;  %v320_v27 = vld [vmem:[%s4937_s26 + $0x68] sm:$0x3]  ;;  %v423_v28 = vsel %vm383_vm0, %v363_v54, %v403_v58  ;;  %vm389_vm10 = vcmp.gt.f32.partialorder %v369_v30, 0.0  ;;  %v409_v47 = vmul.f32 0.1, %v369_v30  ;;  %v425_v58 = vsel %vm385_vm5, %v365_v11, %v405_v13 }
  0x2a   : > { %v347_v45 = vmul.f32 %v4943_v39, %v320_v27  ;;  %vm393_vm14 = vcmp.gt.f32.partialorder %v373_v14, 0.0  ;;  %vm897_vm3 = vcmask 1045504   ;;  %vm400_vm4 = vcmp.gt.f32.partialorder %v4960_v48, 0.0 }
  0x2b   : > { %4179 = vmatpush3.bf16.msra.mxu1 %v4599_v33  ;;  %4155 = vmatpush3.bf16.msra.mxu0 %v4600_v34  ;;  %v5011_v33 = vadd.f32 %v4950_v42, %v345_v24  ;;  %v429_v18 = vsel %vm389_vm10, %v369_v30, %v409_v47  ;;  %v349_v24 = vmul.f32 %v4943_v39, %v322_v7  ;;  %v4607_v7 = vld [vmem:[%s6061_s6 + $0xe0] sm:$0xff]   ;;  %vm399_vm5 = vcmp.gt.f32.partialorder %v4963_v49, 0.0 }
  0x2c   : > { %4212 = vmatprep.subr.bf16.mxu1 %v4925_v37  ;;  %4188 = vmatprep.subr.bf16.mxu0 %v4931_v38  ;;  %v374_v59 = vadd.f32 %v4950_v42, %v347_v45 }
  0x2d   : > { %548 = vperm.xlu1 %4584, %v458_v31   ;;  %543 = vperm.xlu0 %4583, %v457_v32   ;;  %v412_v53 = vmul.f32 0.1, %v5011_v33  ;;  %vm392_vm11 = vcmp.gt.f32.partialorder %v5011_v33, 0.0 }
  0x2e   : > { %vm394_vm13 = vcmp.gt.f32.partialorder %v374_v59, 0.0  ;;  %v414_v13 = vmul.f32 0.1, %v374_v59 }
  0x2f   : > { %v432_v30 = vsel %vm392_vm11, %v5011_v33, %v412_v53  ;;  %v431_v33 = vsel %vm391_vm12, %v5019_v40, %v411_v56  ;;  %v4605_v40 = vld [vmem:[%s6061_s6 + $0xe8] sm:$0xff]  }
  0x31   : > { %558 = vperm.xlu1 %4584, %v460_v35   ;;  %553 = vperm.xlu0 %4583, %v459_v36   ;;  %v410_v36 = vmul.f32 0.1, %v5002_v25 }
  0x33   : > { %v430_v16 = vsel %vm390_vm9, %v5002_v25, %v410_v36  ;;  %v4604_v36 = vld [vmem:[%s6061_s6 + $0xb0] sm:$0xff]  }
  0x88   : > { %v474_v31 = vpop.permute.xlu1 %473  ;;  %v464_v32 = vpop.permute.xlu0 %463 }
  0x89   : > { %v5013_v34 = vmul.f32 %v474_v31, %v423_v28  ;;  %v5015_v35 = vmul.f32 %v464_v32, %v421_v29  ;;  %v413_v29 = vmul.f32 0.1, %v373_v14 }
  0x8b   : > { %v581_v46 = vpack.c.bf16 %v5013_v34, %v5015_v35  ;;  %v618_v61 = vrot.slane %v5015_v35, 1  ;;  %v621_v0 = vrot.slane %v5013_v34, 1 }
  0x8c   : > { %v479_v51 = vpop.permute.xlu1 %478  ;;  %v469_v52 = vpop.permute.xlu0 %468 }
  0x8d   : > { %v5029_v54 = vmul.f32 %v479_v51, %v424_v41  ;;  %v5031_v55 = vmul.f32 %v469_v52, %v422_v44  ;;  %4180 = vmatprep.mubr.bf16.mxu1 %v581_v46  ;;  %v350_v41 = vmul.f32 %v4943_v39, %v323_v15  ;;  %v376_v39 = vadd.f32 %v4950_v42, %v349_v24 }
  0x8e   : > { %v375_v51 = vadd.f32 %v4950_v42, %v348_v26  ;;  %v438_v24 = vsel %vm398_vm1, %v4953_v43, %v418_v8  ;;  %v901_v43 = vrot.slane %v5013_v34, 2 }
  0x8f   : > { %v622_v62 = vrot.slane %v5029_v54, 1  ;;  %v619_v63 = vrot.slane %v5031_v55, 1  ;;  %v377_v56 = vadd.f32 %v4950_v42, %v350_v41  ;;  %vm396_vm15 = vcmp.gt.f32.partialorder %v376_v39, 0.0 }
  0x90   : > { %v489_v1 = vpop.permute.xlu1 %488  ;;  %v484_v2 = vpop.permute.xlu0 %483  ;;  %vm395_vm0 = vcmp.gt.f32.partialorder %v375_v51, 0.0 }
  0x91   : > { %v5044_v3 = vmul.f32 %v489_v1, %v426_v57  ;;  %v5046_v4 = vmul.f32 %v484_v2, %v425_v58  ;;  %v620_v5 = vsel %vm617_vm6, %v618_v61, %v619_v63  ;;  %v5050_v6 = vsel %vm617_vm6, %v621_v0, %v622_v62 }
  0x92   : > { %v650_v11 = vpack.c.bf16 %v5050_v6, %v620_v5  ;;  %v434_v57 = vsel %vm394_vm13, %v374_v59, %v414_v13  ;;  %v433_v62 = vsel %vm393_vm14, %v373_v14, %v413_v29  ;;  %v4606_v59 = vld [vmem:[%s6061_s6 + $0xa8] sm:$0xff]   ;;  %v416_v63 = vmul.f32 0.1, %v376_v39 }
  0x93   : > { %v625_v20 = vrot.slane %v5044_v3, 1  ;;  %v624_v12 = vrot.slane %v5046_v4, 1  ;;  %v415_v0 = vmul.f32 0.1, %v375_v51  ;;  %vm397_vm2 = vcmp.gt.f32.partialorder %v377_v56, 0.0 }
  0x94   : > { %v499_v17 = vpop.permute.xlu1 %498  ;;  %v494_v19 = vpop.permute.xlu0 %493  ;;  %4156 = vmatprep.mubr.bf16.mxu0 %v650_v11  ;;  %v436_v15 = vsel %vm396_vm15, %v376_v39, %v416_v63 }
  0x95   : > { %v5063_v21 = vmul.f32 %v499_v17, %v428_v9  ;;  %v5065_v23 = vmul.f32 %v494_v19, %v427_v10  ;;  %v5091_v44 = vsel %vm617_vm6, %v624_v12, %v625_v20  ;;  %v417_v9 = vmul.f32 0.1, %v377_v56  ;;  %v4608_v20 = vld [vmem:[%s6061_s6 + $0xa0] sm:$0xff]  }
  0x96   : > { %v435_v17 = vsel %vm395_vm0, %v375_v51, %v415_v0  ;;  %v902_v12 = vrot.slane %v5029_v54, 2  ;;  %v4612_v0 = vld [vmem:[%s6061_s6 + $0x90] sm:$0xff]  }
  0x97   : > { %v628_v27 = vrot.slane %v5063_v21, 1  ;;  %v627_v28 = vrot.slane %v5065_v23, 1  ;;  %v5081_v25 = vpack.c.bf16 %v5065_v23, %v5046_v4  ;;  %v437_v26 = vsel %vm397_vm2, %v377_v56, %v417_v9 }
  0x98   : > { %v509_v31 = vpop.permute.xlu1 %508  ;;  %v504_v32 = vpop.permute.xlu0 %503 }
  0x99   : > { %v5093_v45 = vmul.f32 %v509_v31, %v430_v16  ;;  %v5095_v46 = vmul.f32 %v504_v32, %v429_v18  ;;  %v5098_v47 = vsel %vm617_vm6, %v627_v28, %v628_v27  ;;  %4181 = vmatmul.mubr.bf16.vlgmr.msra.gmra.mxu1 %v5081_v25  ;;  %v899_v16 = vrot.slane %v5031_v55, 2  ;;  %v4609_v27 = vld [vmem:[%s6061_s6 + $0xd8] sm:$0xff]  }
  0x9a   : > { %v5106_v50 = vpack.c.bf16 %v5098_v47, %v5091_v44  ;;  %4213 = vmatpush3.bf16.msra.mxu1 %v4925_v37  ;;  %v4610_v31 = vld [vmem:[%s6061_s6 + $0x98] sm:$0xff]   ;;  %v898_v32 = vrot.slane %v5015_v35, 2 }
  0x9b   : > { %4214 = vmatprep.subr.bf16.mxu1 %v4603_v22  ;;  %v631_v58 = vrot.slane %v5093_v45, 1  ;;  %v630_v60 = vrot.slane %v5095_v46, 1 }
  0x9c   : > { %v519_v52 = vpop.permute.xlu1 %518  ;;  %v514_v53 = vpop.permute.xlu0 %513  ;;  %4157 = vmatmul.mubr.bf16.vlgmr.msra.gmra.mxu0 %v5106_v50 }
  0x9d   : > { %v5119_v61 = vmul.f32 %v519_v52, %v432_v30  ;;  %v5121_v37 = vmul.f32 %v514_v53, %v431_v33  ;;  %4189 = vmatpush3.bf16.msra.mxu0 %v4931_v38  ;;  %v5143_v13 = vsel %vm617_vm6, %v630_v60, %v631_v58  ;;  %v420_v30 = vmul.f32 0.1, %v4960_v48  ;;  %v4611_v53 = vld [vmem:[%s6061_s6 + $0xd0] sm:$0xff]  }
  0x9e   : > { %4190 = vmatprep.subr.bf16.mxu0 %v4604_v36  ;;  %4215 = vmatpush3.bf16.msra.mxu1 %v4603_v22  ;;  %v1072_v52 = vpack.c.bf16 %v5046_v4, %v5013_v34 }
  0x9f   : > { %v634_v42 = vrot.slane %v5119_v61, 1  ;;  %v633_v1 = vrot.slane %v5121_v37, 1  ;;  %4216 = vmatprep.subr.bf16.mxu1 %v4605_v40  ;;  %v5132_v38 = vpack.c.bf16 %v5121_v37, %v5095_v46  ;;  %v440_v34 = vsel %vm400_vm4, %v4960_v48, %v420_v30 }
  0xa0   : > { %v529_v2 = vpop.permute.xlu1 %528  ;;  %v524_v5 = vpop.permute.xlu0 %523  ;;  %v908_v30 = vrot.slane %v5063_v21, 2  ;;  %v910_v21 = vrot.slane %v5095_v46, 2 }
  0xa1   : > { %v5138_v10 = vmul.f32 %v529_v2, %v434_v57  ;;  %v5140_v11 = vmul.f32 %v524_v5, %v433_v62  ;;  %4191 = vmatpush3.bf16.msra.mxu0 %v4604_v36  ;;  %v5146_v14 = vsel %vm617_vm6, %v633_v1, %v634_v42  ;;  %4184 = vmatprep.mubr.bf16.mxu1 %v5132_v38  ;;  %v419_v36 = vmul.f32 0.1, %v4963_v49 }
  0xa2   : > { %4192 = vmatprep.subr.bf16.mxu0 %v4606_v59  ;;  %v5153_v19 = vpack.c.bf16 %v5146_v14, %v5143_v13  ;;  %4217 = vmatpush3.bf16.msra.mxu1 %v4605_v40  ;;  %v900_v57 = vsel %vm897_vm3, %v898_v32, %v899_v16  ;;  %v5196_v40 = vsel %vm897_vm3, %v901_v43, %v902_v12 }
  0xa3   : > { %4218 = vmatprep.subr.bf16.mxu1 %v4607_v7  ;;  %v637_v28 = vrot.slane %v5138_v10, 1  ;;  %v636_v54 = vrot.slane %v5140_v11, 1  ;;  %v930_v42 = vpack.c.bf16 %v5196_v40, %v900_v57 }
  0xa4   : > { %v539_v18 = vpop.permute.xlu1 %538  ;;  %v534_v22 = vpop.permute.xlu0 %533  ;;  %4160 = vmatprep.mubr.bf16.mxu0 %v5153_v19 }
  0xa5   : > { %v5170_v55 = vmul.f32 %v539_v18, %v436_v15  ;;  %v5172_v29 = vmul.f32 %v534_v22, %v435_v17  ;;  %4193 = vmatpush3.bf16.msra.mxu0 %v4606_v59  ;;  %v5201_v60 = vsel %vm617_vm6, %v636_v54, %v637_v28  ;;  %v439_v59 = vsel %vm399_vm5, %v4963_v49, %v419_v36  ;;  %v4613_v49 = vld [vmem:[%s6061_s6 + $0xc8] sm:$0xff]   ;;  %v4615_v22 = vld [vmem:[%s6061_s6 + $0xc0] sm:$0xff]  }
  0xa6   : > { %4194 = vmatprep.subr.bf16.mxu0 %v4608_v20  ;;  %4219 = vmatpush3.bf16.msra.mxu1 %v4607_v7  ;;  %v4614_v17 = vld [vmem:[%s6061_s6 + $0x88] sm:$0xff]   ;;  %v907_v36 = vrot.slane %v5065_v23, 2 }
  0xa7   : > { %v640_v41 = vrot.slane %v5170_v55, 1  ;;  %v639_v33 = vrot.slane %v5172_v29, 1  ;;  %4220 = vmatprep.subr.bf16.mxu1 %v4609_v27  ;;  %v5187_v35 = vpack.c.bf16 %v5172_v29, %v5140_v11 }
  0xa8   : > { %v549_v39 = vpop.permute.xlu1 %548  ;;  %v544_v51 = vpop.permute.xlu0 %543  ;;  %v5273_v57 = vsel %vm897_vm3, %v907_v36, %v908_v30  ;;  %v4635_v36 = vld [vmem:[%s6061_s6 + $0x1f0] sm:$0xff]  }
  0xa9   : > { %v578_v56 = vmul.f32 %v549_v39, %v438_v24  ;;  %v5198_v58 = vmul.f32 %v544_v51, %v437_v26  ;;  %4195 = vmatpush3.bf16.msra.mxu0 %v4608_v20  ;;  %v5204_v62 = vsel %vm617_vm6, %v639_v33, %v640_v41  ;;  %4185 = vmatmul.mubr.bf16.gmra.mxu1 %v5187_v35  ;;  %v914_v41 = vrot.slane %v5119_v61, 2  ;;  %v4617_v39 = vld [vmem:[%s6061_s6 + $0x178] sm:$0xff]  }
  0xaa   : > { %4196 = vmatprep.subr.bf16.mxu0 %v4610_v31  ;;  %v5215_v63 = vpack.c.bf16 %v5204_v62, %v5201_v60  ;;  %4221 = vmatpush3.bf16.msra.mxu1 %v4609_v27  ;;  %v913_v33 = vrot.slane %v5121_v37, 2  ;;  %v905_v51 = vrot.slane %v5044_v3, 2  ;;  %v4618_v61 = vld [vmem:[%s6061_s6 + $0x138] sm:$0xff]  }
  0xab   : > { %4228 = vmatprep.mubr.bf16.mxu1 %v1072_v52  ;;  %v1217_v1 = vrot.slane %v578_v56, 1  ;;  %v1363_v2 = vrot.slane %v578_v56, 2  ;;  %4222 = vmatprep.subr.bf16.mxu1 %v4611_v53  ;;  %v1216_v7 = vrot.slane %v5198_v58, 1  ;;  %v1362_v8 = vrot.slane %v5198_v58, 2 }
  0xac   : > { %v559_v5 = vpop.permute.xlu1 %558  ;;  %v554_v48 = vpop.permute.xlu0 %553  ;;  %4161 = vmatmul.mubr.bf16.gmra.mxu0 %v5215_v63  ;;  %v904_v52 = vrot.slane %v5046_v4, 2  ;;  %v1073_v56 = vpack.c.bf16 %v5095_v46, %v5065_v23  ;;  %v5278_v3 = vsel %vm897_vm3, %v913_v33, %v914_v41  ;;  %v4619_v4 = vld [vmem:[%s6061_s6 + $0x170] sm:$0xff]   ;;  %v1221_v33 = vpack.c.bf16 %v5143_v13, %v5098_v47  ;;  %v4638_v47 = vld [vmem:[%s6061_s6 + $0x1a8] sm:$0xff]  }
  0xad   : > { %v580_v9 = vmul.f32 %v559_v5, %v440_v34  ;;  %v5227_v15 = vmul.f32 %v554_v48, %v439_v59  ;;  %4197 = vmatpush3.bf16.msra.mxu0 %v4610_v31  ;;  %4204 = vmatprep.mubr.bf16.mxu0 %v930_v42  ;;  %v5240_v26 = vsel %vm897_vm3, %v1362_v8, %v1363_v2  ;;  %v4616_v31 = vld [vmem:[%s6061_s6 + $0x80] sm:$0xff]   ;;  %v4620_v46 = vld [vmem:[%s6061_s6 + $0x130] sm:$0xff]   ;;  %v919_v42 = vrot.slane %v5172_v29, 2 }
  0xae   : > { %4198 = vmatprep.subr.bf16.mxu0 %v4612_v0  ;;  %4223 = vmatpush3.bf16.msra.mxu1 %v4611_v53  ;;  %v5243_v27 = vsel %vm617_vm6, %v1216_v7, %v1217_v1  ;;  %v911_v53 = vrot.slane %v5093_v45, 2  ;;  %v1074_v45 = vpack.c.bf16 %v5140_v11, %v5121_v37  ;;  %v906_v34 = vsel %vm897_vm3, %v904_v52, %v905_v51  ;;  %v4621_v1 = vld [vmem:[%s6061_s6 + $0x168] sm:$0xff]  }
  0xaf   : > { %v1650_v20 = vrot.slane %v580_v9, 1  ;;  %v1793_v12 = vrot.slane %v580_v9, 2  ;;  %v1649_v16 = vrot.slane %v5227_v15, 1  ;;  %v1792_v18 = vrot.slane %v5227_v15, 2  ;;  %4224 = vmatprep.subr.bf16.mxu1 %v4613_v49  ;;  %v4624_v9 = vld [vmem:[%s6061_s6 + $0x120] sm:$0xff]   ;;  %v4637_v52 = vld [vmem:[%s6061_s6 + $0x1e8] sm:$0xff]  }
  0xb0   : > { %v1508_v24 = vpack.c.bf16 %v5227_v15, %v5198_v58  ;;  %v5287_v59 = vpack.c.bf16 %v5273_v57, %v906_v34  ;;  %v5290_v23 = vsel %vm897_vm3, %v910_v21, %v911_v53  ;;  %v917_v2 = vrot.slane %v5138_v10, 2  ;;  %v4623_v10 = vld [vmem:[%s6061_s6 + $0x160] sm:$0xff]   ;;  %v4641_v21 = vld [vmem:[%s6061_s6 + $0x1d8] sm:$0xff]  }
  0xb1   : > { %4199 = vmatpush3.bf16.msra.mxu0 %v4612_v0  ;;  %v5246_v28 = vsel %vm617_vm6, %v1649_v16, %v1650_v20  ;;  %v5249_v54 = vsel %vm897_vm3, %v1792_v18, %v1793_v12  ;;  %v920_v0 = vrot.slane %v5170_v55, 2  ;;  %v5299_v37 = vpack.c.bf16 %v5278_v3, %v5290_v23  ;;  %v4622_v55 = vld [vmem:[%s6061_s6 + $0x128] sm:$0xff]   ;;  %v4631_v16 = vld [vmem:[%s6061_s6 + $0x140] sm:$0xff]   ;;  %v4657_v15 = vld [vmem:[%s6062_s7 + $0x38] sm:$0xff]  }
  0xb2   : > { %4200 = vmatprep.subr.bf16.mxu0 %v4614_v17  ;;  %v1653_v43 = vpack.c.bf16 %v5246_v28, %v5243_v27  ;;  %v1796_v32 = vpack.c.bf16 %v5249_v54, %v5240_v26  ;;  %4225 = vmatpush3.bf16.msra.mxu1 %v4613_v49  ;;  %v916_v5 = vrot.slane %v5140_v11, 2  ;;  %v1075_v49 = vpack.c.bf16 %v5198_v58, %v5172_v29  ;;  %v4629_v20 = vld [vmem:[%s6061_s6 + $0x148] sm:$0xff]   ;;  %v4632_v18 = vld [vmem:[%s6061_s6 + $0x100] sm:$0xff]  }
  0xb3   : > { %4226 = vmatprep.subr.bf16.mxu1 %v4615_v22  ;;  %v5312_v48 = vsel %vm897_vm3, %v919_v42, %v920_v0  ;;  %v1366_v11 = vpack.c.bf16 %v906_v34, %v5196_v40  ;;  %v1220_v29 = vpack.c.bf16 %v5091_v44, %v5050_v6  ;;  %v4625_v40 = vld [vmem:[%s6061_s6 + $0x158] sm:$0xff]   ;;  %v4627_v6 = vld [vmem:[%s6061_s6 + $0x150] sm:$0xff]   ;;  %v4630_v12 = vld [vmem:[%s6061_s6 + $0x108] sm:$0xff]   ;;  %v1367_v30 = vpack.c.bf16 %v5290_v23, %v5273_v57 }
  0xb4   : > { %v918_v7 = vsel %vm897_vm3, %v916_v5, %v917_v2  ;;  %v4628_v44 = vld [vmem:[%s6061_s6 + $0x110] sm:$0xff]   ;;  %v1222_v51 = vpack.c.bf16 %v5201_v60, %v5146_v14  ;;  %v1369_v13 = vpack.c.bf16 %v5240_v26, %v5312_v48  ;;  %v4639_v14 = vld [vmem:[%s6061_s6 + $0x1e0] sm:$0xff]   ;;  %v1223_v60 = vpack.c.bf16 %v5243_v27, %v5204_v62  ;;  %v4642_v62 = vld [vmem:[%s6061_s6 + $0x198] sm:$0xff]  }
  0xb5   : > { %4201 = vmatpush3.bf16.msra.mxu0 %v4614_v17  ;;  %v5322_v8 = vpack.c.bf16 %v5312_v48, %v918_v7  ;;  %v4626_v17 = vld [vmem:[%s6061_s6 + $0x118] sm:$0xff]   ;;  %v1368_v41 = vpack.c.bf16 %v918_v7, %v5278_v3  ;;  %v4640_v53 = vld [vmem:[%s6061_s6 + $0x1a0] sm:$0xff]   ;;  %v4646_v57 = vld [vmem:[%s6061_s6 + $0x188] sm:$0xff]  }
  0xb6   : > { %4202 = vmatprep.subr.bf16.mxu0 %v4616_v31  ;;  %4227 = vmatpush3.bf16.msra.mxu1 %v4615_v22  ;;  %v4633_v22 = vld [vmem:[%s6061_s6 + $0x1f8] sm:$0xff]   ;;  %v4648_v3 = vld [vmem:[%s6061_s6 + $0x180] sm:$0xff]   ;;  %v4651_v34 = vld [vmem:[%s6061_s6 + $0x228] sm:$0xff]  }
  0xb7   : > { %4260 = vmatprep.subr.bf16.mxu1 %v4617_v39  ;;  %v4655_v58 = vld [vmem:[%s6061_s6 + $0x208] sm:$0xff]   ;;  %v4659_v27 = vld [vmem:[%s6062_s7 + $0x30] sm:$0xff]   ;;  %v4666_v0 = vld [vmem:[%s6062_s7 + $0x58] sm:$0xff]  }
  0xb8   : > { %v4660_v26 = vld [vmem:[%s6062_s7 + $0x70] sm:$0xff]   ;;  %v4661_v28 = vld [vmem:[%s6062_s7 + $0x28] sm:$0xff]   ;;  %v4671_v48 = vld [vmem:[%s6062_s7] sm:$0xff]  }
  0xb9   : > { %4203 = vmatpush3.bf16.msra.mxu0 %v4616_v31  ;;  %4229 = vmatmul.mubr.bf16.vlgmr.msra.gmra.mxu1 %v1073_v56  ;;  %v4634_v31 = vld [vmem:[%s6061_s6 + $0x1b8] sm:$0xff]   ;;  %v4647_v56 = vld [vmem:[%s6061_s6 + $0x1c0] sm:$0xff]   ;;  %v4662_v54 = vld [vmem:[%s6062_s7 + $0x68] sm:$0xff]  }
  0xba   : > { %4236 = vmatprep.subr.bf16.mxu0 %v4618_v61  ;;  %4232 = vmatprep.mubr.bf16.mxu1 %v1074_v45  ;;  %v4650_v45 = vld [vmem:[%s6061_s6 + $0x230] sm:$0xff]   ;;  %v4669_v2 = vld [vmem:[%s6062_s7 + $0x8] sm:$0xff]  }
  0xbb   : > { %4261 = vmatpush3.bf16.msra.mxu1 %v4617_v39  ;;  %v4636_v39 = vld [vmem:[%s6061_s6 + $0x1b0] sm:$0xff]  }
  0xbc   : > { %4205 = vmatmul.mubr.bf16.vlgmr.msra.gmra.mxu0 %v5287_v59  ;;  %4262 = vmatprep.subr.bf16.mxu1 %v4619_v4  ;;  %v4667_v42 = vld [vmem:[%s6062_s7 + $0x10] sm:$0xff]  }
  0xbd   : > { %4208 = vmatprep.mubr.bf16.mxu0 %v5299_v37  ;;  %4237 = vmatpush3.bf16.msra.mxu0 %v4618_v61  ;;  %v4644_v61 = vld [vmem:[%s6061_s6 + $0x190] sm:$0xff]  }
  0xbe   : > { %4238 = vmatprep.subr.bf16.mxu0 %v4620_v46 }
  0xbf   : > { %4263 = vmatpush3.bf16.msra.mxu1 %v4619_v4  ;;  %v4649_v4 = vld [vmem:[%s6061_s6 + $0x238] sm:$0xff]  }
  0xc0   : > { %4264 = vmatprep.subr.bf16.mxu1 %v4621_v1 }
  0xc1   : > { %4239 = vmatpush3.bf16.msra.mxu0 %v4620_v46  ;;  %4233 = vmatmul.mubr.bf16.gmra.mxu1 %v1075_v49  ;;  %v6064_v46 = vmov 0.0  }
  0xc2   : > { %4240 = vmatprep.subr.bf16.mxu0 %v4622_v55  ;;  %4276 = vmatprep.mubr.bf16.mxu1 %v1366_v11  ;;  %1995 = vst [vmem:[#allocation2 + $0x30] sm:$0xff] %v6064_v46  ;;  %1996 = vst [vmem:[#allocation2 + $0x38] sm:$0x3] %v6064_v46 }
  0xc3   : > { %4265 = vmatpush3.bf16.msra.mxu1 %v4621_v1  ;;  %1990 = vst [vmem:[#allocation2 + $0x8] sm:$0x3] %v6064_v46  ;;  %1991 = vst [vmem:[#allocation2 + $0x10] sm:$0xff] %v6064_v46  ;;  %v4668_v1 = vld [vmem:[%s6062_s7 + $0x50] sm:$0xff]  }
  0xc4   : > { %4209 = vmatmul.mubr.bf16.gmra.mxu0 %v5322_v8  ;;  %4266 = vmatprep.subr.bf16.mxu1 %v4623_v10  ;;  %1992 = vst [vmem:[#allocation2 + $0x18] sm:$0x3] %v6064_v46  ;;  %1993 = vst [vmem:[#allocation2 + $0x20] sm:$0xff] %v6064_v46 }
  0xc5   : > { %4241 = vmatpush3.bf16.msra.mxu0 %v4622_v55  ;;  %4252 = vmatprep.mubr.bf16.mxu0 %v1220_v29  ;;  %1994 = vst [vmem:[#allocation2 + $0x28] sm:$0x3] %v6064_v46  ;;  %1997 = vst [vmem:[#allocation2 + $0x40] sm:$0xff] %v6064_v46  ;;  %v4670_v55 = vld [vmem:[%s6062_s7 + $0x48] sm:$0xff]  }
  0xc6   : > { %4242 = vmatprep.subr.bf16.mxu0 %v4624_v9  ;;  %1998 = vst [vmem:[#allocation2 + $0x48] sm:$0x3] %v6064_v46  ;;  %1999 = vst [vmem:[#allocation2 + $0x50] sm:$0xff] %v6064_v46 }
  0xc7   : > { %4267 = vmatpush3.bf16.msra.mxu1 %v4623_v10  ;;  %2000 = vst [vmem:[#allocation2 + $0x58] sm:$0x3] %v6064_v46  ;;  %2001 = vst [vmem:[#allocation2 + $0x60] sm:$0xff] %v6064_v46  ;;  %v4672_v10 = vld [vmem:[%s6062_s7 + $0x40] sm:$0xff]  }
  0xc8   : > { %4268 = vmatprep.subr.bf16.mxu1 %v4625_v40  ;;  %2002 = vst [vmem:[#allocation2 + $0x68] sm:$0x3] %v6064_v46  ;;  %2003 = vst [vmem:[#allocation2 + $0x70] sm:$0xff] %v6064_v46 }
  0xc9   : > { %4243 = vmatpush3.bf16.msra.mxu0 %v4624_v9  ;;  %2004 = vst [vmem:[#allocation2 + $0x78] sm:$0x3] %v6064_v46  ;;  %2005 = vst [vmem:[#allocation2 + $0x80] sm:$0xff] %v6064_v46 }
  0xca   : > { %4244 = vmatprep.subr.bf16.mxu0 %v4626_v17  ;;  %2006 = vst [vmem:[#allocation2 + $0x88] sm:$0x3] %v6064_v46  ;;  %2008 = vst [vmem:[#allocation2 + $0x98] sm:$0x3] %v6064_v46 }
  0xcb   : > { %4269 = vmatpush3.bf16.msra.mxu1 %v4625_v40  ;;  %v5540_v40 = vld [vmem:[%s6062_s7 + $0xb8] sm:$0xff]  }
  0xcc   : > { %4270 = vmatprep.subr.bf16.mxu1 %v4627_v6  ;;  %6069 = vst [vmem:[#allocation4_spill] sm:$0xff] %v5540_v40 }
  0xcd   : > { %4245 = vmatpush3.bf16.msra.mxu0 %v4626_v17 }
  0xce   : > { %4246 = vmatprep.subr.bf16.mxu0 %v4628_v44 }
  0xcf   : > { %4271 = vmatpush3.bf16.msra.mxu1 %v4627_v6 }
  0xd0   : > { %4272 = vmatprep.subr.bf16.mxu1 %v4629_v20 }
  0xd1   : > { %4247 = vmatpush3.bf16.msra.mxu0 %v4628_v44 }
  0xd2   : > { %4248 = vmatprep.subr.bf16.mxu0 %v4630_v12 }
  0xd3   : > { %4273 = vmatpush3.bf16.msra.mxu1 %v4629_v20 }
  0xd4   : > { %4274 = vmatprep.subr.bf16.mxu1 %v4631_v16 }
  0xd5   : > { %4249 = vmatpush3.bf16.msra.mxu0 %v4630_v12 }
  0xd6   : > { %4250 = vmatprep.subr.bf16.mxu0 %v4632_v18 }
  0xd7   : > { %4275 = vmatpush3.bf16.msra.mxu1 %v4631_v16 }
  0xd8   : > { %4308 = vmatprep.subr.bf16.mxu1 %v4633_v22 }
  0xd9   : > { %4251 = vmatpush3.bf16.msra.mxu0 %v4632_v18 }
  0xda   : > { %4277 = vmatmul.mubr.bf16.vlgmr.msra.gmra.mxu1 %v1367_v30  ;;  %4284 = vmatprep.subr.bf16.mxu0 %v4634_v31 }
  0xdb   : > { %4280 = vmatprep.mubr.bf16.mxu1 %v1368_v41  ;;  %4309 = vmatpush3.bf16.msra.mxu1 %v4633_v22 }
  0xdc   : > { %4253 = vmatmul.mubr.bf16.vlgmr.msra.gmra.mxu0 %v1221_v33  ;;  %4310 = vmatprep.subr.bf16.mxu1 %v4635_v36 }
  0xdd   : > { %4256 = vmatprep.mubr.bf16.mxu0 %v1222_v51  ;;  %4285 = vmatpush3.bf16.msra.mxu0 %v4634_v31 }
  0xde   : > { %4286 = vmatprep.subr.bf16.mxu0 %v4636_v39 }
  0xdf   : > { %4311 = vmatpush3.bf16.msra.mxu1 %v4635_v36 }
  0xe0   : > { %4312 = vmatprep.subr.bf16.mxu1 %v4637_v52 }
  0xe1   : > { %4287 = vmatpush3.bf16.msra.mxu0 %v4636_v39 }
  0xe2   : > { %4281 = vmatmul.mubr.bf16.gmra.mxu1 %v1369_v13  ;;  %4288 = vmatprep.subr.bf16.mxu0 %v4638_v47 }
  0xe3   : > { %4313 = vmatpush3.bf16.msra.mxu1 %v4637_v52  ;;  %4324 = vmatprep.mubr.bf16.mxu1 %v5106_v50  ;;  %v4643_v50 = vld [vmem:[%s6061_s6 + $0x1d0] sm:$0xff]  }
  0xe4   : > { %4257 = vmatmul.mubr.bf16.gmra.mxu0 %v1223_v60  ;;  %4314 = vmatprep.subr.bf16.mxu1 %v4639_v14 }
  0xe5   : > { %4289 = vmatpush3.bf16.msra.mxu0 %v4638_v47  ;;  %4300 = vmatprep.mubr.bf16.mxu0 %v5081_v25  ;;  %v4645_v25 = vld [vmem:[%s6061_s6 + $0x1c8] sm:$0xff]  }
  0xe6   : > { %4290 = vmatprep.subr.bf16.mxu0 %v4640_v53 }
  0xe7   : > { %4315 = vmatpush3.bf16.msra.mxu1 %v4639_v14 }
  0xe8   : > { %4316 = vmatprep.subr.bf16.mxu1 %v4641_v21 }
  0xe9   : > { %4291 = vmatpush3.bf16.msra.mxu0 %v4640_v53 }
  0xea   : > { %4292 = vmatprep.subr.bf16.mxu0 %v4642_v62 }
  0xeb   : > { %4317 = vmatpush3.bf16.msra.mxu1 %v4641_v21 }
  0xec   : > { %4318 = vmatprep.subr.bf16.mxu1 %v4643_v50 }
  0xed   : > { %4293 = vmatpush3.bf16.msra.mxu0 %v4642_v62 }
  0xee   : > { %4294 = vmatprep.subr.bf16.mxu0 %v4644_v61 }
  0xef   : > { %4319 = vmatpush3.bf16.msra.mxu1 %v4643_v50 }
  0xf0   : > { %4320 = vmatprep.subr.bf16.mxu1 %v4645_v25 }
  0xf1   : > { %4295 = vmatpush3.bf16.msra.mxu0 %v4644_v61 }
  0xf2   : > { %4296 = vmatprep.subr.bf16.mxu0 %v4646_v57 }
  0xf3   : > { %4321 = vmatpush3.bf16.msra.mxu1 %v4645_v25 }
  0xf4   : > { %4322 = vmatprep.subr.bf16.mxu1 %v4647_v56 }
  0xf5   : > { %4297 = vmatpush3.bf16.msra.mxu0 %v4646_v57 }
  0xf6   : > { %4298 = vmatprep.subr.bf16.mxu0 %v4648_v3 }
  0xf7   : > { %4323 = vmatpush3.bf16.msra.mxu1 %v4647_v56 }
  0xf9   : > { %4299 = vmatpush3.bf16.msra.mxu0 %v4648_v3 }
  0xfa   : > { %4325 = vmatmul.mubr.bf16.vlgmr.msra.gmra.mxu1 %v5153_v19  ;;  %4332 = vmatprep.subr.bf16.mxu0 %v4649_v4  ;;  %v4652_v19 = vld [vmem:[%s6061_s6 + $0x220] sm:$0xff]  }
  0xfb   : > { %4328 = vmatprep.mubr.bf16.mxu1 %v5215_v63  ;;  %v4656_v63 = vld [vmem:[%s6061_s6 + $0x200] sm:$0xff]  }
  0xfc   : > { %4301 = vmatmul.mubr.bf16.vlgmr.msra.gmra.mxu0 %v5132_v38  ;;  %v4653_v38 = vld [vmem:[%s6061_s6 + $0x218] sm:$0xff]  }
  0xfd   : > { %4304 = vmatprep.mubr.bf16.mxu0 %v5187_v35  ;;  %4333 = vmatpush3.bf16.msra.mxu0 %v4649_v4  ;;  %v4654_v35 = vld [vmem:[%s6061_s6 + $0x210] sm:$0xff]  }
  0xfe   : > { %4334 = vmatprep.subr.bf16.mxu0 %v4650_v45 }
 0x101   : > { %4335 = vmatpush3.bf16.msra.mxu0 %v4650_v45 }
 0x102   : > { %4329 = vmatmul.mubr.bf16.gmra.mxu1 %v1653_v43  ;;  %4336 = vmatprep.subr.bf16.mxu0 %v4651_v34  ;;  %v4663_v43 = vld [vmem:[%s6062_s7 + $0x20] sm:$0xff]  }
 0x104   : > { %4305 = vmatmul.mubr.bf16.gmra.mxu0 %v1508_v24  ;;  %v4658_v24 = vld [vmem:[%s6062_s7 + $0x78] sm:$0xff]  }
 0x105   : > { %4337 = vmatpush3.bf16.msra.mxu0 %v4651_v34  ;;  %4348 = vmatprep.mubr.bf16.mxu0 %v5287_v59  ;;  %v4665_v59 = vld [vmem:[%s6062_s7 + $0x18] sm:$0xff]  }
 0x106   : > { %4338 = vmatprep.subr.bf16.mxu0 %v4652_v19  ;;  %4356 = vmatprep.subr.bf16.mxu1 %v4658_v24 }
 0x107   : > { %4357 = vmatpush3.bf16.msra.mxu1 %v4658_v24 }
 0x108   : > { %4358 = vmatprep.subr.bf16.mxu1 %v4660_v26 }
 0x109   : > { %4339 = vmatpush3.bf16.msra.mxu0 %v4652_v19 }
 0x10a   : > { %4340 = vmatprep.subr.bf16.mxu0 %v4653_v38 }
 0x10b   : > { %4359 = vmatpush3.bf16.msra.mxu1 %v4660_v26 }
 0x10c   : > { %4360 = vmatprep.subr.bf16.mxu1 %v4662_v54 }
 0x10d   : > { %4341 = vmatpush3.bf16.msra.mxu0 %v4653_v38 }
 0x10e   : > { %4342 = vmatprep.subr.bf16.mxu0 %v4654_v35 }
 0x10f   : > { %4361 = vmatpush3.bf16.msra.mxu1 %v4662_v54 }
 0x111   : > { %4343 = vmatpush3.bf16.msra.mxu0 %v4654_v35 }
 0x112   : > { %4344 = vmatprep.subr.bf16.mxu0 %v4655_v58 }
 0x115   : > { %4345 = vmatpush3.bf16.msra.mxu0 %v4655_v58 }
 0x116   : > { %4346 = vmatprep.subr.bf16.mxu0 %v4656_v63 }
 0x119   : > { %4347 = vmatpush3.bf16.msra.mxu0 %v4656_v63 }
 0x11a   : > { %4380 = vmatprep.subr.bf16.mxu0 %v4657_v15 }
 0x11c   : > { %4349 = vmatmul.mubr.bf16.vlgmr.msra.gmra.mxu0 %v5299_v37 }
 0x11d   : > { %4352 = vmatprep.mubr.bf16.mxu0 %v5322_v8  ;;  %4381 = vmatpush3.bf16.msra.mxu0 %v4657_v15  ;;  %v5534_v8 = vld [vmem:[%s6062_s7 + $0xf8] sm:$0xff]  }
 0x11e   : > { %4382 = vmatprep.subr.bf16.mxu0 %v4659_v27  ;;  %6068 = vst [vmem:[#allocation3_spill] sm:$0xff] %v5534_v8 }
 0x121   : > { %4383 = vmatpush3.bf16.msra.mxu0 %v4659_v27 }
 0x122   : > { %4384 = vmatprep.subr.bf16.mxu0 %v4661_v28 }
 0x124   : > { %4353 = vmatmul.mubr.bf16.gmra.mxu0 %v1796_v32  ;;  %v4664_v32 = vld [vmem:[%s6062_s7 + $0x60] sm:$0xff]  }
 0x125   : > { %4385 = vmatpush3.bf16.msra.mxu0 %v4661_v28  ;;  %4362 = vmatprep.subr.bf16.mxu1 %v4664_v32 }
 0x126   : > { %4386 = vmatprep.subr.bf16.mxu0 %v4663_v43  ;;  %4363 = vmatpush3.bf16.msra.mxu1 %v4664_v32 }
 0x127   : > { %4364 = vmatprep.subr.bf16.mxu1 %v4666_v0 }
 0x129   : > { %4387 = vmatpush3.bf16.msra.mxu0 %v4663_v43 }
 0x12a   : > { %4388 = vmatprep.subr.bf16.mxu0 %v4665_v59  ;;  %4365 = vmatpush3.bf16.msra.mxu1 %v4666_v0 }
 0x12b   : > { %4366 = vmatprep.subr.bf16.mxu1 %v4668_v1 }
 0x12d   : > { %4389 = vmatpush3.bf16.msra.mxu0 %v4665_v59 }
 0x12e   : > { %4390 = vmatprep.subr.bf16.mxu0 %v4667_v42  ;;  %4367 = vmatpush3.bf16.msra.mxu1 %v4668_v1 }
 0x12f   : > { %4368 = vmatprep.subr.bf16.mxu1 %v4670_v55 }
 0x131   : > { %4391 = vmatpush3.bf16.msra.mxu0 %v4667_v42 }
 0x132   : > { %4392 = vmatprep.subr.bf16.mxu0 %v4669_v2  ;;  %4369 = vmatpush3.bf16.msra.mxu1 %v4670_v55 }
 0x133   : > { %4370 = vmatprep.subr.bf16.mxu1 %v4672_v10 }
 0x135   : > { %4393 = vmatpush3.bf16.msra.mxu0 %v4669_v2 }
 0x136   : > { %4394 = vmatprep.subr.bf16.mxu0 %v4671_v48  ;;  %4371 = vmatpush3.bf16.msra.mxu1 %v4672_v10 }
 0x137   : > { %4404 = vmatprep.subr.bf16.mxu1 %v5540_v40 }
 0x139   : > { %4395 = vmatpush3.bf16.msra.mxu0 %v4671_v48 }
 0x13a   : > { %4428 = vmatprep.subr.bf16.mxu0 %v5534_v8 }
 0x159   : > { %v4182_v11 = vpop.f32.mrf.mxu1 }
 0x15b   : > { %v866_v9 = vpop.f32.mrf.mxu1 }
 0x15c   : > { %v5482_v23 = vpop.f32.mrf.mxu0 }
 0x15d   : > { %v4183_v17 = vpop.f32.mrf.mxu1  ;;  %v875_v54 = vadd.f32 %v4182_v11, %v5482_v23 }
 0x15e   : > { %v5508_v37 = vpop.f32.mrf.mxu0 }
 0x15f   : > { %v869_v44 = vpop.f32.mrf.mxu1  ;;  %v867_v59 = vadd.f32 %v866_v9, %v5508_v37 }
 0x160   : > { %v5516_v5 = vpop.f32.mrf.mxu0 }
 0x161   : > { %v878_v1 = vadd.f32 %v4183_v17, %v5516_v5 }
 0x162   : > { %v5524_v49 = vpop.f32.mrf.mxu0 }
 0x163   : > { %v870_v46 = vadd.f32 %v869_v44, %v5524_v49 }
 0x169   : > { %v4186_v12 = vpop.f32.mrf.mxu1 }
 0x16b   : > { %v882_v18 = vpop.f32.mrf.mxu1 }
 0x16c   : > { %v5529_v7 = vpop.f32.mrf.mxu0 }
 0x16d   : > { %v4187_v31 = vpop.f32.mrf.mxu1  ;;  %v891_v23 = vadd.f32 %v4186_v12, %v5529_v7 }
 0x16e   : > { %v769_v29 = vpop.f32.mrf.mxu0 }
 0x16f   : > { %v885_v36 = vpop.f32.mrf.mxu1  ;;  %v883_v11 = vadd.f32 %v882_v18, %v769_v29 }
 0x170   : > { %v4163_v6 = vpop.f32.mrf.mxu0 }
 0x171   : > { %v894_v9 = vadd.f32 %v4187_v31, %v4163_v6 }
 0x172   : > { %v5543_v20 = vpop.f32.mrf.mxu0 }
 0x173   : > { %6070 = vst [vmem:[#allocation5_spill] sm:$0xff] %v5543_v20 }
 0x179   : > { %v4230_v33 = vpop.f32.mrf.mxu1 }
 0x17b   : > { %v1175_v51 = vpop.f32.mrf.mxu1 }
 0x17c   : > { %v4206_v16 = vpop.f32.mrf.mxu0 }
 0x17d   : > { %v4231_v47 = vpop.f32.mrf.mxu1  ;;  %v1066_v0 = vadd.f32 %v4206_v16, %v875_v54 }
 0x17e   : > { %v1033_v22 = vpop.f32.mrf.mxu0 }
 0x17f   : > { %v1178_v14 = vpop.f32.mrf.mxu1  ;;  %v1064_v2 = vadd.f32 %v1033_v22, %v867_v59  ;;  %v1208_v10 = vadd.f32 %v4230_v33, %v1066_v0 }
 0x180   : > { %v4207_v30 = vpop.f32.mrf.mxu0 }
 0x181   : > { %v4234_v53 = vpop.f32.mrf.mxu1  ;;  %v1067_v48 = vadd.f32 %v4207_v30, %v878_v1  ;;  %v6074_v30 = vld [vmem:[#allocation5_spill] sm:$0xff] }
 0x182   : > { %v1036_v41 = vpop.f32.mrf.mxu0  ;;  %v886_v33 = vadd.f32 %v885_v36, %v6074_v30 }
 0x183   : > { %v1191_v62 = vpop.f32.mrf.mxu1  ;;  %v1209_v37 = vadd.f32 %v4231_v47, %v1067_v48 }
 0x184   : > { %v4210_v39 = vpop.f32.mrf.mxu0 }
 0x185   : > { %v4235_v61 = vpop.f32.mrf.mxu1  ;;  %v1070_v16 = vadd.f32 %v4210_v39, %v891_v23 }
 0x186   : > { %v1049_v52 = vpop.f32.mrf.mxu0 }
 0x187   : > { %v5545_v57 = vpop.f32.mrf.mxu1  ;;  %v1068_v54 = vadd.f32 %v1049_v52, %v883_v11  ;;  %v1212_v29 = vadd.f32 %v4234_v53, %v1070_v16 }
 0x188   : > { %v4211_v13 = vpop.f32.mrf.mxu0  ;;  %6071 = vst [vmem:[#allocation6_spill] sm:$0xff] %v5545_v57 }
 0x189   : > { %v1071_v59 = vadd.f32 %v4211_v13, %v894_v9 }
 0x18a   : > { %v1052_v60 = vpop.f32.mrf.mxu0 }
 0x18b   : > { %v1069_v0 = vadd.f32 %v1052_v60, %v886_v33  ;;  %v1213_v39 = vadd.f32 %v4235_v61, %v1071_v59 }
 0x18f   : > { %v6075_v36 = vld [vmem:[#allocation6_spill] sm:$0xff] }
 0x190   : > { %v1211_v13 = vadd.f32 %v6075_v36, %v1069_v0 }
 0x19a   : > { %v4278_v3 = vpop.f32.mrf.mxu1 }
 0x19c   : > { %v4254_v21 = vpop.f32.mrf.mxu0  ;;  %v1469_v45 = vpop.f32.mrf.mxu1 }
 0x19d   : > { %v1356_v8 = vadd.f32 %v4254_v21, %v1208_v10 }
 0x19e   : > { %v1323_v50 = vpop.f32.mrf.mxu0  ;;  %v4279_v19 = vpop.f32.mrf.mxu1 }
 0x19f   : > { %v1502_v22 = vadd.f32 %v4278_v3, %v1356_v8 }
 0x1a0   : > { %v4255_v25 = vpop.f32.mrf.mxu0  ;;  %v1472_v35 = vpop.f32.mrf.mxu1 }
 0x1a1   : > { %v1357_v17 = vadd.f32 %v4255_v25, %v1209_v37 }
 0x1a2   : > { %v1326_v56 = vpop.f32.mrf.mxu0  ;;  %v4282_v63 = vpop.f32.mrf.mxu1 }
 0x1a4   : > { %v4258_v4 = vpop.f32.mrf.mxu0  ;;  %v1485_v24 = vpop.f32.mrf.mxu1 }
 0x1a5   : > { %v1360_v6 = vadd.f32 %v4258_v4, %v1212_v29 }
 0x1a6   : > { %v1339_v34 = vpop.f32.mrf.mxu0  ;;  %v5547_v26 = vpop.f32.mrf.mxu1 }
 0x1a7   : > { %6072 = vst [vmem:[#allocation7_spill] sm:$0xff] %v5547_v26  ;;  %v1206_v26 = vadd.f32 %v1175_v51, %v1064_v2  ;;  %v1506_v4 = vadd.f32 %v4282_v63, %v1360_v6 }
 0x1a8   : > { %v4259_v38 = vpop.f32.mrf.mxu0  ;;  %v5550_v43 = vpop.f32.mrf.mxu1 }
 0x1a9   : > { %6073 = vst [vmem:[#allocation8_spill] sm:$0xff] %v5550_v43  ;;  %v1065_v43 = vadd.f32 %v1036_v41, %v870_v46  ;;  %v1354_v20 = vadd.f32 %v1323_v50, %v1206_v26  ;;  %v1210_v46 = vadd.f32 %v1191_v62, %v1068_v54  ;;  %v1503_v41 = vadd.f32 %v4279_v19, %v1357_v17 }
 0x1aa   : > { %v1342_v58 = vpop.f32.mrf.mxu0  ;;  %v1361_v50 = vadd.f32 %v4259_v38, %v1213_v39 }
 0x1ab   : > { %v1207_v49 = vadd.f32 %v1178_v14, %v1065_v43  ;;  %v1500_v51 = vadd.f32 %v1469_v45, %v1354_v20  ;;  %v1358_v31 = vadd.f32 %v1339_v34, %v1210_v46  ;;  %v5561_v20 = vld [vmem:[%s6059_s4] ss:$0 sm:$0xff]  ;;  %v1359_v62 = vadd.f32 %v1342_v58, %v1211_v13 }
 0x1ac   : > { %v5566_v45 = vld [vmem:[%s6060_s5] ss:$0 sm:$0xff]  ;;  %v6078_v13 = vmov 0.0  }
 0x1ad   : > { %v1355_v7 = vadd.f32 %v1326_v56, %v1207_v49  ;;  %v1504_v61 = vadd.f32 %v1485_v24, %v1358_v31  ;;  %v5580_v31 = vld [vmem:[#allocation2 + $0x8] sm:$0x3] }
 0x1af   : > { %v1501_v25 = vadd.f32 %v1472_v35, %v1355_v7 }
 0x1ba   : > { %v4326_v42 = vpop.f32.mrf.mxu1 }
 0x1bc   : > { %v4302_v15 = vpop.f32.mrf.mxu0  ;;  %v1753_v40 = vpop.f32.mrf.mxu1 }
 0x1bd   : > { %v1641_v21 = vadd.f32 %v4302_v15, %v1502_v22 }
 0x1be   : > { %v1608_v27 = vpop.f32.mrf.mxu0  ;;  %v4327_v5 = vpop.f32.mrf.mxu1 }
 0x1bf   : > { %v1639_v18 = vadd.f32 %v1608_v27, %v1500_v51  ;;  %v1786_v8 = vadd.f32 %v4326_v42, %v1641_v21  ;;  %v6077_v42 = vld [vmem:[#allocation8_spill] sm:$0xff] }
 0x1c0   : > { %v4303_v28 = vpop.f32.mrf.mxu0  ;;  %v1756_v12 = vpop.f32.mrf.mxu1  ;;  %v1505_v1 = vadd.f32 %v6077_v42, %v1359_v62 }
 0x1c1   : > { %v1642_v47 = vadd.f32 %v4303_v28, %v1503_v41  ;;  %v1784_v53 = vadd.f32 %v1753_v40, %v1639_v18  ;;  %v6076_v28 = vld [vmem:[#allocation7_spill] sm:$0xff] }
 0x1c2   : > { %v1611_v32 = vpop.f32.mrf.mxu0  ;;  %v4330_v14 = vpop.f32.mrf.mxu1  ;;  %v1507_v43 = vadd.f32 %v6076_v28, %v1361_v50 }
 0x1c3   : > { %v1640_v56 = vadd.f32 %v1611_v32, %v1501_v25  ;;  %v1787_v35 = vadd.f32 %v4327_v5, %v1642_v47 }
 0x1c4   : > { %v4306_v55 = vpop.f32.mrf.mxu0  ;;  %v1769_v15 = vpop.f32.mrf.mxu1 }
 0x1c5   : > { %v1645_v27 = vadd.f32 %v4306_v55, %v1506_v4  ;;  %v1785_v2 = vadd.f32 %v1756_v12, %v1640_v56 }
 0x1c6   : > { %v1624_v57 = vpop.f32.mrf.mxu0 }
 0x1c7   : > { %v1643_v26 = vadd.f32 %v1624_v57, %v1504_v61  ;;  %v4331_v57 = vpop.f32.mrf.mxu1  ;;  %v1790_v9 = vadd.f32 %v4330_v14, %v1645_v27  ;;  %v5586_v14 = vrot.slane %v6078_v13, 1 }
 0x1c8   : > { %v4307_v44 = vpop.f32.mrf.mxu0 }
 0x1c9   : > { %v1646_v32 = vadd.f32 %v4307_v44, %v1507_v43  ;;  %v1788_v54 = vadd.f32 %v1769_v15, %v1643_v26  ;;  %v1772_v0 = vpop.f32.mrf.mxu1 }
 0x1ca   : > { %v1627_v52 = vpop.f32.mrf.mxu0 }
 0x1cb   : > { %v1644_v11 = vadd.f32 %v1627_v52, %v1505_v1  ;;  %v1791_v49 = vadd.f32 %v4331_v57, %v1646_v32 }
 0x1cd   : > { %v1789_v6 = vadd.f32 %v1772_v0, %v1644_v11  ;;  %v4675_v11 = vld [vmem:[%s6062_s7 + $0xf0] sm:$0xff]  }
 0x1dc   : > { %v4350_v3 = vpop.f32.mrf.mxu0 }
 0x1dd   : > { %v1929_v60 = vadd.f32 %v4350_v3, %v1786_v8 }
 0x1de   : > { %v1896_v34 = vpop.f32.mrf.mxu0 }
 0x1df   : > { %v1944_v19 = vmul.f32 %v5561_v20, %v1929_v60  ;;  %v1927_v38 = vadd.f32 %v1896_v34, %v1784_v53  ;;  %v2075_v60 = vrot.slane %v5580_v31, 1 }
 0x1e0   : > { %v4351_v40 = vpop.f32.mrf.mxu0 }
 0x1e1   : > { %v1959_v58 = vadd.f32 %v5566_v45, %v1944_v19  ;;  %v1942_v63 = vmul.f32 %v5561_v20, %v1927_v38  ;;  %v1930_v24 = vadd.f32 %v4351_v40, %v1787_v35  ;;  %v2076_v27 = vsel %vm617_vm6, %v5586_v14, %v2075_v60 }
 0x1e2   : > { %v1899_v48 = vpop.f32.mrf.mxu0 }
 0x1e3   : > { %vm1967_vm7 = vcmp.gt.f32.partialorder %v1959_v58, 0.0  ;;  %v1975_v10 = vmul.f32 0.1, %v1959_v58  ;;  %v1957_v23 = vadd.f32 %v5566_v45, %v1942_v63  ;;  %v1945_v55 = vmul.f32 %v5561_v20, %v1930_v24 }
 0x1e4   : > { %v1928_v37 = vadd.f32 %v1899_v48, %v1785_v2  ;;  %v4354_v16 = vpop.f32.mrf.mxu0 }
 0x1e5   : > { %v1983_v5 = vsel %vm1967_vm7, %v1959_v58, %v1975_v10  ;;  %vm1965_vm8 = vcmp.gt.f32.partialorder %v1957_v23, 0.0  ;;  %v1973_v17 = vmul.f32 0.1, %v1957_v23  ;;  %v1960_v22 = vadd.f32 %v5566_v45, %v1945_v55 }
 0x1e6   : > { %2012 = vst [vmem:[#allocation2 + $0x31] sm:$0xff] %v1983_v5  ;;  %v1943_v30 = vmul.f32 %v5561_v20, %v1928_v37  ;;  %v1933_v33 = vadd.f32 %v4354_v16, %v1790_v9  ;;  %v1912_v59 = vpop.f32.mrf.mxu0 }
 0x1e7   : > { %v1981_v44 = vsel %vm1965_vm8, %v1957_v23, %v1973_v17  ;;  %vm1968_vm9 = vcmp.gt.f32.partialorder %v1960_v22, 0.0  ;;  %v1976_v21 = vmul.f32 0.1, %v1960_v22  ;;  %v1931_v51 = vadd.f32 %v1912_v59, %v1788_v54  ;;  %v6079_v59 = vld [vmem:[#allocation3_spill] sm:$0xff] }
 0x1e8   : > { %2010 = vst [vmem:[#allocation2 + $0x11] sm:$0xff] %v1981_v44  ;;  %v1958_v7 = vadd.f32 %v5566_v45, %v1943_v30  ;;  %v1948_v29 = vmul.f32 %v5561_v20, %v1933_v33  ;;  %v4355_v46 = vpop.f32.mrf.mxu0  ;;  %v2353_v54 = vrot.slane %v6078_v13, 2 }
 0x1e9   : > { %v1984_v12 = vsel %vm1968_vm9, %v1960_v22, %v1976_v21  ;;  %v1946_v18 = vmul.f32 %v5561_v20, %v1931_v51  ;;  %v1934_v41 = vadd.f32 %v4355_v46, %v1791_v49  ;;  %v4676_v21 = vld [vmem:[%s6062_s7 + $0xb0] sm:$0xff]  }
 0x1ea   : > { %2013 = vst [vmem:[#allocation2 + $0x41] sm:$0xff] %v1984_v12  ;;  %vm1966_vm10 = vcmp.gt.f32.partialorder %v1958_v7, 0.0  ;;  %v1974_v39 = vmul.f32 0.1, %v1958_v7  ;;  %v1963_v52 = vadd.f32 %v5566_v45, %v1948_v29  ;;  %v1915_v47 = vpop.f32.mrf.mxu0  ;;  %v2354_v29 = vrot.slane %v5580_v31, 2 }
 0x1eb   : > { %v1961_v8 = vadd.f32 %v5566_v45, %v1946_v18  ;;  %v1949_v50 = vmul.f32 %v5561_v20, %v1934_v41  ;;  %v1932_v36 = vadd.f32 %v1915_v47, %v1789_v6  ;;  %v5667_v18 = vld [vmem:[#allocation2 + $0x98] sm:$0x3] }
 0x1ec   : > { %v1982_v25 = vsel %vm1966_vm10, %v1958_v7, %v1974_v39  ;;  %vm1971_vm11 = vcmp.gt.f32.partialorder %v1963_v52, 0.0  ;;  %v1979_v3 = vmul.f32 0.1, %v1963_v52  ;;  %v4677_v7 = vld [vmem:[%s6062_s7 + $0xe8] sm:$0xff]  }
 0x1ed   : > { %2011 = vst [vmem:[#allocation2 + $0x21] sm:$0xff] %v1982_v25  ;;  %vm1969_vm12 = vcmp.gt.f32.partialorder %v1961_v8, 0.0  ;;  %v1977_v53 = vmul.f32 0.1, %v1961_v8  ;;  %v1964_v62 = vadd.f32 %v5566_v45, %v1949_v50  ;;  %v1947_v56 = vmul.f32 %v5561_v20, %v1932_v36  ;;  %v5602_v28 = vld [vmem:[#allocation2 + $0x30] sm:$0xff] }
 0x1ee   : > { %v1987_v4 = vsel %vm1971_vm11, %v1963_v52, %v1979_v3  ;;  %v5604_v43 = vld [vmem:[#allocation2 + $0x38] sm:$0x3]  ;;  %v2083_v32 = vrot.slane %v5602_v28, 1  ;;  %v6080_v52 = vld [vmem:[#allocation4_spill] sm:$0xff] }
 0x1ef   : > { %2016 = vst [vmem:[#allocation2 + $0x71] sm:$0xff] %v1987_v4  ;;  %v1985_v61 = vsel %vm1969_vm12, %v1961_v8, %v1977_v53  ;;  %vm1972_vm13 = vcmp.gt.f32.partialorder %v1964_v62, 0.0  ;;  %v1980_v34 = vmul.f32 0.1, %v1964_v62  ;;  %v1962_v19 = vadd.f32 %v5566_v45, %v1947_v56  ;;  %v5592_v38 = vld [vmem:[#allocation2 + $0x10] sm:$0xff]  ;;  %v4679_v56 = vld [vmem:[%s6062_s7 + $0xe0] sm:$0xff]  }
 0x1f0   : > { %v5594_v35 = vld [vmem:[#allocation2 + $0x18] sm:$0x3]  ;;  %2014 = vst [vmem:[#allocation2 + $0x51] sm:$0xff] %v1985_v61  ;;  %v2038_v15 = vpack.c.bf16 %v5592_v38, %v6078_v13  ;;  %v2077_v20 = vrot.slane %v5592_v38, 1  ;;  %v2084_v42 = vrot.slane %v5604_v43, 1  ;;  %v2356_v46 = vrot.slane %v5592_v38, 2 }
 0x1f1   : > { %v2078_v26 = vrot.slane %v5594_v35, 1  ;;  %v1988_v45 = vsel %vm1972_vm13, %v1964_v62, %v1980_v34  ;;  %vm1970_vm14 = vcmp.gt.f32.partialorder %v1962_v19, 0.0  ;;  %v1978_v40 = vmul.f32 0.1, %v1962_v19  ;;  %v5612_v1 = vld [vmem:[#allocation2 + $0x40] sm:$0xff]  ;;  %v4678_v62 = vld [vmem:[%s6062_s7 + $0xa8] sm:$0xff]  }
 0x1f2   : > { %2017 = vst [vmem:[#allocation2 + $0x81] sm:$0xff] %v1988_v45  ;;  %4396 = vmatprep.mubr.bf16.mxu0 %v2038_v15  ;;  %v5614_v2 = vld [vmem:[#allocation2 + $0x48] sm:$0x3]  ;;  %v2086_v37 = vrot.slane %v5612_v1, 1  ;;  %v5639_v17 = vsel %vm617_vm6, %v2083_v32, %v2084_v42  ;;  %v2357_v12 = vrot.slane %v5594_v35, 2  ;;  %v3248_v53 = vrot.slane %v5667_v18, 2 }
 0x1f3   : > { %v5607_v58 = vsel %vm617_vm6, %v2077_v20, %v2078_v26  ;;  %v1986_v63 = vsel %vm1970_vm14, %v1962_v19, %v1978_v40  ;;  %v2087_v9 = vrot.slane %v5614_v2, 1  ;;  %v2355_v4 = vsel %vm897_vm3, %v2353_v54, %v2354_v29  ;;  %v4682_v42 = vld [vmem:[%s6062_s7 + $0x98] sm:$0xff]  }
 0x1f4   : > { %v2106_v24 = vpack.c.bf16 %v5607_v58, %v2076_v27  ;;  %2015 = vst [vmem:[#allocation2 + $0x61] sm:$0xff] %v1986_v63  ;;  %v5616_v48 = vld [vmem:[#allocation2 + $0x20] sm:$0xff]  ;;  %v5618_v10 = vld [vmem:[#allocation2 + $0x28] sm:$0x3]  ;;  %v5716_v15 = vsel %vm897_vm3, %v2356_v46, %v2357_v12  ;;  %v5729_v45 = vsel %vm897_vm3, %v2353_v54, %v3248_v53  ;;  %v4681_v63 = vld [vmem:[%s6062_s7 + $0xd8] sm:$0xff]   ;;  %v2362_v29 = vrot.slane %v5602_v28, 2 }
 0x1f5   : > { %v5622_v23 = vpack.c.bf16 %v5602_v28, %v5616_v48  ;;  %v2080_v55 = vrot.slane %v5616_v48, 1  ;;  %v2081_v57 = vrot.slane %v5618_v10, 1  ;;  %v5672_v41 = vsel %vm617_vm6, %v2086_v37, %v2087_v9  ;;  %v4686_v37 = vld [vmem:[%s6062_s7 + $0x88] sm:$0xff]   ;;  %v4687_v9 = vld [vmem:[%s6062_s7 + $0xc0] sm:$0xff]  }
 0x1f6   : > { %4372 = vmatprep.mubr.bf16.mxu1 %v2106_v24  ;;  %v5631_v16 = vld [vmem:[#allocation2 + $0x70] sm:$0xff]  ;;  %v5645_v33 = vld [vmem:[#allocation2 + $0x78] sm:$0x3]  ;;  %v2527_v34 = vpack.c.bf16 %v5616_v48, %v5592_v38  ;;  %v4680_v38 = vld [vmem:[%s6062_s7 + $0xa0] sm:$0xff]   ;;  %v2385_v40 = vpack.c.bf16 %v5716_v15, %v2355_v4  ;;  %v2363_v46 = vrot.slane %v5604_v43, 2  ;;  %v2365_v12 = vrot.slane %v5612_v1, 2 }
 0x1f7   : > { %4397 = vmatmul.mubr.bf16.vlgmr.msra.gmra.mxu0 %v5622_v23  ;;  %v5636_v5 = vsel %vm617_vm6, %v2080_v55, %v2081_v57  ;;  %v5641_v22 = vld [vmem:[#allocation2 + $0x50] sm:$0xff]  ;;  %v5643_v30 = vld [vmem:[#allocation2 + $0x58] sm:$0x3]  ;;  %v2095_v39 = vrot.slane %v5631_v16, 1  ;;  %v2096_v31 = vrot.slane %v5645_v33, 1  ;;  %v4688_v54 = vld [vmem:[%s6062_s7 + $0x80] sm:$0xff]  }
 0x1f8   : > { %4429 = vmatpush3.bf16.msra.mxu0 %v6079_v59  ;;  %v5650_v49 = vpack.c.bf16 %v5639_v17, %v5636_v5  ;;  %v5654_v44 = vpack.c.bf16 %v5641_v22, %v5612_v1  ;;  %v2089_v51 = vrot.slane %v5641_v22, 1  ;;  %v2090_v0 = vrot.slane %v5643_v30, 1  ;;  %v4683_v55 = vld [vmem:[%s6062_s7 + $0xd0] sm:$0xff]   ;;  %v4689_v59 = vld [vmem:[%s6062_s7 + $0x178] sm:$0xff]  }
 0x1f9   : > { %4430 = vmatprep.subr.bf16.mxu0 %v4675_v11  ;;  %v5694_v60 = vld [vmem:[#allocation2 + $0x80] sm:$0xff]  ;;  %v5705_v61 = vld [vmem:[#allocation2 + $0x88] sm:$0x3]  ;;  %v5713_v35 = vsel %vm617_vm6, %v2095_v39, %v2096_v31  ;;  %v4684_v57 = vld [vmem:[%s6062_s7 + $0x90] sm:$0xff]   ;;  %v2366_v39 = vrot.slane %v5614_v2, 2  ;;  %v2375_v4 = vrot.slane %v5645_v33, 2 }
 0x1fa   : > { %4373 = vmatmul.mubr.bf16.vlgmr.msra.gmra.mxu1 %v5650_v49  ;;  %4400 = vmatprep.mubr.bf16.mxu0 %v5654_v44  ;;  %v5675_v6 = vsel %vm617_vm6, %v2089_v51, %v2090_v0  ;;  %v2817_v20 = vrot.slane %v5694_v60, 2  ;;  %v2818_v26 = vrot.slane %v5705_v61, 2  ;;  %v2360_v51 = vrot.slane %v5618_v10, 2  ;;  %v4691_v43 = vld [vmem:[%s6062_s7 + $0x170] sm:$0xff]  }
 0x1fb   : > { %4405 = vmatpush3.bf16.msra.mxu1 %v6080_v52  ;;  %v5682_v47 = vpack.c.bf16 %v5675_v6, %v5672_v41  ;;  %v5684_v8 = vld [vmem:[#allocation2 + $0x60] sm:$0xff]  ;;  %v5686_v50 = vld [vmem:[#allocation2 + $0x68] sm:$0x3]  ;;  %v2368_v0 = vrot.slane %v5641_v22, 2  ;;  %v5794_v2 = vsel %vm897_vm3, %v2365_v12, %v2366_v39  ;;  %v2672_v12 = vrot.slane %v5705_v61, 1 }
 0x1fc   : > { %4431 = vmatpush3.bf16.msra.mxu0 %v4675_v11  ;;  %4406 = vmatprep.subr.bf16.mxu1 %v4676_v21  ;;  %v5690_v36 = vpack.c.bf16 %v5631_v16, %v5684_v8  ;;  %v2092_v25 = vrot.slane %v5684_v8, 1  ;;  %v2093_v3 = vrot.slane %v5686_v50, 1  ;;  %v5737_v24 = vsel %vm897_vm3, %v2817_v20, %v2818_v26  ;;  %v4685_v11 = vld [vmem:[%s6062_s7 + $0xc8] sm:$0xff]   ;;  %v4696_v26 = vld [vmem:[%s6062_s7 + $0x120] sm:$0xff]  }
 0x1fd   : > { %4376 = vmatprep.mubr.bf16.mxu1 %v5682_v47  ;;  %4432 = vmatprep.subr.bf16.mxu0 %v4677_v7  ;;  %v3251_v32 = vpack.c.bf16 %v5729_v45, %v5737_v24  ;;  %v2529_v31 = vpack.c.bf16 %v5684_v8, %v5641_v22  ;;  %v4692_v22 = vld [vmem:[%s6062_s7 + $0x130] sm:$0xff]   ;;  %v2371_v53 = vrot.slane %v5684_v8, 2  ;;  %v4694_v8 = vld [vmem:[%s6062_s7 + $0x128] sm:$0xff]   ;;  %v4712_v39 = vld [vmem:[%s6062_s7 + $0x1a0] sm:$0xff]  }
 0x1fe   : > { %v5710_v19 = vsel %vm617_vm6, %v2092_v25, %v2093_v3  ;;  %v4693_v3 = vld [vmem:[%s6062_s7 + $0x168] sm:$0xff]  }
 0x1ff   : > { %4407 = vmatpush3.bf16.msra.mxu1 %v4676_v21  ;;  %4401 = vmatmul.mubr.bf16.gmra.mxu0 %v5690_v36  ;;  %v5721_v27 = vpack.c.bf16 %v5713_v35, %v5710_v19  ;;  %v2359_v21 = vrot.slane %v5616_v48, 2  ;;  %v2528_v48 = vpack.c.bf16 %v5612_v1, %v5602_v28  ;;  %v5788_v28 = vsel %vm897_vm3, %v2362_v29, %v2363_v46  ;;  %v4709_v29 = vld [vmem:[%s6062_s7 + $0x1e8] sm:$0xff]  }
 0x200   : > { %4433 = vmatpush3.bf16.msra.mxu0 %v4677_v7  ;;  %4444 = vmatprep.mubr.bf16.mxu0 %v2527_v34  ;;  %v2369_v7 = vrot.slane %v5643_v30, 2  ;;  %v4690_v30 = vld [vmem:[%s6062_s7 + $0x138] sm:$0xff]   ;;  %v2530_v34 = vpack.c.bf16 %v5694_v60, %v5631_v16  ;;  %v2671_v46 = vrot.slane %v5694_v60, 1 }
 0x201   : > { %4408 = vmatprep.subr.bf16.mxu1 %v4678_v62  ;;  %4434 = vmatprep.subr.bf16.mxu0 %v4679_v56  ;;  %v2361_v10 = vsel %vm897_vm3, %v2359_v21, %v2360_v51  ;;  %v2676_v51 = vpack.c.bf16 %v5672_v41, %v5639_v17 }
 0x202   : > { %4377 = vmatmul.mubr.bf16.gmra.mxu1 %v5721_v27  ;;  %v5785_v52 = vsel %vm897_vm3, %v2368_v0, %v2369_v7  ;;  %v5791_v1 = vpack.c.bf16 %v5788_v28, %v2361_v10  ;;  %v4708_v0 = vld [vmem:[%s6062_s7 + $0x1b0] sm:$0xff]   ;;  %v2677_v7 = vpack.c.bf16 %v5710_v19, %v5675_v6  ;;  %v2673_v41 = vsel %vm617_vm6, %v2671_v46, %v2672_v12  ;;  %v4710_v6 = vld [vmem:[%s6062_s7 + $0x1a8] sm:$0xff]   ;;  %v4711_v19 = vld [vmem:[%s6062_s7 + $0x1e0] sm:$0xff]  }
 0x203   : > { %4409 = vmatpush3.bf16.msra.mxu1 %v4678_v62  ;;  %4420 = vmatprep.mubr.bf16.mxu1 %v2385_v40  ;;  %v5801_v25 = vpack.c.bf16 %v5785_v52, %v5794_v2  ;;  %v2372_v62 = vrot.slane %v5686_v50, 2  ;;  %v4695_v50 = vld [vmem:[%s6062_s7 + $0x160] sm:$0xff]   ;;  %v2675_v40 = vpack.c.bf16 %v5636_v5, %v5607_v58  ;;  %v4699_v58 = vld [vmem:[%s6062_s7 + $0x150] sm:$0xff]   ;;  %v2678_v61 = vpack.c.bf16 %v2673_v41, %v5713_v35 }
 0x204   : > { %4435 = vmatpush3.bf16.msra.mxu0 %v4679_v56  ;;  %4410 = vmatprep.subr.bf16.mxu1 %v4680_v38  ;;  %v2374_v56 = vrot.slane %v5631_v16, 2  ;;  %v4700_v5 = vld [vmem:[%s6062_s7 + $0x110] sm:$0xff]  }
 0x205   : > { %4436 = vmatprep.subr.bf16.mxu0 %v4681_v63  ;;  %v2373_v20 = vsel %vm897_vm3, %v2371_v53, %v2372_v62  ;;  %v4715_v35 = vld [vmem:[%s6062_s7 + $0x1d0] sm:$0xff]  }
 0x206   : > { %v5823_v33 = vsel %vm897_vm3, %v2374_v56, %v2375_v4  ;;  %v2823_v21 = vpack.c.bf16 %v2373_v20, %v5785_v52  ;;  %v4721_v52 = vld [vmem:[%s6062_s7 + $0x238] sm:$0xff]  }
 0x207   : > { %4411 = vmatpush3.bf16.msra.mxu1 %v4680_v38  ;;  %v2821_v38 = vpack.c.bf16 %v2361_v10, %v5716_v15  ;;  %v5826_v16 = vpack.c.bf16 %v5823_v33, %v2373_v20  ;;  %v4697_v15 = vld [vmem:[%s6062_s7 + $0x158] sm:$0xff]   ;;  %v2824_v17 = vpack.c.bf16 %v5737_v24, %v5823_v33  ;;  %v4716_v10 = vld [vmem:[%s6062_s7 + $0x190] sm:$0xff]  }
 0x208   : > { %4437 = vmatpush3.bf16.msra.mxu0 %v4681_v63  ;;  %4412 = vmatprep.subr.bf16.mxu1 %v4682_v42  ;;  %v4698_v63 = vld [vmem:[%s6062_s7 + $0x118] sm:$0xff]  }
 0x209   : > { %4438 = vmatprep.subr.bf16.mxu0 %v4683_v55 }
 0x20b   : > { %4413 = vmatpush3.bf16.msra.mxu1 %v4682_v42  ;;  %v4701_v42 = vld [vmem:[%s6062_s7 + $0x148] sm:$0xff]  }
 0x20c   : > { %4439 = vmatpush3.bf16.msra.mxu0 %v4683_v55  ;;  %4414 = vmatprep.subr.bf16.mxu1 %v4684_v57  ;;  %v4702_v55 = vld [vmem:[%s6062_s7 + $0x108] sm:$0xff]  }
 0x20d   : > { %4440 = vmatprep.subr.bf16.mxu0 %v4685_v11 }
 0x20f   : > { %4415 = vmatpush3.bf16.msra.mxu1 %v4684_v57  ;;  %v4703_v57 = vld [vmem:[%s6062_s7 + $0x140] sm:$0xff]  }
 0x210   : > { %4441 = vmatpush3.bf16.msra.mxu0 %v4685_v11  ;;  %4416 = vmatprep.subr.bf16.mxu1 %v4686_v37  ;;  %v4704_v11 = vld [vmem:[%s6062_s7 + $0x100] sm:$0xff]  }
 0x211   : > { %4442 = vmatprep.subr.bf16.mxu0 %v4687_v9 }
 0x213   : > { %4417 = vmatpush3.bf16.msra.mxu1 %v4686_v37  ;;  %v4705_v37 = vld [vmem:[%s6062_s7 + $0x1f8] sm:$0xff]  }
 0x214   : > { %4443 = vmatpush3.bf16.msra.mxu0 %v4687_v9  ;;  %4418 = vmatprep.subr.bf16.mxu1 %v4688_v54  ;;  %v2822_v9 = vpack.c.bf16 %v5794_v2, %v5788_v28  ;;  %v3105_v28 = vrot.slane %v5667_v18, 1  ;;  %v4722_v2 = vld [vmem:[%s6062_s7 + $0x230] sm:$0xff]   ;;  %v4723_v18 = vld [vmem:[%s6062_s7 + $0x228] sm:$0xff]  }
 0x215   : > { %4476 = vmatprep.subr.bf16.mxu0 %v4689_v59 }
 0x217   : > { %4419 = vmatpush3.bf16.msra.mxu1 %v4688_v54  ;;  %4445 = vmatmul.mubr.bf16.vlgmr.msra.gmra.mxu0 %v2528_v48  ;;  %v4706_v54 = vld [vmem:[%s6062_s7 + $0x1b8] sm:$0xff]  }
 0x218   : > { %4448 = vmatprep.mubr.bf16.mxu0 %v2529_v31  ;;  %4477 = vmatpush3.bf16.msra.mxu0 %v4689_v59  ;;  %v4707_v59 = vld [vmem:[%s6062_s7 + $0x1f0] sm:$0xff]   ;;  %v4713_v48 = vld [vmem:[%s6062_s7 + $0x1d8] sm:$0xff]   ;;  %v4720_v31 = vld [vmem:[%s6062_s7 + $0x180] sm:$0xff]  }
 0x219   : > { %4452 = vmatprep.subr.bf16.mxu1 %v4690_v30  ;;  %4478 = vmatprep.subr.bf16.mxu0 %v4691_v43 }
 0x21a   : > { %4421 = vmatmul.mubr.bf16.vlgmr.msra.gmra.mxu1 %v5791_v1 }
 0x21b   : > { %4424 = vmatprep.mubr.bf16.mxu1 %v5801_v25  ;;  %4453 = vmatpush3.bf16.msra.mxu1 %v4690_v30  ;;  %v4718_v30 = vld [vmem:[%s6062_s7 + $0x188] sm:$0xff]  }
 0x21c   : > { %4479 = vmatpush3.bf16.msra.mxu0 %v4691_v43  ;;  %4454 = vmatprep.subr.bf16.mxu1 %v4692_v22  ;;  %v4719_v43 = vld [vmem:[%s6062_s7 + $0x1c0] sm:$0xff]  }
 0x21d   : > { %4480 = vmatprep.subr.bf16.mxu0 %v4693_v3 }
 0x21f   : > { %4449 = vmatmul.mubr.bf16.gmra.mxu0 %v2530_v34  ;;  %4455 = vmatpush3.bf16.msra.mxu1 %v4692_v22  ;;  %v3106_v22 = vsel %vm617_vm6, %v5586_v14, %v3105_v28  ;;  %v4725_v14 = vld [vmem:[%s6062_s7 + $0x218] sm:$0xff]  }
 0x220   : > { %4481 = vmatpush3.bf16.msra.mxu0 %v4693_v3  ;;  %4492 = vmatprep.mubr.bf16.mxu0 %v2821_v38 }
 0x221   : > { %4456 = vmatprep.subr.bf16.mxu1 %v4694_v8  ;;  %4482 = vmatprep.subr.bf16.mxu0 %v4695_v50 }
 0x222   : > { %4425 = vmatmul.mubr.bf16.gmra.mxu1 %v5826_v16 }
 0x223   : > { %4457 = vmatpush3.bf16.msra.mxu1 %v4694_v8  ;;  %4468 = vmatprep.mubr.bf16.mxu1 %v2675_v40 }
 0x224   : > { %4483 = vmatpush3.bf16.msra.mxu0 %v4695_v50  ;;  %4458 = vmatprep.subr.bf16.mxu1 %v4696_v26 }
 0x225   : > { %4484 = vmatprep.subr.bf16.mxu0 %v4697_v15 }
 0x227   : > { %4459 = vmatpush3.bf16.msra.mxu1 %v4696_v26 }
 0x228   : > { %4485 = vmatpush3.bf16.msra.mxu0 %v4697_v15  ;;  %4460 = vmatprep.subr.bf16.mxu1 %v4698_v63 }
 0x229   : > { %4486 = vmatprep.subr.bf16.mxu0 %v4699_v58 }
 0x22b   : > { %4461 = vmatpush3.bf16.msra.mxu1 %v4698_v63 }
 0x22c   : > { %4487 = vmatpush3.bf16.msra.mxu0 %v4699_v58  ;;  %4462 = vmatprep.subr.bf16.mxu1 %v4700_v5 }
 0x22d   : > { %4488 = vmatprep.subr.bf16.mxu0 %v4701_v42 }
 0x22f   : > { %4463 = vmatpush3.bf16.msra.mxu1 %v4700_v5 }
 0x230   : > { %4489 = vmatpush3.bf16.msra.mxu0 %v4701_v42  ;;  %4464 = vmatprep.subr.bf16.mxu1 %v4702_v55 }
 0x231   : > { %4490 = vmatprep.subr.bf16.mxu0 %v4703_v57 }
 0x233   : > { %4465 = vmatpush3.bf16.msra.mxu1 %v4702_v55 }
 0x234   : > { %4491 = vmatpush3.bf16.msra.mxu0 %v4703_v57  ;;  %4466 = vmatprep.subr.bf16.mxu1 %v4704_v11 }
 0x235   : > { %4524 = vmatprep.subr.bf16.mxu0 %v4705_v37 }
 0x237   : > { %4467 = vmatpush3.bf16.msra.mxu1 %v4704_v11  ;;  %4493 = vmatmul.mubr.bf16.vlgmr.msra.gmra.mxu0 %v2822_v9 }
 0x238   : > { %4496 = vmatprep.mubr.bf16.mxu0 %v2823_v21  ;;  %4525 = vmatpush3.bf16.msra.mxu0 %v4705_v37 }
 0x239   : > { %4500 = vmatprep.subr.bf16.mxu1 %v4706_v54  ;;  %4526 = vmatprep.subr.bf16.mxu0 %v4707_v59 }
 0x23a   : > { %4469 = vmatmul.mubr.bf16.vlgmr.msra.gmra.mxu1 %v2676_v51 }
 0x23b   : > { %4472 = vmatprep.mubr.bf16.mxu1 %v2677_v7  ;;  %4501 = vmatpush3.bf16.msra.mxu1 %v4706_v54 }
 0x23c   : > { %4527 = vmatpush3.bf16.msra.mxu0 %v4707_v59  ;;  %4502 = vmatprep.subr.bf16.mxu1 %v4708_v0 }
 0x23d   : > { %4528 = vmatprep.subr.bf16.mxu0 %v4709_v29 }
 0x23f   : > { %4497 = vmatmul.mubr.bf16.gmra.mxu0 %v2824_v17  ;;  %4503 = vmatpush3.bf16.msra.mxu1 %v4708_v0 }
 0x240   : > { %4529 = vmatpush3.bf16.msra.mxu0 %v4709_v29  ;;  %4540 = vmatprep.mubr.bf16.mxu0 %v5650_v49  ;;  %v4714_v49 = vld [vmem:[%s6062_s7 + $0x198] sm:$0xff]  }
 0x241   : > { %4504 = vmatprep.subr.bf16.mxu1 %v4710_v6  ;;  %4530 = vmatprep.subr.bf16.mxu0 %v4711_v19 }
 0x242   : > { %4473 = vmatmul.mubr.bf16.gmra.mxu1 %v2678_v61 }
 0x243   : > { %4505 = vmatpush3.bf16.msra.mxu1 %v4710_v6  ;;  %4516 = vmatprep.mubr.bf16.mxu1 %v5622_v23  ;;  %v4717_v23 = vld [vmem:[%s6062_s7 + $0x1c8] sm:$0xff]  }
 0x244   : > { %4531 = vmatpush3.bf16.msra.mxu0 %v4711_v19  ;;  %4506 = vmatprep.subr.bf16.mxu1 %v4712_v39 }
 0x245   : > { %4532 = vmatprep.subr.bf16.mxu0 %v4713_v48 }
 0x247   : > { %4507 = vmatpush3.bf16.msra.mxu1 %v4712_v39 }
 0x248   : > { %4533 = vmatpush3.bf16.msra.mxu0 %v4713_v48  ;;  %4508 = vmatprep.subr.bf16.mxu1 %v4714_v49 }
 0x249   : > { %4534 = vmatprep.subr.bf16.mxu0 %v4715_v35 }
 0x24b   : > { %4509 = vmatpush3.bf16.msra.mxu1 %v4714_v49 }
 0x24c   : > { %4535 = vmatpush3.bf16.msra.mxu0 %v4715_v35  ;;  %4510 = vmatprep.subr.bf16.mxu1 %v4716_v10 }
 0x24d   : > { %4536 = vmatprep.subr.bf16.mxu0 %v4717_v23 }
 0x24f   : > { %4511 = vmatpush3.bf16.msra.mxu1 %v4716_v10 }
 0x250   : > { %4537 = vmatpush3.bf16.msra.mxu0 %v4717_v23  ;;  %4512 = vmatprep.subr.bf16.mxu1 %v4718_v30 }
 0x251   : > { %4538 = vmatprep.subr.bf16.mxu0 %v4719_v43 }
 0x253   : > { %4513 = vmatpush3.bf16.msra.mxu1 %v4718_v30 }
 0x254   : > { %4539 = vmatpush3.bf16.msra.mxu0 %v4719_v43  ;;  %4514 = vmatprep.subr.bf16.mxu1 %v4720_v31 }
 0x257   : > { %4515 = vmatpush3.bf16.msra.mxu1 %v4720_v31  ;;  %4541 = vmatmul.mubr.bf16.vlgmr.msra.gmra.mxu0 %v5682_v47  ;;  %v3108_v47 = vpack.c.bf16 %v3106_v22, %v2673_v41 }
 0x258   : > { %4544 = vmatprep.mubr.bf16.mxu0 %v5721_v27  ;;  %4548 = vmatprep.subr.bf16.mxu1 %v4721_v52  ;;  %v2963_v27 = vpack.c.bf16 %v6078_v13, %v5694_v60  ;;  %v4726_v13 = vld [vmem:[%s6062_s7 + $0x210] sm:$0xff]   ;;  %v4728_v60 = vld [vmem:[%s6062_s7 + $0x200] sm:$0xff]  }
 0x25a   : > { %4517 = vmatmul.mubr.bf16.vlgmr.msra.gmra.mxu1 %v5654_v44  ;;  %v4724_v44 = vld [vmem:[%s6062_s7 + $0x220] sm:$0xff]  }
 0x25b   : > { %4520 = vmatprep.mubr.bf16.mxu1 %v5690_v36  ;;  %4549 = vmatpush3.bf16.msra.mxu1 %v4721_v52  ;;  %v4727_v36 = vld [vmem:[%s6062_s7 + $0x208] sm:$0xff]  }
 0x25c   : > { %4550 = vmatprep.subr.bf16.mxu1 %v4722_v2 }
 0x25f   : > { %4545 = vmatmul.mubr.bf16.gmra.mxu0 %v3108_v47  ;;  %4551 = vmatpush3.bf16.msra.mxu1 %v4722_v2 }
 0x260   : > { %4552 = vmatprep.subr.bf16.mxu1 %v4723_v18 }
 0x262   : > { %4521 = vmatmul.mubr.bf16.gmra.mxu1 %v2963_v27 }
 0x263   : > { %4553 = vmatpush3.bf16.msra.mxu1 %v4723_v18  ;;  %4564 = vmatprep.mubr.bf16.mxu1 %v5791_v1 }
 0x264   : > { %4554 = vmatprep.subr.bf16.mxu1 %v4724_v44 }
 0x267   : > { %4555 = vmatpush3.bf16.msra.mxu1 %v4724_v44 }
 0x268   : > { %4556 = vmatprep.subr.bf16.mxu1 %v4725_v14 }
 0x26b   : > { %4557 = vmatpush3.bf16.msra.mxu1 %v4725_v14 }
 0x26c   : > { %4558 = vmatprep.subr.bf16.mxu1 %v4726_v13 }
 0x26f   : > { %4559 = vmatpush3.bf16.msra.mxu1 %v4726_v13 }
 0x270   : > { %4560 = vmatprep.subr.bf16.mxu1 %v4727_v36 }
 0x273   : > { %4561 = vmatpush3.bf16.msra.mxu1 %v4727_v36 }
 0x274   : > { %4562 = vmatprep.subr.bf16.mxu1 %v4728_v60 }
 0x277   : > { %4563 = vmatpush3.bf16.msra.mxu1 %v4728_v60 }
 0x27a   : > { %4565 = vmatmul.mubr.bf16.vlgmr.msra.gmra.mxu1 %v5801_v25 }
 0x27b   : > { %4568 = vmatprep.mubr.bf16.mxu1 %v5826_v16 }
 0x282   : > { %4569 = vmatmul.mubr.bf16.gmra.mxu1 %v3251_v32 }
 0x2b7   : > { %v4398_v56 = vpop.f32.mrf.mxu0 }
 0x2b9   : > { %v2322_v34 = vpop.f32.mrf.mxu0 }
 0x2ba   : > { %v4374_v1 = vpop.f32.mrf.mxu1 }
 0x2bb   : > { %v4399_v8 = vpop.f32.mrf.mxu0  ;;  %v2331_v43 = vadd.f32 %v4398_v56, %v4374_v1 }
 0x2bc   : > { %v2209_v3 = vpop.f32.mrf.mxu1 }
 0x2bd   : > { %v2325_v38 = vpop.f32.mrf.mxu0  ;;  %v2323_v28 = vadd.f32 %v2322_v34, %v2209_v3 }
 0x2be   : > { %v4375_v53 = vpop.f32.mrf.mxu1 }
 0x2bf   : > { %v4402_v25 = vpop.f32.mrf.mxu0  ;;  %v2334_v18 = vadd.f32 %v4399_v8, %v4375_v53 }
 0x2c0   : > { %v2212_v62 = vpop.f32.mrf.mxu1 }
 0x2c1   : > { %v2338_v26 = vpop.f32.mrf.mxu0  ;;  %v2326_v44 = vadd.f32 %v2325_v38, %v2212_v62 }
 0x2c2   : > { %v4378_v4 = vpop.f32.mrf.mxu1 }
 0x2c3   : > { %v4403_v45 = vpop.f32.mrf.mxu0  ;;  %v2347_v60 = vadd.f32 %v4402_v25, %v4378_v4 }
 0x2c4   : > { %v2225_v20 = vpop.f32.mrf.mxu1 }
 0x2c5   : > { %v5964_v32 = vpop.f32.mrf.mxu0 }
 0x2c6   : > { %v5960_v50 = vpop.f32.mrf.mxu1 }
 0x2c7   : > { %v2350_v8 = vadd.f32 %v4403_v45, %v5960_v50 }
 0x2c8   : > { %v5962_v33 = vpop.f32.mrf.mxu1 }
 0x2d7   : > { %v4446_v63 = vpop.f32.mrf.mxu0 }
 0x2d9   : > { %v2630_v5 = vpop.f32.mrf.mxu0 }
 0x2da   : > { %v4422_v16 = vpop.f32.mrf.mxu1 }
 0x2db   : > { %v4447_v55 = vpop.f32.mrf.mxu0  ;;  %v2521_v2 = vadd.f32 %v4422_v16, %v2331_v43  ;;  %v4729_v16 = vld [vmem:[%s4937_s26 + $0x30] sm:$0xff] }
 0x2dc   : > { %v2488_v40 = vpop.f32.mrf.mxu1 }
 0x2dd   : > { %v2633_v11 = vpop.f32.mrf.mxu0  ;;  %v2519_v47 = vadd.f32 %v2488_v40, %v2323_v28  ;;  %v2663_v13 = vadd.f32 %v4446_v63, %v2521_v2  ;;  %v3412_v40 = vrot.slane %v4729_v16, 1  ;;  %v4734_v2 = vld [vmem:[%s4937_s26 + $0x48] sm:$0x3]  ;;  %v4737_v16 = vld [vmem:[%s4937_s26 + $0x70] sm:$0xff] }
 0x2de   : > { %v4423_v24 = vpop.f32.mrf.mxu1 }
 0x2df   : > { %v4450_v9 = vpop.f32.mrf.mxu0  ;;  %v2522_v14 = vadd.f32 %v4423_v24, %v2334_v18  ;;  %v2661_v56 = vadd.f32 %v2630_v5, %v2519_v47  ;;  %v4731_v5 = vld [vmem:[%s4937_s26 + $0x10] sm:$0xff]  ;;  %v3416_v18 = vrot.slane %v4734_v2, 1 }
 0x2e0   : > { %v2491_v15 = vpop.f32.mrf.mxu1 }
 0x2e1   : > { %v5968_v59 = vpop.f32.mrf.mxu0  ;;  %v2664_v53 = vadd.f32 %v4447_v55, %v2522_v14  ;;  %v3406_v55 = vrot.slane %v4731_v5, 1 }
 0x2e2   : > { %v4426_v58 = vpop.f32.mrf.mxu1 }
 0x2e3   : > { %v5970_v51 = vpop.f32.mrf.mxu0  ;;  %v2525_v3 = vadd.f32 %v4426_v58, %v2347_v60 }
 0x2e4   : > { %v2504_v42 = vpop.f32.mrf.mxu1 }
 0x2e5   : > { %v5972_v7 = vpop.f32.mrf.mxu0  ;;  %v2667_v45 = vadd.f32 %v4450_v9, %v2525_v3 }
 0x2e6   : > { %v4427_v57 = vpop.f32.mrf.mxu1 }
 0x2e8   : > { %v5966_v37 = vpop.f32.mrf.mxu1 }
 0x2f7   : > { %v4494_v46 = vpop.f32.mrf.mxu0 }
 0x2f9   : > { %v2924_v17 = vpop.f32.mrf.mxu0 }
 0x2fa   : > { %v4470_v54 = vpop.f32.mrf.mxu1 }
 0x2fb   : > { %v4495_v6 = vpop.f32.mrf.mxu0  ;;  %v2811_v1 = vadd.f32 %v4470_v54, %v2663_v13  ;;  %v4732_v54 = vld [vmem:[%s4937_s26 + $0x18] sm:$0x3]  ;;  %v4735_v13 = vld [vmem:[%s4937_s26 + $0x20] sm:$0xff] }
 0x2fc   : > { %v2778_v21 = vpop.f32.mrf.mxu1  ;;  %v3409_v60 = vrot.slane %v4735_v13, 1 }
 0x2fd   : > { %v2927_v61 = vpop.f32.mrf.mxu0  ;;  %v2809_v34 = vadd.f32 %v2778_v21, %v2661_v56  ;;  %v2957_v25 = vadd.f32 %v4494_v46, %v2811_v1  ;;  %v3407_v21 = vrot.slane %v4732_v54, 1 }
 0x2fe   : > { %v4471_v0 = vpop.f32.mrf.mxu1 }
 0x2ff   : > { %v5978_v48 = vpop.f32.mrf.mxu0  ;;  %v2812_v24 = vadd.f32 %v4471_v0, %v2664_v53  ;;  %v2955_v43 = vadd.f32 %v2924_v17, %v2809_v34 }
 0x300   : > { %v2781_v29 = vpop.f32.mrf.mxu1 }
 0x301   : > { %v5980_v35 = vpop.f32.mrf.mxu0 }
 0x302   : > { %v4474_v12 = vpop.f32.mrf.mxu1  ;;  %6081 = vst [vmem:[#allocation5_spill] sm:$0xff] %v5980_v35 }
 0x303   : > { %v5982_v23 = vpop.f32.mrf.mxu0 }
 0x304   : > { %v2794_v41 = vpop.f32.mrf.mxu1  ;;  %6082 = vst [vmem:[#allocation6_spill] sm:$0xff] %v5982_v23  ;;  %v2520_v23 = vadd.f32 %v2491_v15, %v2326_v44  ;;  %v4730_v15 = vld [vmem:[%s4937_s26 + $0x38] sm:$0x3] }
 0x305   : > { %v5984_v31 = vpop.f32.mrf.mxu0  ;;  %v3413_v63 = vrot.slane %v4730_v15, 1 }
 0x306   : > { %v5974_v19 = vpop.f32.mrf.mxu1  ;;  %6083 = vst [vmem:[#allocation7_spill] sm:$0xff] %v5984_v31  ;;  %v2339_v31 = vadd.f32 %v2338_v26, %v2225_v20  ;;  %v2662_v4 = vadd.f32 %v2633_v11, %v2520_v23  ;;  %v2342_v20 = vadd.f32 %v5964_v32, %v5962_v33  ;;  %v2526_v26 = vadd.f32 %v4427_v57, %v2350_v8 }
 0x307   : > { %v2815_v23 = vadd.f32 %v4474_v12, %v2667_v45  ;;  %v2958_v32 = vadd.f32 %v4495_v6, %v2812_v24  ;;  %v4738_v24 = vld [vmem:[%s4937_s26 + $0x78] sm:$0x3] }
 0x308   : > { %v5976_v39 = vpop.f32.mrf.mxu1  ;;  %v2523_v62 = vadd.f32 %v2504_v42, %v2339_v31  ;;  %v2810_v50 = vadd.f32 %v2781_v29, %v2662_v4  ;;  %v2524_v11 = vadd.f32 %v5966_v37, %v2342_v20  ;;  %v2668_v31 = vadd.f32 %v5970_v51, %v2526_v26 }
 0x309   : > { %v3414_v29 = vsel %vm617_vm6, %v3412_v40, %v3413_v63  ;;  %v3408_v37 = vsel %vm617_vm6, %v3406_v55, %v3407_v21  ;;  %v6084_v14 = vld [vmem:[#allocation5_spill] sm:$0xff]  ;;  %v3424_v40 = vrot.slane %v4737_v16, 1  ;;  %v3425_v4 = vrot.slane %v4738_v24, 1  ;;  %v4740_v21 = vld [vmem:[%s4937_s26 + $0x58] sm:$0x3] }
 0x30a   : > { %v2665_v0 = vadd.f32 %v5968_v59, %v2523_v62  ;;  %v2816_v59 = vadd.f32 %v5974_v19, %v2668_v31  ;;  %v2666_v12 = vadd.f32 %v5972_v7, %v2524_v11  ;;  %v4739_v55 = vld [vmem:[%s4937_s26 + $0x50] sm:$0xff] }
 0x30b   : > { %v6085_v34 = vld [vmem:[#allocation6_spill] sm:$0xff]  ;;  %v3418_v54 = vrot.slane %v4739_v55, 1 }
 0x30c   : > { %v2813_v57 = vadd.f32 %v2794_v41, %v2665_v0  ;;  %v2814_v44 = vadd.f32 %v5976_v39, %v2666_v12  ;;  %v2962_v53 = vadd.f32 %v6085_v34, %v2816_v59  ;;  %v4744_v12 = vld [vmem:[%s4937_s26 + $0x68] sm:$0x3] }
 0x30e   : > { %v2959_v19 = vadd.f32 %v6084_v14, %v2813_v57 }
 0x317   : > { %v4542_v22 = vpop.f32.mrf.mxu0 }
 0x319   : > { %v3208_v36 = vpop.f32.mrf.mxu0 }
 0x31a   : > { %v4518_v49 = vpop.f32.mrf.mxu1 }
 0x31b   : > { %v4543_v38 = vpop.f32.mrf.mxu0  ;;  %v3096_v42 = vadd.f32 %v4518_v49, %v2957_v25  ;;  %v2956_v49 = vadd.f32 %v2927_v61, %v2810_v50  ;;  %v2961_v61 = vadd.f32 %v5978_v48, %v2815_v23  ;;  %v3419_v50 = vrot.slane %v4740_v21, 1  ;;  %v4741_v23 = vld [vmem:[%s4937_s26 + $0x80] sm:$0xff] }
 0x31c   : > { %v3063_v10 = vpop.f32.mrf.mxu1 }
 0x31d   : > { %v3211_v46 = vpop.f32.mrf.mxu0  ;;  %v3094_v33 = vadd.f32 %v3063_v10, %v2955_v43  ;;  %v3241_v17 = vadd.f32 %v4542_v22, %v3096_v42  ;;  %v4733_v10 = vld [vmem:[%s4937_s26 + $0x40] sm:$0xff] }
 0x31e   : > { %v4519_v30 = vpop.f32.mrf.mxu1  ;;  %v3415_v51 = vrot.slane %v4733_v10, 1 }
 0x31f   : > { %v3097_v9 = vadd.f32 %v4519_v30, %v2958_v32  ;;  %v4546_v6 = vpop.f32.mrf.mxu0  ;;  %v3239_v22 = vadd.f32 %v3208_v36, %v3094_v33  ;;  %v3427_v33 = vrot.slane %v4741_v23, 1  ;;  %v4742_v32 = vld [vmem:[%s4937_s26 + $0x88] sm:$0x3] }
 0x320   : > { %v5986_v52 = vpop.f32.mrf.mxu1  ;;  %v3417_v62 = vsel %vm617_vm6, %v3415_v51, %v3416_v18  ;;  %v3428_v57 = vrot.slane %v4742_v32, 1 }
 0x321   : > { %v3095_v47 = vadd.f32 %v5986_v52, %v2956_v49  ;;  %v4736_v52 = vld [vmem:[%s4937_s26 + $0x28] sm:$0x3]  ;;  %v3242_v39 = vadd.f32 %v4543_v38, %v3097_v9  ;;  %v3224_v3 = vpop.f32.mrf.mxu0  ;;  %v6086_v38 = vld [vmem:[#allocation7_spill] sm:$0xff] }
 0x322   : > { %v5988_v27 = vpop.f32.mrf.mxu1  ;;  %v3410_v1 = vrot.slane %v4736_v52, 1  ;;  %v2960_v20 = vadd.f32 %v6086_v38, %v2814_v44  ;;  %v3429_v18 = vsel %vm617_vm6, %v3427_v33, %v3428_v57 }
 0x323   : > { %v3100_v48 = vadd.f32 %v5988_v27, %v2961_v61  ;;  %v3240_v63 = vadd.f32 %v3211_v46, %v3095_v47  ;;  %v4547_v11 = vpop.f32.mrf.mxu0  ;;  %v3426_v46 = vsel %vm617_vm6, %v3424_v40, %v3425_v4 }
 0x324   : > { %v5990_v35 = vpop.f32.mrf.mxu1  ;;  %v3411_v5 = vsel %vm617_vm6, %v3409_v60, %v3410_v1 }
 0x325   : > { %v3098_v25 = vadd.f32 %v5990_v35, %v2959_v19  ;;  %v3245_v43 = vadd.f32 %v4546_v6, %v3100_v48  ;;  %v3422_v6 = vrot.slane %v4744_v12, 1 }
 0x326   : > { %v5997_v58 = vpop.f32.mrf.mxu1 }
 0x327   : > { %v3101_v45 = vadd.f32 %v5997_v58, %v2962_v53  ;;  %v3243_v9 = vadd.f32 %v3224_v3, %v3098_v25 }
 0x328   : > { %v6004_v28 = vpop.f32.mrf.mxu1 }
 0x329   : > { %v3099_v31 = vadd.f32 %v6004_v28, %v2960_v20  ;;  %v3246_v51 = vadd.f32 %v4547_v11, %v3101_v45  ;;  %v3227_v28 = vpop.f32.mrf.mxu0 }
 0x33a   : > { %v4566_v41 = vpop.f32.mrf.mxu1 }
 0x33b   : > { %v3384_v30 = vadd.f32 %v4566_v41, %v3241_v17  ;;  %v3420_v17 = vsel %vm617_vm6, %v3418_v54, %v3419_v50 }
 0x33c   : > { %v3351_v7 = vpop.f32.mrf.mxu1 }
 0x33d   : > { %v3440_v36 = vadd.f32 %v3414_v29, %v3384_v30  ;;  %v3382_v56 = vadd.f32 %v3351_v7, %v3239_v22  ;;  %v3244_v30 = vadd.f32 %v3227_v28, %v3099_v31 }
 0x33e   : > { %v4567_v8 = vpop.f32.mrf.mxu1 }
 0x33f   : > { %3448 = vst [vmem:[%s6020_s22 + $0x10] sm:$0xff] %v3440_v36  ;;  %v3438_v27 = vadd.f32 %v3408_v37, %v3382_v56  ;;  %v3385_v15 = vadd.f32 %v4567_v8, %v3242_v39  ;;  %v4743_v37 = vld [vmem:[%s4937_s26 + $0x60] sm:$0xff] }
 0x340   : > { %v3354_v26 = vpop.f32.mrf.mxu1  ;;  %v3421_v59 = vrot.slane %v4743_v37, 1 }
 0x341   : > { %3446 = vst [vmem:[%s6020_s22] sm:$0xff] %v3438_v27  ;;  %v3441_v35 = vadd.f32 %v3417_v62, %v3385_v15  ;;  %v3383_v42 = vadd.f32 %v3354_v26, %v3240_v63 }
 0x342   : > { %v4570_v0 = vpop.f32.mrf.mxu1  ;;  %v3423_v44 = vsel %vm617_vm6, %v3421_v59, %v3422_v6 }
 0x343   : > { %3449 = vst [vmem:[%s6020_s22 + $0x18] sm:$0xff] %v3441_v35  ;;  %v3439_v29 = vadd.f32 %v3411_v5, %v3383_v42  ;;  %v3388_v58 = vadd.f32 %v4570_v0, %v3245_v43 }
 0x344   : > { %v3367_v49 = vpop.f32.mrf.mxu1 }
 0x345   : > { %3447 = vst [vmem:[%s6020_s22 + $0x8] sm:$0xff] %v3439_v29  ;;  %v3444_v41 = vadd.f32 %v3426_v46, %v3388_v58  ;;  %v3386_v10 = vadd.f32 %v3367_v49, %v3243_v9 }
 0x346   : > { %v4571_v2 = vpop.f32.mrf.mxu1 }
 0x347   : > { %3452 = vst [vmem:[%s6020_s22 + $0x30] sm:$0xff] %v3444_v41  ;;  %v3442_v47 = vadd.f32 %v3420_v17, %v3386_v10  ;;  %v3389_v61 = vadd.f32 %v4571_v2, %v3246_v51 }
 0x348   : > { %v3370_v22 = vpop.f32.mrf.mxu1 }
 0x349   : > { %3450 = vst [vmem:[%s6020_s22 + $0x20] sm:$0xff] %v3442_v47  ;;  %v3445_v14 = vadd.f32 %v3429_v18, %v3389_v61  ;;  %v3387_v19 = vadd.f32 %v3370_v22, %v3244_v30 }
 0x34b   : > { %3453 = vst [vmem:[%s6020_s22 + $0x38] sm:$0xff] %v3445_v14  ;;  %v3443_v7 = vadd.f32 %v3423_v44, %v3387_v19 }
 0x34d   : > { %3451 = vst [vmem:[%s6020_s22 + $0x28] sm:$0xff] %v3443_v7 }
 0x34e PF: > { %s18_s27 = sadd.s32 1, %s4751_s27  }
 0x34f   : > { %p15_p4 = scmp.ge.s32.totalorder %s18_s27, 4  }
 0x351   :  { %17 = sbr.rel (!%p15_p4) target bundleno = 1 (0x1), region = 99 }

// kernel: network_block_fwd.2
= control target key start
LH: loop header
LB: loop body
LE: loop exit
PB: predicated region body
PF: predicated region fallthrough
CT: control target
= control target key end

     0   :  { %s5382_s30 = smov 0   ;;  %s7138_s0 = inlined_call_operand.vmem [shape: f32[2,4,9,9,128], index: 0, kind: input, shape index: {}]   ;;  %s7139_s1 = inlined_call_operand.vmem [shape: f32[4,9,9,1], index: 1, kind: input, shape index: {}]   ;;  %s7140_s2 = inlined_call_operand.vmem [shape: f32[1,128], index: 2, kind: input, shape index: {}]   ;;  %s7141_s3 = inlined_call_operand.vmem [shape: f32[1,128], index: 3, kind: input, shape index: {}]   ;;  %s7142_s4 = inlined_call_operand.vmem [shape: f32[1,128], index: 4, kind: input, shape index: {}]   ;;  %s7143_s5 = inlined_call_operand.vmem [shape: f32[1,128], index: 5, kind: input, shape index: {}]   ;;  %s7144_s6 = inlined_call_operand.vmem [shape: bf16[9,128,128], index: 6, kind: input, shape index: {}]   ;;  %s7145_s7 = inlined_call_operand.vmem [shape: bf16[9,128,128], index: 7, kind: input, shape index: {}]   ;;  %s7146_s8 = inlined_call_operand.vmem [shape: bf16[128,128], index: 8, kind: input, shape index: {}]   ;;  %s7147_s9 = inlined_call_operand.vmem [shape: f32[2,8,8,128], index: 9, kind: output, shape index: {}]  }
   0x1 LB: > { %s4031_s10 = sadd.s32 4294967295, %s5328_s30   ;;  %p4035_p0 = scmp.ge.s32.totalorder %s5328_s30, 1  ;;  %s5328_s30 = sphi %s5382_s30, %s19_s30  }
   0x2   : > { %p287_p1 = scmp.lt.s32.totalorder %s5328_s30, 3 }
   0x4   : > { %p288_p2 = pnand %p4035_p0, %p287_p1 }
   0x6   : > { %291 = sbr.rel (%p288_p2) target bundleno = 859 (0x35b), region = 56 }
   0xb   : > { %v674_v0 = vld [vmem:[%s7139_s1 + $0xb0] sm:$0xff]  ;;  %v5330_v2 = vmov 0   ;;  %v675_v3 = vld [vmem:[%s7139_s1 + $0xc0] sm:$0xff]  ;;  %v655_v9 = vld [vmem:[%s7139_s1 + $0x8] sm:$0x1]  ;;  %p323_p3 = scmp.lt.s32.totalorder %s4031_s10, 1 }
   0xc   : > { %v672_v1 = vld [vmem:[%s7139_s1 + $0x90] sm:$0xff]  ;;  %5166 = vset.pattern.permute.xlu1 %v5330_v2  ;;  %5165 = vset.pattern.permute.xlu0 %v5330_v2  ;;  %v673_v4 = vld [vmem:[%s7139_s1 + $0xa0] sm:$0xff]  ;;  %v657_v11 = vld [vmem:[%s7139_s1 + $0x18] sm:$0x1]  ;;  %vm1294_vm14 = vcmask 1046528  }
   0xd   : > { %807 = vperm.xlu1 %5166, %v674_v0   ;;  %797 = vperm.xlu0 %5165, %v672_v1   ;;  %v677_v5 = vld [vmem:[%s7139_s1 + $0xe0] sm:$0xff]  ;;  %v676_v6 = vld [vmem:[%s7139_s1 + $0xd0] sm:$0xff]  ;;  %v5167_v12 = vld [vmem:[%s7144_s6 + $0x78] sm:$0xff]   ;;  %s7209_s10 = smov (!%p323_p3, %s4031_s10), 1 }
   0xe   : > { %v679_v7 = vld [vmem:[%s7139_s1 + $0x100] sm:$0xff]  ;;  %v678_v8 = vld [vmem:[%s7139_s1 + $0xf0] sm:$0xff]  ;;  %4682 = vmatprep.subr.bf16.mxu0 %v5167_v12  ;;  %v659_v15 = vld [vmem:[%s7139_s1 + $0x28] sm:$0x1]  ;;  %s5154_s28 = smul.u32 576, %s7209_s10  ;;  %s4453_s22 = sshll.u32 %s7209_s10, 6 }
   0xf   : > { %v654_v10 = vld [vmem:[%s7139_s1] sm:$0xff]  ;;  %v5168_v13 = vld [vmem:[%s7144_s6 + $0x70] sm:$0xff]   ;;  %4683 = vmatpush3.bf16.msra.mxu0 %v5167_v12  ;;  %v5169_v16 = vld [vmem:[%s7144_s6 + $0x68] sm:$0xff]   ;;  %s7100_s24 = scalar_lea.vmem %s7147_s9, %s4453_s22 }
  0x10   : > { %v656_v14 = vld [vmem:[%s7139_s1 + $0x10] sm:$0xff]  ;;  %4684 = vmatprep.subr.bf16.mxu0 %v5168_v13  ;;  %v658_v17 = vld [vmem:[%s7139_s1 + $0x20] sm:$0xff]  ;;  %v5173_v18 = vld [vmem:[%s7144_s6 + $0x38] sm:$0xff]   ;;  %s5580_s16 = scalar_lea.vmem %s7138_s0, %s5154_s28 }
  0x11   : > { %812 = vperm.xlu1 %5166, %v675_v3   ;;  %802 = vperm.xlu0 %5165, %v673_v4   ;;  %v5170_v19 = vld [vmem:[%s7144_s6 + $0x60] sm:$0xff]   ;;  %v661_v20 = vld [vmem:[%s7139_s1 + $0x38] sm:$0x1]  ;;  %v660_v21 = vld [vmem:[%s7139_s1 + $0x30] sm:$0xff] }
  0x12   : > { %4706 = vmatprep.subr.bf16.mxu1 %v5173_v18  ;;  %v5175_v22 = vld [vmem:[%s7144_s6 + $0x30] sm:$0xff]   ;;  %v5171_v23 = vld [vmem:[%s7144_s6 + $0x58] sm:$0xff]   ;;  %v5177_v24 = vld [vmem:[%s7144_s6 + $0x28] sm:$0xff]  }
  0x13   : > { %4685 = vmatpush3.bf16.msra.mxu0 %v5168_v13  ;;  %4707 = vmatpush3.bf16.msra.mxu1 %v5173_v18  ;;  %v663_v25 = vld [vmem:[%s7139_s1 + $0x48] sm:$0x1]  ;;  %v662_v26 = vld [vmem:[%s7139_s1 + $0x40] sm:$0xff]  ;;  %v5172_v28 = vld [vmem:[%s7144_s6 + $0x50] sm:$0xff]  }
  0x14   : > { %4686 = vmatprep.subr.bf16.mxu0 %v5169_v16  ;;  %4708 = vmatprep.subr.bf16.mxu1 %v5175_v22  ;;  %v5179_v27 = vld [vmem:[%s7144_s6 + $0x20] sm:$0xff]   ;;  %v665_v29 = vld [vmem:[%s7139_s1 + $0x58] sm:$0x1]  ;;  %v664_v30 = vld [vmem:[%s7139_s1 + $0x50] sm:$0xff] }
  0x15   : > { %822 = vperm.xlu1 %5166, %v677_v5   ;;  %817 = vperm.xlu0 %5165, %v676_v6   ;;  %v5181_v31 = vld [vmem:[%s7144_s6 + $0x18] sm:$0xff]   ;;  %v5174_v32 = vld [vmem:[%s7144_s6 + $0x48] sm:$0xff]   ;;  %v666_v34 = vld [vmem:[%s7139_s1 + $0x60] sm:$0xff] }
  0x16   : > { %v667_v33 = vld [vmem:[%s7139_s1 + $0x68] sm:$0x1]  ;;  %v5183_v35 = vld [vmem:[%s7144_s6 + $0x10] sm:$0xff]   ;;  %v5176_v36 = vld [vmem:[%s7144_s6 + $0x40] sm:$0xff]  }
  0x17   : > { %4687 = vmatpush3.bf16.msra.mxu0 %v5169_v16  ;;  %4709 = vmatpush3.bf16.msra.mxu1 %v5175_v22  ;;  %v669_v37 = vld [vmem:[%s7139_s1 + $0x78] sm:$0x1]  ;;  %v668_v38 = vld [vmem:[%s7139_s1 + $0x70] sm:$0xff]  ;;  %v5185_v39 = vld [vmem:[%s7144_s6 + $0x8] sm:$0xff]  }
  0x18   : > { %4688 = vmatprep.subr.bf16.mxu0 %v5170_v19  ;;  %4710 = vmatprep.subr.bf16.mxu1 %v5177_v24  ;;  %v5510_v40 = vld [vmem:[%s7144_s6 + $0xb8] sm:$0xff]   ;;  %v683_v41 = vld [vmem:[%s7139_s1 + $0x130] sm:$0xff]  ;;  %v681_v42 = vld [vmem:[%s7139_s1 + $0x120] sm:$0xff] }
  0x19   : > { %832 = vperm.xlu1 %5166, %v679_v7   ;;  %827 = vperm.xlu0 %5165, %v678_v8   ;;  %v5187_v43 = vld [vmem:[%s7144_s6] sm:$0xff]   ;;  %v687_v44 = vld [vmem:[%s7139_s1 + $0x150] sm:$0xff]  ;;  %v5531_v46 = vld [vmem:[%s7144_s6 + $0xf8] sm:$0xff]  }
  0x1a   : > { %v685_v45 = vld [vmem:[%s7139_s1 + $0x140] sm:$0xff]  ;;  %v697_v48 = vld [vmem:[%s7139_s1 + $0x1b0] sm:$0xff]  ;;  %v684_v59 = vld [vmem:[%s7139_s1 + $0x138] sm:$0x1] }
  0x1b   : > { %4689 = vmatpush3.bf16.msra.mxu0 %v5170_v19  ;;  %4711 = vmatpush3.bf16.msra.mxu1 %v5177_v24  ;;  %v698_v47 = vld [vmem:[%s7139_s1 + $0x1c0] sm:$0xff]  ;;  %v699_v50 = vld [vmem:[%s7139_s1 + $0x1d0] sm:$0xff]  ;;  %v682_v60 = vld [vmem:[%s7139_s1 + $0x128] sm:$0x1] }
  0x1c   : > { %4690 = vmatprep.subr.bf16.mxu0 %v5171_v23  ;;  %4712 = vmatprep.subr.bf16.mxu1 %v5179_v27  ;;  %v700_v49 = vld [vmem:[%s7139_s1 + $0x1e0] sm:$0xff]  ;;  %v691_v51 = vld [vmem:[%s7139_s1 + $0x170] sm:$0xff]  ;;  %v688_v0 = vld [vmem:[%s7139_s1 + $0x158] sm:$0x1] }
  0x1d   : > { %712 = vperm.xlu1 %5166, %v655_v9   ;;  %707 = vperm.xlu0 %5165, %v654_v10   ;;  %v689_v52 = vld [vmem:[%s7139_s1 + $0x160] sm:$0xff]  ;;  %v695_v53 = vld [vmem:[%s7139_s1 + $0x190] sm:$0xff]  ;;  %v686_v1 = vld [vmem:[%s7139_s1 + $0x148] sm:$0x1] }
  0x1e   : > { %v693_v54 = vld [vmem:[%s7139_s1 + $0x180] sm:$0xff]  ;;  %v701_v56 = vld [vmem:[%s7139_s1 + $0x1f0] sm:$0xff]  ;;  %v692_v7 = vld [vmem:[%s7139_s1 + $0x178] sm:$0x1] }
  0x1f   : > { %4691 = vmatpush3.bf16.msra.mxu0 %v5171_v23  ;;  %4713 = vmatpush3.bf16.msra.mxu1 %v5179_v27  ;;  %v702_v55 = vld [vmem:[%s7139_s1 + $0x200] sm:$0xff]  ;;  %v703_v58 = vld [vmem:[%s7139_s1 + $0x210] sm:$0xff]  ;;  %v690_v8 = vld [vmem:[%s7139_s1 + $0x168] sm:$0x1] }
  0x20   : > { %4692 = vmatprep.subr.bf16.mxu0 %v5172_v28  ;;  %4714 = vmatprep.subr.bf16.mxu1 %v5181_v31  ;;  %v704_v57 = vld [vmem:[%s7139_s1 + $0x220] sm:$0xff]  ;;  %v354_v61 = vld [vmem:[%s5580_s16 + $0xb0] sm:$0xff]  ;;  %v694_v23 = vld [vmem:[%s7139_s1 + $0x188] sm:$0x1] }
  0x21   : > { %722 = vperm.xlu1 %5166, %v657_v11   ;;  %717 = vperm.xlu0 %5165, %v656_v14   ;;  %v5592_v62 = vld [vmem:[%s7140_s2] ss:$0 sm:$0xff]  ;;  %v352_v63 = vld [vmem:[%s5580_s16 + $0x90] sm:$0xff] }
  0x22   : > { %v412_v2 = vmul.f32 %v5592_v62, %v354_v61  ;;  %v5605_v3 = vld [vmem:[%s7141_s3] ss:$0 sm:$0xff]  ;;  %v410_v5 = vmul.f32 %v5592_v62, %v352_v63  ;;  %v356_v13 = vld [vmem:[%s5580_s16 + $0xd0] sm:$0xff] }
  0x23   : > { %4693 = vmatpush3.bf16.msra.mxu0 %v5172_v28  ;;  %4715 = vmatpush3.bf16.msra.mxu1 %v5181_v31  ;;  %v355_v4 = vld [vmem:[%s5580_s16 + $0xc0] sm:$0xff]  ;;  %v358_v16 = vld [vmem:[%s5580_s16 + $0xf0] sm:$0xff] }
  0x24   : > { %4694 = vmatprep.subr.bf16.mxu0 %v5174_v32  ;;  %4716 = vmatprep.subr.bf16.mxu1 %v5183_v35  ;;  %v353_v6 = vld [vmem:[%s5580_s16 + $0xa0] sm:$0xff]  ;;  %v413_v9 = vmul.f32 %v5592_v62, %v355_v4  ;;  %v5619_v11 = vadd.f32 %v5605_v3, %v412_v2  ;;  %v5624_v14 = vadd.f32 %v5605_v3, %v410_v5  ;;  %v345_v2 = vld [vmem:[%s5580_s16 + $0x58] sm:$0x1] }
  0x25   : > { %732 = vperm.xlu1 %5166, %v659_v15   ;;  %727 = vperm.xlu0 %5165, %v658_v17   ;;  %v357_v10 = vld [vmem:[%s5580_s16 + $0xe0] sm:$0xff]  ;;  %v411_v12 = vmul.f32 %v5592_v62, %v353_v6  ;;  %v696_v17 = vld [vmem:[%s7139_s1 + $0x198] sm:$0x1] }
  0x26   : > { %v359_v15 = vld [vmem:[%s5580_s16 + $0x100] sm:$0xff]  ;;  %v5632_v18 = vadd.f32 %v5605_v3, %v413_v9  ;;  %v415_v19 = vmul.f32 %v5592_v62, %v357_v10  ;;  %v5642_v24 = vmul.f32 0.1, %v5619_v11  ;;  %v5649_v27 = vmul.f32 0.1, %v5624_v14 }
  0x27   : > { %4695 = vmatpush3.bf16.msra.mxu0 %v5174_v32  ;;  %4717 = vmatpush3.bf16.msra.mxu1 %v5183_v35  ;;  %v334_v22 = vld [vmem:[%s5580_s16] sm:$0xff]  ;;  %v417_v28 = vmul.f32 %v5592_v62, %v359_v15  ;;  %vm521_vm0 = vcmp.gt.f32.partialorder %v5619_v11, 0.0  ;;  %vm519_vm1 = vcmp.gt.f32.partialorder %v5624_v14, 0.0 }
  0x28   : > { %4696 = vmatprep.subr.bf16.mxu0 %v5176_v36  ;;  %4718 = vmatprep.subr.bf16.mxu1 %v5185_v39  ;;  %v392_v32 = vmul.f32 %v5592_v62, %v334_v22  ;;  %v670_v35 = vld [vmem:[%s7139_s1 + $0x80] sm:$0xff]  ;;  %vm522_vm2 = vcmp.gt.f32.partialorder %v5632_v18, 0.0 }
  0x29   : > { %742 = vperm.xlu1 %5166, %v661_v20   ;;  %737 = vperm.xlu0 %5165, %v660_v21   ;;  %v414_v20 = vmul.f32 %v5592_v62, %v356_v13  ;;  %v335_v21 = vld [vmem:[%s5580_s16 + $0x8] sm:$0x1]  ;;  %v346_v15 = vld [vmem:[%s5580_s16 + $0x60] sm:$0xff] }
  0x2a   : > { %v393_v31 = vmul.f32 %v5592_v62, %v335_v21  ;;  %v347_v13 = vld [vmem:[%s5580_s16 + $0x68] sm:$0x1] }
  0x2b   : > { %4697 = vmatpush3.bf16.msra.mxu0 %v5176_v36  ;;  %4719 = vmatpush3.bf16.msra.mxu1 %v5185_v39  ;;  %v5664_v36 = vmul.f32 0.1, %v5632_v18 }
  0x2c   : > { %4730 = vmatprep.subr.bf16.mxu0 %v5510_v40  ;;  %4720 = vmatprep.subr.bf16.mxu1 %v5187_v43 }
  0x2d   : > { %752 = vperm.xlu1 %5166, %v663_v25   ;;  %747 = vperm.xlu0 %5165, %v662_v26   ;;  %v5645_v25 = vadd.f32 %v5605_v3, %v411_v12  ;;  %v337_v26 = vld [vmem:[%s5580_s16 + $0x18] sm:$0x1]  ;;  %v344_v12 = vld [vmem:[%s5580_s16 + $0x50] sm:$0xff] }
  0x2e   : > { %v395_v39 = vmul.f32 %v5592_v62, %v337_v26  ;;  %v405_v26 = vmul.f32 %v5592_v62, %v347_v13 }
  0x2f   : > { %4721 = vmatpush3.bf16.msra.mxu1 %v5187_v43  ;;  %v341_v43 = vld [vmem:[%s5580_s16 + $0x38] sm:$0x1]  ;;  %vm520_vm3 = vcmp.gt.f32.partialorder %v5645_v25, 0.0 }
  0x30   : > { %4754 = vmatprep.subr.bf16.mxu1 %v5531_v46 }
  0x31   : > { %762 = vperm.xlu1 %5166, %v665_v29   ;;  %757 = vperm.xlu0 %5165, %v664_v30   ;;  %v671_v29 = vld [vmem:[%s7139_s1 + $0x88] sm:$0x1]  ;;  %v416_v30 = vmul.f32 %v5592_v62, %v358_v16 }
  0x35   : > { %772 = vperm.xlu1 %5166, %v667_v33   ;;  %767 = vperm.xlu0 %5165, %v666_v34   ;;  %v336_v33 = vld [vmem:[%s5580_s16 + $0x10] sm:$0xff]  ;;  %v339_v34 = vld [vmem:[%s5580_s16 + $0x28] sm:$0x1] }
  0x39   : > { %782 = vperm.xlu1 %5166, %v669_v37   ;;  %777 = vperm.xlu0 %5165, %v668_v38   ;;  %v5667_v37 = vadd.f32 %v5605_v3, %v415_v19  ;;  %v5670_v38 = vadd.f32 %v5605_v3, %v414_v20  ;;  %v403_v19 = vmul.f32 %v5592_v62, %v345_v2 }
  0x3b   : > { %vm524_vm4 = vcmp.gt.f32.partialorder %v5667_v37, 0.0  ;;  %vm523_vm5 = vcmp.gt.f32.partialorder %v5670_v38, 0.0 }
  0x3d   : > { %852 = vperm.xlu1 %5166, %v683_v41   ;;  %842 = vperm.xlu0 %5165, %v681_v42   ;;  %v338_v41 = vld [vmem:[%s5580_s16 + $0x20] sm:$0xff]  ;;  %v5675_v42 = vmul.f32 0.1, %v5645_v25 }
  0x41   : > { %872 = vperm.xlu1 %5166, %v687_v44   ;;  %862 = vperm.xlu0 %5165, %v685_v45   ;;  %v5679_v44 = vadd.f32 %v5605_v3, %v417_v28  ;;  %v394_v45 = vmul.f32 %v5592_v62, %v336_v33  ;;  %v349_v28 = vld [vmem:[%s5580_s16 + $0x78] sm:$0x1] }
  0x43   : > { %v5712_v63 = vmul.f32 0.1, %v5679_v44  ;;  %vm526_vm6 = vcmp.gt.f32.partialorder %v5679_v44, 0.0 }
  0x45   : > { %927 = vperm.xlu1 %5166, %v698_v47   ;;  %922 = vperm.xlu0 %5165, %v697_v48   ;;  %v397_v47 = vmul.f32 %v5592_v62, %v339_v34  ;;  %v340_v48 = vld [vmem:[%s5580_s16 + $0x30] sm:$0xff] }
  0x49   : > { %937 = vperm.xlu1 %5166, %v700_v49   ;;  %932 = vperm.xlu0 %5165, %v699_v50   ;;  %v343_v49 = vld [vmem:[%s5580_s16 + $0x48] sm:$0x1]  ;;  %v5686_v50 = vadd.f32 %v5605_v3, %v416_v30 }
  0x4a   : > { %v401_v61 = vmul.f32 %v5592_v62, %v343_v49 }
  0x4b   : > { %v5722_v4 = vmul.f32 0.1, %v5686_v50  ;;  %vm525_vm7 = vcmp.gt.f32.partialorder %v5686_v50, 0.0 }
  0x4d   : > { %892 = vperm.xlu1 %5166, %v691_v51   ;;  %882 = vperm.xlu0 %5165, %v689_v52   ;;  %v5689_v51 = vadd.f32 %v5605_v3, %v393_v31  ;;  %v5692_v52 = vadd.f32 %v5605_v3, %v392_v32  ;;  %v404_v31 = vmul.f32 %v5592_v62, %v346_v15  ;;  %v348_v32 = vld [vmem:[%s5580_s16 + $0x70] sm:$0xff] }
  0x4f   : > { %v5725_v5 = vmul.f32 0.1, %v5689_v51  ;;  %v5728_v6 = vmul.f32 0.1, %v5692_v52  ;;  %vm502_vm8 = vcmp.gt.f32.partialorder %v5689_v51, 0.0  ;;  %vm501_vm9 = vcmp.gt.f32.partialorder %v5692_v52, 0.0 }
  0x51   : > { %912 = vperm.xlu1 %5166, %v695_v53   ;;  %902 = vperm.xlu0 %5165, %v693_v54   ;;  %v396_v53 = vmul.f32 %v5592_v62, %v338_v41  ;;  %v680_v54 = vld [vmem:[%s7139_s1 + $0x110] sm:$0xff] }
  0x52   : > { %v363_v41 = vld [vmem:[%s5580_s16 + $0x130] sm:$0xff] }
  0x55   : > { %947 = vperm.xlu1 %5166, %v702_v55   ;;  %942 = vperm.xlu0 %5165, %v701_v56   ;;  %v5699_v55 = vmul.f32 0.1, %v5667_v37  ;;  %v5702_v56 = vmul.f32 0.1, %v5670_v38 }
  0x59   : > { %957 = vperm.xlu1 %5166, %v704_v57   ;;  %952 = vperm.xlu0 %5165, %v703_v58   ;;  %v5705_v57 = vadd.f32 %v5605_v3, %v395_v39  ;;  %v399_v58 = vmul.f32 %v5592_v62, %v341_v43  ;;  %v407_v39 = vmul.f32 %v5592_v62, %v349_v28 }
  0x5b   : > { %v5737_v9 = vadd.f32 %v5605_v3, %v399_v58  ;;  %v5803_v2 = vadd.f32 %v5605_v3, %v407_v39  ;;  %vm504_vm10 = vcmp.gt.f32.partialorder %v5705_v57, 0.0 }
  0x5d   : > { %857 = vperm.xlu1 %5166, %v684_v59   ;;  %847 = vperm.xlu0 %5165, %v682_v60   ;;  %v342_v59 = vld [vmem:[%s5580_s16 + $0x40] sm:$0xff]  ;;  %v398_v60 = vmul.f32 %v5592_v62, %v340_v48  ;;  %v5829_v39 = vmul.f32 0.1, %v5803_v2  ;;  %vm508_vm15 = vcmp.gt.f32.partialorder %v5737_v9, 0.0 }
  0x5e   : > { %v400_v10 = vmul.f32 %v5592_v62, %v342_v59  ;;  %v361_v48 = vld [vmem:[%s5580_s16 + $0x120] sm:$0xff]  ;;  %v421_v59 = vmul.f32 %v5592_v62, %v363_v41 }
  0x5f   : > { %v5744_v16 = vadd.f32 %v5605_v3, %v398_v60  ;;  %v365_v60 = vld [vmem:[%s5580_s16 + $0x140] sm:$0xff]  ;;  %7158 = vst [vmem:[#allocation3_spill] sm:$0xff] %v5829_v39 }
  0x60   : > { %v5766_v30 = vadd.f32 %v5605_v3, %v400_v10  ;;  %v419_v10 = vmul.f32 %v5592_v62, %v361_v48  ;;  %v5821_v28 = vadd.f32 %v5605_v3, %v421_v59 }
  0x61   : > { %877 = vperm.xlu1 %5166, %v688_v0   ;;  %867 = vperm.xlu0 %5165, %v686_v1   ;;  %v5715_v0 = vadd.f32 %v5605_v3, %v394_v45  ;;  %v5718_v1 = vadd.f32 %v5605_v3, %v397_v47  ;;  %v5771_v33 = vmul.f32 0.1, %v5744_v16  ;;  %v5785_v45 = vadd.f32 %v5605_v3, %v405_v26 }
  0x62   : > { %v406_v47 = vmul.f32 %v5592_v62, %v348_v32  ;;  %v5790_v49 = vmul.f32 0.1, %v5766_v30  ;;  %v423_v26 = vmul.f32 %v5592_v62, %v365_v60  ;;  %v377_v32 = vld [vmem:[%s5580_s16 + $0x1b0] sm:$0xff]  ;;  %v5832_v41 = vadd.f32 %v5605_v3, %v419_v10 }
  0x63   : > { %v5751_v20 = vmul.f32 0.1, %v5715_v0  ;;  %v5754_v21 = vmul.f32 0.1, %v5718_v1  ;;  %v5810_v13 = vmul.f32 0.1, %v5785_v45  ;;  %v435_v59 = vmul.f32 %v5592_v62, %v377_v32 }
  0x64   : > { %v5813_v15 = vadd.f32 %v5605_v3, %v406_v47  ;;  %v371_v60 = vld [vmem:[%s5580_s16 + $0x170] sm:$0xff]  ;;  %vm503_vm11 = vcmp.gt.f32.partialorder %v5715_v0, 0.0  ;;  %vm506_vm12 = vcmp.gt.f32.partialorder %v5718_v1, 0.0 }
  0x65   : > { %897 = vperm.xlu1 %5166, %v692_v7   ;;  %887 = vperm.xlu0 %5165, %v690_v8   ;;  %v5731_v7 = vadd.f32 %v5605_v3, %v396_v53  ;;  %v5734_v8 = vmul.f32 0.1, %v5705_v57  ;;  %v5793_v53 = vadd.f32 %v5605_v3, %v404_v31 }
  0x66   : > { %v5835_v47 = vmul.f32 0.1, %v5813_v15 }
  0x67   : > { %v5757_v22 = vmul.f32 0.1, %v5731_v7  ;;  %vm505_vm13 = vcmp.gt.f32.partialorder %v5731_v7, 0.0 }
  0x68   : > { %7159 = vst [vmem:[#allocation4_spill] sm:$0xff] %v5835_v47 }
  0x69   : > { %917 = vperm.xlu1 %5166, %v696_v17   ;;  %907 = vperm.xlu0 %5165, %v694_v23   ;;  %v5747_v17 = vadd.f32 %v5605_v3, %v401_v61  ;;  %v402_v23 = vmul.f32 %v5592_v62, %v344_v12  ;;  %v378_v61 = vld [vmem:[%s5580_s16 + $0x1c0] sm:$0xff] }
  0x6a   : > { %v436_v31 = vmul.f32 %v5592_v62, %v378_v61  ;;  %v5847_v61 = vmul.f32 0.1, %v5821_v28 }
  0x6b   : > { %v5774_v34 = vmul.f32 0.1, %v5747_v17  ;;  %v5782_v43 = vadd.f32 %v5605_v3, %v402_v23  ;;  %v5817_v23 = vmul.f32 0.1, %v5793_v53 }
  0x6c   : > { %7161 = vst [vmem:[#allocation6_spill] sm:$0xff] %v5847_v61  ;;  %v5850_v10 = vadd.f32 %v5605_v3, %v436_v31  ;;  %v5865_v61 = vadd.f32 %v5605_v3, %v435_v59  ;;  %v623_v59 = vsel %vm521_vm0, %v5619_v11, %v5642_v24  ;;  %vm507_vm0 = vcmp.gt.f32.partialorder %v5744_v16, 0.0 }
  0x6d   : > { %792 = vperm.xlu1 %5166, %v671_v29   ;;  %787 = vperm.xlu0 %5165, %v670_v35   ;;  %v5763_v29 = vmul.f32 0.1, %v5737_v9  ;;  %v5777_v35 = vadd.f32 %v5605_v3, %v403_v19  ;;  %v5807_v12 = vmul.f32 0.1, %v5782_v43 }
  0x6e   : > { %v5868_v31 = vmul.f32 0.1, %v5850_v10 }
  0x6f   : > { %v5797_v58 = vmul.f32 0.1, %v5777_v35 }
  0x71   : > { %837 = vperm.xlu0 %5165, %v680_v54   ;;  %v367_v54 = vld [vmem:[%s5580_s16 + $0x150] sm:$0xff] }
  0x72   : > { %v425_v19 = vmul.f32 %v5592_v62, %v367_v54  ;;  %v5842_v54 = vadd.f32 %v5605_v3, %v423_v26  ;;  %v429_v26 = vmul.f32 %v5592_v62, %v371_v60  ;;  %v5876_v60 = vmul.f32 0.1, %v5865_v61 }
  0x74   : > { %v5838_v48 = vadd.f32 %v5605_v3, %v425_v19  ;;  %v5855_v19 = vmul.f32 0.1, %v5832_v41  ;;  %v5862_v32 = vmul.f32 0.1, %v5842_v54  ;;  %7165 = vst [vmem:[#allocation10_spill] sm:$0xff] %v5876_v60 }
  0x76   : > { %7160 = vst [vmem:[#allocation5_spill] sm:$0xff] %v5838_v48  ;;  %7162 = vst [vmem:[#allocation7_spill] sm:$0xff] %v5855_v19  ;;  %v5858_v47 = vmul.f32 0.1, %v5838_v48  ;;  %v5873_v48 = vadd.f32 %v5605_v3, %v429_v26  ;;  %v622_v3 = vsel %vm520_vm3, %v5645_v25, %v5675_v42  ;;  %v626_v25 = vsel %vm524_vm4, %v5667_v37, %v5699_v55  ;;  %v5180_v42 = vld [vmem:[%s7144_s6 + $0xb0] sm:$0xff]  }
  0x77   : > { %7164 = vst [vmem:[#allocation9_spill] sm:$0xff] %v5862_v32  ;;  %v621_v32 = vsel %vm519_vm1, %v5624_v14, %v5649_v27  ;;  %vm510_vm1 = vcmp.gt.f32.partialorder %v5747_v17, 0.0  ;;  %vm512_vm3 = vcmp.gt.f32.partialorder %v5777_v35, 0.0  ;;  %vm511_vm4 = vcmp.gt.f32.partialorder %v5782_v43, 0.0 }
  0x78   : > { %7163 = vst [vmem:[#allocation8_spill] sm:$0xff] %v5858_v47  ;;  %v624_v47 = vsel %vm522_vm2, %v5632_v18, %v5664_v36  ;;  %v5897_v26 = vmul.f32 0.1, %v5873_v48  ;;  %v625_v36 = vsel %vm523_vm5, %v5670_v38, %v5702_v56  ;;  %v628_v56 = vsel %vm526_vm6, %v5679_v44, %v5712_v63 }
  0x79   : > { %vm509_vm2 = vcmp.gt.f32.partialorder %v5766_v30, 0.0  ;;  %vm514_vm5 = vcmp.gt.f32.partialorder %v5785_v45, 0.0  ;;  %vm513_vm6 = vcmp.gt.f32.partialorder %v5793_v53, 0.0 }
  0x88   : > { %v808_v39 = vpop.permute.xlu1 %807  ;;  %v798_v19 = vpop.permute.xlu0 %797 }
  0x89   : > { %v5899_v14 = vmul.f32 %v808_v39, %v623_v59  ;;  %v978_v27 = vmul.f32 %v798_v19, %v621_v32  ;;  %v627_v59 = vsel %vm525_vm7, %v5686_v50, %v5722_v4  ;;  %vm516_vm7 = vcmp.gt.f32.partialorder %v5803_v2, 0.0 }
  0x8c   : > { %v813_v11 = vpop.permute.xlu1 %812  ;;  %v803_v24 = vpop.permute.xlu0 %802 }
  0x8d   : > { %v5901_v60 = vmul.f32 %v813_v11, %v624_v47  ;;  %v5903_v18 = vmul.f32 %v803_v24, %v622_v3  ;;  %v5182_v3 = vld [vmem:[%s7144_s6 + $0xa8] sm:$0xff]  }
  0x8f   : > { %v1032_v39 = vpack.c.bf16 %v5901_v60, %v5899_v14  ;;  %v2085_v47 = vpack.c.bf16 %v5899_v14, %v5903_v18  ;;  %v1031_v19 = vpack.c.bf16 %v5903_v18, %v978_v27  ;;  %v604_v27 = vsel %vm502_vm8, %v5689_v51, %v5725_v5  ;;  %v5231_v14 = vld [vmem:[%s7144_s6 + $0x1d0] sm:$0xff]  }
  0x90   : > { %v823_v37 = vpop.permute.xlu1 %822  ;;  %v818_v55 = vpop.permute.xlu0 %817  ;;  %vm515_vm8 = vcmp.gt.f32.partialorder %v5813_v15, 0.0 }
  0x91   : > { %v5923_v32 = vmul.f32 %v823_v37, %v626_v25  ;;  %v5925_v38 = vmul.f32 %v818_v55, %v625_v36  ;;  %4698 = vmatprep.mubr.bf16.mxu0 %v1031_v19  ;;  %v5184_v25 = vld [vmem:[%s7144_s6 + $0xa0] sm:$0xff]   ;;  %v606_v19 = vsel %vm504_vm10, %v5705_v57, %v5734_v8  ;;  %v5186_v37 = vld [vmem:[%s7144_s6 + $0x98] sm:$0xff]   ;;  %vm528_vm10 = vcmp.gt.f32.partialorder %v5832_v41, 0.0 }
  0x92   : > { %4699 = vmatmul.mubr.bf16.vlgmr.msra.gmra.mxu0 %v1032_v39 }
  0x93   : > { %v1033_v11 = vpack.c.bf16 %v5923_v32, %v5925_v38  ;;  %4731 = vmatpush3.bf16.msra.mxu0 %v5510_v40  ;;  %v603_v40 = vsel %vm501_vm9, %v5692_v52, %v5728_v6  ;;  %vm530_vm9 = vcmp.gt.f32.partialorder %v5821_v28, 0.0 }
  0x94   : > { %v833_v44 = vpop.permute.xlu1 %832  ;;  %v828_v63 = vpop.permute.xlu0 %827  ;;  %4732 = vmatprep.subr.bf16.mxu0 %v5180_v42 }
  0x95   : > { %v5945_v50 = vmul.f32 %v833_v44, %v628_v56  ;;  %v5947_v4 = vmul.f32 %v828_v63, %v627_v59  ;;  %4702 = vmatprep.mubr.bf16.mxu0 %v1033_v11 }
  0x97   : > { %v1034_v36 = vpack.c.bf16 %v5945_v50, %v5947_v4  ;;  %4733 = vmatpush3.bf16.msra.mxu0 %v5180_v42  ;;  %v605_v42 = vsel %vm503_vm11, %v5715_v0, %v5751_v20  ;;  %v608_v0 = vsel %vm506_vm12, %v5718_v1, %v5754_v21  ;;  %v607_v20 = vsel %vm505_vm13, %v5731_v7, %v5757_v22 }
  0x98   : > { %v713_v51 = vpop.permute.xlu1 %712  ;;  %v708_v5 = vpop.permute.xlu0 %707  ;;  %4734 = vmatprep.subr.bf16.mxu0 %v5182_v3  ;;  %vm545_vm11 = vcmp.gt.f32.partialorder %v5850_v10, 0.0  ;;  %vm544_vm12 = vcmp.gt.f32.partialorder %v5865_v61, 0.0 }
  0x99   : > { %v961_v52 = vmul.f32 %v713_v51, %v604_v27  ;;  %v960_v6 = vmul.f32 %v708_v5, %v603_v40  ;;  %v609_v51 = vsel %vm507_vm0, %v5744_v16, %v5771_v33  ;;  %vm538_vm0 = vcmp.gt.f32.partialorder %v5873_v48, 0.0 }
  0x9a   : > { %4703 = vmatmul.mubr.bf16.gmra.mxu0 %v1034_v36 }
  0x9b   : > { %v1296_v55 = vrot.slane %v961_v52, 1  ;;  %v1295_v56 = vrot.slane %v960_v6, 1  ;;  %4735 = vmatpush3.bf16.msra.mxu0 %v5182_v3  ;;  %v5188_v3 = vld [vmem:[%s7144_s6 + $0x90] sm:$0xff]   ;;  %v5190_v52 = vld [vmem:[%s7144_s6 + $0x88] sm:$0xff]  }
  0x9c   : > { %v723_v59 = vpop.permute.xlu1 %722  ;;  %v718_v11 = vpop.permute.xlu0 %717  ;;  %4736 = vmatprep.subr.bf16.mxu0 %v5184_v25 }
  0x9d   : > { %v963_v57 = vmul.f32 %v723_v59, %v606_v19  ;;  %v5979_v8 = vmul.f32 %v718_v11, %v605_v42  ;;  %v1297_v7 = vsel %vm1294_vm14, %v1295_v56, %v1296_v55  ;;  %v5191_v55 = vld [vmem:[%s7144_s6 + $0xf0] sm:$0xff]   ;;  %v611_v56 = vsel %vm509_vm2, %v5766_v30, %v5790_v49  ;;  %v5192_v59 = vld [vmem:[%s7144_s6 + $0x80] sm:$0xff]  }
  0x9f   : > { %v1299_v44 = vrot.slane %v963_v57, 1  ;;  %v1298_v63 = vrot.slane %v5979_v8, 1  ;;  %4737 = vmatpush3.bf16.msra.mxu0 %v5184_v25  ;;  %v1011_v27 = vpack.c.bf16 %v5979_v8, %v960_v6  ;;  %v610_v25 = vsel %vm508_vm15, %v5737_v9, %v5763_v29 }
  0xa0   : > { %v733_v1 = vpop.permute.xlu1 %732  ;;  %v728_v21 = vpop.permute.xlu0 %727  ;;  %4738 = vmatprep.subr.bf16.mxu0 %v5186_v37  ;;  %vm532_vm15 = vcmp.gt.f32.partialorder %v5842_v54, 0.0 }
  0xa1   : > { %v965_v40 = vmul.f32 %v733_v1, %v608_v0  ;;  %v5996_v36 = vmul.f32 %v728_v21, %v607_v20  ;;  %4722 = vmatprep.mubr.bf16.mxu1 %v1011_v27  ;;  %v6000_v22 = vsel %vm1294_vm14, %v1298_v63, %v1299_v44  ;;  %v5193_v44 = vld [vmem:[%s7144_s6 + $0xe8] sm:$0xff]   ;;  %v613_v63 = vsel %vm511_vm4, %v5782_v43, %v5807_v12  ;;  %v5194_v27 = vld [vmem:[%s7144_s6 + $0x138] sm:$0xff]  }
  0xa2   : > { %v1327_v5 = vpack.c.bf16 %v6000_v22, %v1297_v7 }
  0xa3   : > { %v1302_v6 = vrot.slane %v965_v40, 1  ;;  %v1301_v19 = vrot.slane %v5996_v36, 1  ;;  %4739 = vmatpush3.bf16.msra.mxu0 %v5186_v37  ;;  %v612_v37 = vsel %vm510_vm1, %v5747_v17, %v5774_v34 }
  0xa4   : > { %v743_v9 = vpop.permute.xlu1 %742  ;;  %v738_v29 = vpop.permute.xlu0 %737  ;;  %4746 = vmatprep.mubr.bf16.mxu0 %v1327_v5  ;;  %4740 = vmatprep.subr.bf16.mxu0 %v5188_v3  ;;  %v615_v5 = vsel %vm513_vm6, %v5793_v53, %v5817_v23 }
  0xa5   : > { %v6018_v16 = vsel %vm1294_vm14, %v1301_v19, %v1302_v6  ;;  %v967_v33 = vmul.f32 %v743_v9, %v610_v25  ;;  %v6020_v42 = vmul.f32 %v738_v29, %v609_v51  ;;  %v5195_v25 = vld [vmem:[%s7144_s6 + $0xe0] sm:$0xff]   ;;  %v616_v51 = vsel %vm514_vm5, %v5785_v45, %v5810_v13  ;;  %v5196_v6 = vld [vmem:[%s7144_s6 + $0x130] sm:$0xff]  }
  0xa6   : > { %v369_v19 = vld [vmem:[%s5580_s16 + $0x160] sm:$0xff] }
  0xa7   : > { %v1305_v57 = vrot.slane %v967_v33, 1  ;;  %v1304_v0 = vrot.slane %v6020_v42, 1  ;;  %4741 = vmatpush3.bf16.msra.mxu0 %v5188_v3  ;;  %v1012_v20 = vpack.c.bf16 %v6020_v42, %v5996_v36  ;;  %v614_v3 = vsel %vm512_vm3, %v5777_v35, %v5797_v58 }
  0xa8   : > { %v753_v17 = vpop.permute.xlu1 %752  ;;  %v748_v30 = vpop.permute.xlu0 %747  ;;  %4742 = vmatprep.subr.bf16.mxu0 %v5190_v52 }
  0xa9   : > { %v969_v34 = vmul.f32 %v753_v17, %v612_v37  ;;  %v6043_v49 = vmul.f32 %v748_v30, %v611_v56  ;;  %4723 = vmatmul.mubr.bf16.vlgmr.msra.gmra.mxu1 %v1012_v20  ;;  %v6066_v43 = vsel %vm1294_vm14, %v1304_v0, %v1305_v57  ;;  %v5197_v56 = vld [vmem:[%s7144_s6 + $0xd8] sm:$0xff]   ;;  %v7167_v0 = vld [vmem:[#allocation4_spill] sm:$0xff] }
  0xaa   : > { %4755 = vmatpush3.bf16.msra.mxu1 %v5531_v46  ;;  %v1328_v13 = vpack.c.bf16 %v6066_v43, %v6018_v16  ;;  %v617_v20 = vsel %vm515_vm8, %v5813_v15, %v7167_v0  ;;  %v5198_v30 = vld [vmem:[%s7144_s6 + $0x128] sm:$0xff]  }
  0xab   : > { %v1308_v1 = vrot.slane %v969_v34, 1  ;;  %v1307_v21 = vrot.slane %v6043_v49, 1  ;;  %v1944_v46 = vpack.c.bf16 %v6043_v49, %v6020_v42  ;;  %4743 = vmatpush3.bf16.msra.mxu0 %v5190_v52  ;;  %4756 = vmatprep.subr.bf16.mxu1 %v5191_v55  ;;  %v5230_v42 = vld [vmem:[%s7144_s6 + $0x228] sm:$0xff]  }
  0xac   : > { %v763_v35 = vpop.permute.xlu1 %762  ;;  %v758_v58 = vpop.permute.xlu0 %757  ;;  %4744 = vmatprep.subr.bf16.mxu0 %v5192_v59 }
  0xad   : > { %v971_v12 = vmul.f32 %v763_v35, %v614_v3  ;;  %v6068_v40 = vmul.f32 %v758_v58, %v613_v63  ;;  %v6071_v7 = vsel %vm1294_vm14, %v1307_v21, %v1308_v1  ;;  %v7168_v21 = vld [vmem:[#allocation5_spill] sm:$0xff]  ;;  %v380_v35 = vld [vmem:[%s5580_s16 + $0x1e0] sm:$0xff]  ;;  %v7169_v58 = vld [vmem:[#allocation6_spill] sm:$0xff] }
  0xae   : > { %4757 = vmatpush3.bf16.msra.mxu1 %v5191_v55  ;;  %vm534_vm13 = vcmp.gt.f32.partialorder %v7168_v21, 0.0 }
  0xaf   : > { %v1311_v9 = vrot.slane %v971_v12, 1  ;;  %v1310_v29 = vrot.slane %v6068_v40, 1  ;;  %4745 = vmatpush3.bf16.msra.mxu0 %v5192_v59  ;;  %4758 = vmatprep.subr.bf16.mxu1 %v5193_v44  ;;  %v1013_v45 = vpack.c.bf16 %v6068_v40, %v6043_v49  ;;  %v7166_v59 = vld [vmem:[#allocation3_spill] sm:$0xff]  ;;  %v632_v12 = vsel %vm530_vm9, %v5821_v28, %v7169_v58 }
  0xb0   : > { %v773_v53 = vpop.permute.xlu1 %772  ;;  %v768_v23 = vpop.permute.xlu0 %767  ;;  %4778 = vmatprep.subr.bf16.mxu0 %v5194_v27  ;;  %v618_v57 = vsel %vm516_vm7, %v5803_v2, %v7166_v59  ;;  %v427_v2 = vmul.f32 %v5592_v62, %v369_v19  ;;  %v5199_v62 = vld [vmem:[%s7144_s6 + $0xd0] sm:$0xff]   ;;  %v5200_v19 = vld [vmem:[%s7144_s6 + $0x120] sm:$0xff]  }
  0xb1   : > { %v973_v33 = vmul.f32 %v773_v53, %v616_v51  ;;  %v6095_v55 = vmul.f32 %v768_v23, %v615_v5  ;;  %4726 = vmatprep.mubr.bf16.mxu1 %v1013_v45  ;;  %v6098_v37 = vsel %vm1294_vm14, %v1310_v29, %v1311_v9  ;;  %v7170_v51 = vld [vmem:[#allocation7_spill] sm:$0xff]  ;;  %v379_v9 = vld [vmem:[%s5580_s16 + $0x1d0] sm:$0xff] }
  0xb2   : > { %4747 = vmatmul.mubr.bf16.vlgmr.msra.gmra.mxu0 %v1328_v13  ;;  %4759 = vmatpush3.bf16.msra.mxu1 %v5193_v44  ;;  %v1329_v17 = vpack.c.bf16 %v6098_v37, %v6071_v7  ;;  %v630_v5 = vsel %vm528_vm10, %v5832_v41, %v7170_v51  ;;  %v6151_v41 = vld [vmem:[%s7141_s3] ss:$0 sm:$0xff]  ;;  %v375_v53 = vld [vmem:[%s5580_s16 + $0x190] sm:$0xff] }
  0xb3   : > { %v1314_v34 = vrot.slane %v973_v33, 1  ;;  %v1313_v44 = vrot.slane %v6095_v55, 1  ;;  %4779 = vmatpush3.bf16.msra.mxu0 %v5194_v27  ;;  %4760 = vmatprep.subr.bf16.mxu1 %v5195_v25  ;;  %v6154_v13 = vadd.f32 %v6151_v41, %v427_v2  ;;  %v373_v59 = vld [vmem:[%s5580_s16 + $0x180] sm:$0xff] }
  0xb4   : > { %v783_v15 = vpop.permute.xlu1 %782  ;;  %v778_v3 = vpop.permute.xlu0 %777  ;;  %4750 = vmatprep.mubr.bf16.mxu0 %v1329_v17  ;;  %4780 = vmatprep.subr.bf16.mxu0 %v5196_v6  ;;  %v382_v51 = vld [vmem:[%s5580_s16 + $0x200] sm:$0xff] }
  0xb5   : > { %v975_v63 = vmul.f32 %v783_v15, %v618_v57  ;;  %v6120_v1 = vmul.f32 %v778_v3, %v617_v20  ;;  %v6125_v27 = vsel %vm1294_vm14, %v1313_v44, %v1314_v34  ;;  %v5201_v20 = vld [vmem:[%s7144_s6 + $0xc8] sm:$0xff]   ;;  %v5202_v34 = vld [vmem:[%s7144_s6 + $0x118] sm:$0xff]   ;;  %v6176_v44 = vld [vmem:[%s7140_s2] ss:$0 sm:$0xff]  ;;  %v587_v3 = vmul.f32 0.1, %v6154_v13 }
  0xb6   : > { %4761 = vmatpush3.bf16.msra.mxu1 %v5195_v25  ;;  %v438_v2 = vmul.f32 %v6176_v44, %v380_v35  ;;  %v5203_v35 = vld [vmem:[%s7144_s6 + $0xc0] sm:$0xff]   ;;  %vm536_vm2 = vcmp.gt.f32.partialorder %v6154_v13, 0.0 }
  0xb7   : > { %v1317_v25 = vrot.slane %v975_v63, 1  ;;  %v1316_v45 = vrot.slane %v6120_v1, 1  ;;  %4781 = vmatpush3.bf16.msra.mxu0 %v5196_v6  ;;  %4762 = vmatprep.subr.bf16.mxu1 %v5197_v56  ;;  %v1014_v28 = vpack.c.bf16 %v6120_v1, %v6095_v55  ;;  %v5232_v49 = vld [vmem:[%s7144_s6 + $0x220] sm:$0xff]  }
  0xb8   : > { %v853_v23 = vpop.permute.xlu1 %852  ;;  %v843_v33 = vpop.permute.xlu0 %842  ;;  %4782 = vmatprep.subr.bf16.mxu0 %v5198_v30 }
  0xb9   : > { %v6158_v57 = vmul.f32 %v853_v23, %v632_v12  ;;  %v6160_v6 = vmul.f32 %v843_v33, %v630_v5  ;;  %4727 = vmatmul.mubr.bf16.gmra.mxu1 %v1014_v28  ;;  %v6163_v0 = vsel %vm1294_vm14, %v1316_v45, %v1317_v25  ;;  %v433_v12 = vmul.f32 %v6176_v44, %v375_v53  ;;  %v5204_v28 = vld [vmem:[%s7144_s6 + $0x110] sm:$0xff]   ;;  %v7172_v23 = vld [vmem:[#allocation8_spill] sm:$0xff] }
  0xba   : > { %4763 = vmatpush3.bf16.msra.mxu1 %v5197_v56  ;;  %v1330_v17 = vpack.c.bf16 %v6163_v0, %v6125_v27  ;;  %v437_v56 = vmul.f32 %v6176_v44, %v379_v9  ;;  %v647_v5 = vsel %vm545_vm11, %v5850_v10, %v5868_v31  ;;  %v7171_v9 = vld [vmem:[#allocation10_spill] sm:$0xff]  ;;  %v496_v45 = vadd.f32 %v6151_v41, %v438_v2  ;;  %v381_v53 = vld [vmem:[%s5580_s16 + $0x1f0] sm:$0xff] }
  0xbb   : > { %v1469_v15 = vpack.c.bf16 %v6158_v57, %v6160_v6  ;;  %4783 = vmatpush3.bf16.msra.mxu0 %v5198_v30  ;;  %4764 = vmatprep.subr.bf16.mxu1 %v5199_v62  ;;  %v431_v30 = vmul.f32 %v6176_v44, %v373_v59  ;;  %v646_v25 = vsel %vm544_vm12, %v5865_v61, %v7171_v9  ;;  %v7173_v31 = vld [vmem:[#allocation9_spill] sm:$0xff] }
  0xbc   : > { %v873_v63 = vpop.permute.xlu1 %872  ;;  %v863_v58 = vpop.permute.xlu0 %862  ;;  %4751 = vmatmul.mubr.bf16.gmra.mxu0 %v1330_v17  ;;  %4784 = vmatprep.subr.bf16.mxu0 %v5200_v19  ;;  %v636_v10 = vsel %vm534_vm13, %v7168_v21, %v7172_v23  ;;  %v634_v61 = vsel %vm532_vm15, %v5842_v54, %v7173_v31  ;;  %vm547_vm1 = vcmp.gt.f32.partialorder %v496_v45, 0.0  ;;  %v598_v21 = vmul.f32 0.1, %v496_v45 }
  0xbd   : > { %4770 = vmatprep.mubr.bf16.mxu1 %v1469_v15  ;;  %v489_v15 = vadd.f32 %v6151_v41, %v431_v30  ;;  %v439_v54 = vmul.f32 %v6176_v44, %v381_v53  ;;  %v6217_v9 = vmul.f32 %v873_v63, %v636_v10  ;;  %v6219_v23 = vmul.f32 %v863_v58, %v634_v61  ;;  %v383_v30 = vld [vmem:[%s5580_s16 + $0x210] sm:$0xff]  ;;  %v364_v53 = vld [vmem:[%s5580_s16 + $0x138] sm:$0x1] }
  0xbe   : > { %4765 = vmatpush3.bf16.msra.mxu1 %v5199_v62  ;;  %v495_v62 = vadd.f32 %v6151_v41, %v437_v56  ;;  %v440_v56 = vmul.f32 %v6176_v44, %v382_v51  ;;  %v384_v51 = vld [vmem:[%s5580_s16 + $0x220] sm:$0xff]  ;;  %v640_v63 = vsel %vm538_vm0, %v5873_v48, %v5897_v26  ;;  %v638_v10 = vsel %vm536_vm2, %v6154_v13, %v587_v3  ;;  %v5207_v13 = vld [vmem:[%s7144_s6 + $0x170] sm:$0xff]  }
  0xbf   : > { %4785 = vmatpush3.bf16.msra.mxu0 %v5200_v19  ;;  %4766 = vmatprep.subr.bf16.mxu1 %v5201_v20  ;;  %v491_v19 = vadd.f32 %v6151_v41, %v433_v12  ;;  %v591_v61 = vmul.f32 0.1, %v489_v15  ;;  %vm540_vm5 = vcmp.gt.f32.partialorder %v489_v15, 0.0  ;;  %v497_v48 = vadd.f32 %v6151_v41, %v439_v54 }
  0xc0   : > { %v928_v33 = vpop.permute.xlu1 %927  ;;  %v923_v59 = vpop.permute.xlu0 %922  ;;  %4786 = vmatprep.subr.bf16.mxu0 %v5202_v34  ;;  %vm546_vm3 = vcmp.gt.f32.partialorder %v495_v62, 0.0  ;;  %v442_v26 = vmul.f32 %v6176_v44, %v384_v51  ;;  %v422_v3 = vmul.f32 %v6176_v44, %v364_v53  ;;  %v366_v53 = vld [vmem:[%s5580_s16 + $0x148] sm:$0x1] }
  0xc1   : > { %v1004_v17 = vmul.f32 %v928_v33, %v647_v5  ;;  %v1003_v2 = vmul.f32 %v923_v59, %v646_v25  ;;  %v597_v5 = vmul.f32 0.1, %v495_v62  ;;  %v593_v58 = vmul.f32 0.1, %v491_v19  ;;  %v362_v59 = vld [vmem:[%s5580_s16 + $0x128] sm:$0x1] }
  0xc2   : > { %4767 = vmatpush3.bf16.msra.mxu1 %v5201_v20  ;;  %v5205_v20 = vld [vmem:[%s7144_s6 + $0x178] sm:$0xff]   ;;  %vm542_vm4 = vcmp.gt.f32.partialorder %v491_v19, 0.0  ;;  %v498_v33 = vadd.f32 %v6151_v41, %v440_v56  ;;  %v420_v29 = vmul.f32 %v6176_v44, %v362_v59  ;;  %vm548_vm7 = vcmp.gt.f32.partialorder %v497_v48, 0.0 }
  0xc3   : > { %v6221_v12 = vpack.c.bf16 %v1004_v17, %v1003_v2  ;;  %4787 = vmatpush3.bf16.msra.mxu0 %v5202_v34  ;;  %4768 = vmatprep.subr.bf16.mxu1 %v5203_v35  ;;  %v5206_v34 = vld [vmem:[%s7144_s6 + $0x108] sm:$0xff]   ;;  %v441_v17 = vmul.f32 %v6176_v44, %v383_v30  ;;  %v1470_v2 = vpack.c.bf16 %v6217_v9, %v6219_v23 }
  0xc4   : > { %v938_v25 = vpop.permute.xlu1 %937  ;;  %v933_v31 = vpop.permute.xlu0 %932  ;;  %4788 = vmatprep.subr.bf16.mxu0 %v5204_v28  ;;  %v648_v56 = vsel %vm546_vm3, %v495_v62, %v597_v5  ;;  %v644_v30 = vsel %vm542_vm4, %v491_v19, %v593_v58  ;;  %v600_v62 = vmul.f32 0.1, %v498_v33  ;;  %vm549_vm6 = vcmp.gt.f32.partialorder %v498_v33, 0.0 }
  0xc5   : > { %7174 = vst [vmem:[#allocation3_spill] sm:$0xff] %v6221_v12  ;;  %4794 = vmatprep.mubr.bf16.mxu0 %v6221_v12  ;;  %v599_v5 = vmul.f32 0.1, %v497_v48  ;;  %v500_v19 = vadd.f32 %v6151_v41, %v442_v26  ;;  %v499_v58 = vadd.f32 %v6151_v41, %v441_v17  ;;  %v5210_v17 = vld [vmem:[%s7144_s6 + $0x1b8] sm:$0xff]  }
  0xc6   : > { %4769 = vmatpush3.bf16.msra.mxu1 %v5203_v35  ;;  %v649_v35 = vsel %vm547_vm1, %v496_v45, %v598_v21  ;;  %v642_v45 = vsel %vm540_vm5, %v489_v15, %v591_v61  ;;  %v368_v21 = vld [vmem:[%s5580_s16 + $0x158] sm:$0x1]  ;;  %v5209_v15 = vld [vmem:[%s7144_s6 + $0x168] sm:$0xff]  }
  0xc7   : > { %4789 = vmatpush3.bf16.msra.mxu0 %v5204_v28  ;;  %4802 = vmatprep.subr.bf16.mxu1 %v5205_v20  ;;  %v5208_v28 = vld [vmem:[%s7144_s6 + $0x100] sm:$0xff]   ;;  %vm551_vm8 = vcmp.gt.f32.partialorder %v500_v19, 0.0  ;;  %v601_v24 = vmul.f32 0.1, %v499_v58  ;;  %vm550_vm9 = vcmp.gt.f32.partialorder %v499_v58, 0.0 }
  0xc8   : > { %v893_v54 = vpop.permute.xlu1 %892  ;;  %v883_v51 = vpop.permute.xlu0 %882  ;;  %4790 = vmatprep.subr.bf16.mxu0 %v5206_v34 }
  0xc9   : > { %v6258_v52 = vmul.f32 %v893_v54, %v640_v63  ;;  %v6260_v39 = vmul.f32 %v883_v51, %v638_v10  ;;  %4771 = vmatmul.mubr.bf16.vlgmr.msra.gmra.mxu1 %v1470_v2  ;;  %v1006_v63 = vmul.f32 %v938_v25, %v649_v35  ;;  %v1005_v10 = vmul.f32 %v933_v31, %v648_v56 }
  0xca   : > { %4803 = vmatpush3.bf16.msra.mxu1 %v5205_v20  ;;  %v480_v20 = vadd.f32 %v6151_v41, %v422_v3  ;;  %v426_v2 = vmul.f32 %v6176_v44, %v368_v21  ;;  %v651_v25 = vsel %vm549_vm6, %v498_v33, %v600_v62  ;;  %v424_v31 = vmul.f32 %v6176_v44, %v366_v53  ;;  %v372_v3 = vld [vmem:[%s5580_s16 + $0x178] sm:$0x1]  ;;  %v5212_v21 = vld [vmem:[%s7144_s6 + $0x1b0] sm:$0xff]  }
  0xcb   : > { %v1471_v59 = vpack.c.bf16 %v6258_v52, %v6260_v39  ;;  %4791 = vmatpush3.bf16.msra.mxu0 %v5206_v34  ;;  %4804 = vmatprep.subr.bf16.mxu1 %v5207_v13  ;;  %v478_v34 = vadd.f32 %v6151_v41, %v420_v29  ;;  %v650_v35 = vsel %vm548_vm7, %v497_v48, %v599_v5  ;;  %v602_v56 = vmul.f32 0.1, %v500_v19  ;;  %v5211_v29 = vld [vmem:[%s7144_s6 + $0x160] sm:$0xff]  }
  0xcc   : > { %v913_v61 = vpop.permute.xlu1 %912  ;;  %v903_v26 = vpop.permute.xlu0 %902  ;;  %4792 = vmatprep.subr.bf16.mxu0 %v5208_v28  ;;  %vm531_vm10 = vcmp.gt.f32.partialorder %v480_v20, 0.0  ;;  %v582_v33 = vmul.f32 0.1, %v480_v20  ;;  %v6292_v62 = vpack.c.bf16 %v1006_v63, %v1005_v10  ;;  %v484_v53 = vadd.f32 %v6151_v41, %v426_v2 }
  0xcd   : > { %v6278_v54 = vmul.f32 %v913_v61, %v644_v30  ;;  %v6280_v51 = vmul.f32 %v903_v26, %v642_v45  ;;  %4774 = vmatprep.mubr.bf16.mxu1 %v1471_v59  ;;  %v370_v45 = vld [vmem:[%s5580_s16 + $0x168] sm:$0x1]  ;;  %v580_v5 = vmul.f32 0.1, %v478_v34  ;;  %vm529_vm11 = vcmp.gt.f32.partialorder %v478_v34, 0.0 }
  0xce   : > { %4805 = vmatpush3.bf16.msra.mxu1 %v5207_v13  ;;  %7175 = vst [vmem:[#allocation4_spill] sm:$0xff] %v6292_v62  ;;  %v482_v63 = vadd.f32 %v6151_v41, %v424_v31  ;;  %v653_v10 = vsel %vm551_vm8, %v500_v19, %v602_v56  ;;  %v652_v26 = vsel %vm550_vm9, %v499_v58, %v601_v24  ;;  %v5214_v24 = vld [vmem:[%s7144_s6 + $0x1a8] sm:$0xff]   ;;  %v586_v58 = vmul.f32 0.1, %v484_v53 }
  0xcf   : > { %v1472_v30 = vpack.c.bf16 %v6278_v54, %v6280_v51  ;;  %4793 = vmatpush3.bf16.msra.mxu0 %v5208_v28  ;;  %4806 = vmatprep.subr.bf16.mxu1 %v5209_v15  ;;  %v430_v28 = vmul.f32 %v6176_v44, %v372_v3  ;;  %v428_v11 = vmul.f32 %v6176_v44, %v370_v45  ;;  %v376_v3 = vld [vmem:[%s5580_s16 + $0x198] sm:$0x1]  ;;  %vm535_vm12 = vcmp.gt.f32.partialorder %v484_v53, 0.0 }
  0xd0   : > { %v948_v13 = vpop.permute.xlu1 %947  ;;  %v943_v48 = vpop.permute.xlu0 %942  ;;  %4826 = vmatprep.subr.bf16.mxu0 %v5210_v17  ;;  %v631_v19 = vsel %vm529_vm11, %v478_v34, %v580_v5  ;;  %vm533_vm13 = vcmp.gt.f32.partialorder %v482_v63, 0.0 }
  0xd1   : > { %v1008_v59 = vmul.f32 %v948_v13, %v651_v25  ;;  %v1007_v61 = vmul.f32 %v943_v48, %v650_v35  ;;  %4775 = vmatmul.mubr.bf16.gmra.mxu1 %v1472_v30  ;;  %v5213_v25 = vld [vmem:[%s7144_s6 + $0x158] sm:$0xff]   ;;  %v374_v35 = vld [vmem:[%s5580_s16 + $0x188] sm:$0x1]  ;;  %v584_v13 = vmul.f32 0.1, %v482_v63  ;;  %v486_v48 = vadd.f32 %v6151_v41, %v428_v11  ;;  %v5216_v11 = vld [vmem:[%s7144_s6 + $0x1a0] sm:$0xff]  }
  0xd2   : > { %4795 = vmatmul.mubr.bf16.vlgmr.msra.gmra.mxu0 %v6292_v62  ;;  %4807 = vmatpush3.bf16.msra.mxu1 %v5209_v15  ;;  %v633_v15 = vsel %vm531_vm10, %v480_v20, %v582_v33  ;;  %v434_v20 = vmul.f32 %v6176_v44, %v376_v3  ;;  %v432_v34 = vmul.f32 %v6176_v44, %v374_v35 }
  0xd3   : > { %v6304_v2 = vpack.c.bf16 %v1008_v59, %v1007_v61  ;;  %4827 = vmatpush3.bf16.msra.mxu0 %v5210_v17  ;;  %4808 = vmatprep.subr.bf16.mxu1 %v5211_v29  ;;  %v488_v17 = vadd.f32 %v6151_v41, %v430_v28  ;;  %v637_v59 = vsel %vm535_vm12, %v484_v53, %v586_v58  ;;  %v5215_v61 = vld [vmem:[%s7144_s6 + $0x150] sm:$0xff]   ;;  %vm537_vm0 = vcmp.gt.f32.partialorder %v486_v48, 0.0 }
  0xd4   : > { %v958_v31 = vpop.permute.xlu1 %957  ;;  %v953_v30 = vpop.permute.xlu0 %952  ;;  %4828 = vmatprep.subr.bf16.mxu0 %v5212_v21  ;;  %v635_v3 = vsel %vm533_vm13, %v482_v63, %v584_v13  ;;  %v588_v53 = vmul.f32 0.1, %v486_v48  ;;  %v492_v35 = vadd.f32 %v6151_v41, %v434_v20  ;;  %v1769_v58 = vrot.slane %v6160_v6, 1 }
  0xd5   : > { %7176 = vst [vmem:[#allocation5_spill] sm:$0xff] %v6304_v2  ;;  %v1010_v56 = vmul.f32 %v958_v31, %v653_v10  ;;  %v1009_v45 = vmul.f32 %v953_v30, %v652_v26  ;;  %4798 = vmatprep.mubr.bf16.mxu0 %v6304_v2  ;;  %vm539_vm15 = vcmp.gt.f32.partialorder %v488_v17, 0.0  ;;  %v490_v31 = vadd.f32 %v6151_v41, %v432_v34 }
  0xd6   : > { %4809 = vmatpush3.bf16.msra.mxu1 %v5211_v29  ;;  %v590_v29 = vmul.f32 0.1, %v488_v17  ;;  %v1772_v30 = vrot.slane %v6158_v57, 1  ;;  %v5218_v57 = vld [vmem:[%s7144_s6 + $0x198] sm:$0xff]   ;;  %v639_v13 = vsel %vm537_vm0, %v486_v48, %v588_v53  ;;  %v594_v34 = vmul.f32 0.1, %v492_v35 }
  0xd7   : > { %v6321_v33 = vpack.c.bf16 %v1010_v56, %v1009_v45  ;;  %4829 = vmatpush3.bf16.msra.mxu0 %v5212_v21  ;;  %4810 = vmatprep.subr.bf16.mxu1 %v5213_v25  ;;  %v1943_v21 = vpack.c.bf16 %v5996_v36, %v5979_v8  ;;  %v5217_v8 = vld [vmem:[%s7144_s6 + $0x148] sm:$0xff]   ;;  %vm543_vm1 = vcmp.gt.f32.partialorder %v492_v35, 0.0  ;;  %vm541_vm2 = vcmp.gt.f32.partialorder %v490_v31, 0.0  ;;  %v5220_v48 = vld [vmem:[%s7144_s6 + $0x190] sm:$0xff]  }
  0xd8   : > { %v858_v5 = vpop.permute.xlu1 %857  ;;  %v848_v28 = vpop.permute.xlu0 %847  ;;  %4830 = vmatprep.subr.bf16.mxu0 %v5214_v24  ;;  %v645_v53 = vsel %vm543_vm1, %v492_v35, %v594_v34  ;;  %v5224_v34 = vld [vmem:[%s7144_s6 + $0x180] sm:$0xff]  }
  0xd9   : > { %7177 = vst [vmem:[#allocation6_spill] sm:$0xff] %v6321_v33  ;;  %v990_v10 = vmul.f32 %v858_v5, %v633_v15  ;;  %v988_v26 = vmul.f32 %v848_v28, %v631_v19  ;;  %v592_v5 = vmul.f32 0.1, %v490_v31 }
  0xda   : > { %4799 = vmatmul.mubr.bf16.gmra.mxu0 %v6321_v33  ;;  %4811 = vmatpush3.bf16.msra.mxu1 %v5213_v25  ;;  %v641_v25 = vsel %vm539_vm15, %v488_v17, %v590_v29  ;;  %v5219_v17 = vld [vmem:[%s7144_s6 + $0x140] sm:$0xff]   ;;  %vm2793_vm15 = vcmask 1045504  }
  0xdb   : > { %v1773_v15 = vrot.slane %v990_v10, 1  ;;  %v1770_v19 = vrot.slane %v988_v26, 1  ;;  %4831 = vmatpush3.bf16.msra.mxu0 %v5214_v24  ;;  %4842 = vmatprep.mubr.bf16.mxu0 %v1943_v21  ;;  %v1778_v21 = vrot.slane %v6217_v9, 1 }
  0xdc   : > { %v878_v36 = vpop.permute.xlu1 %877  ;;  %v868_v63 = vpop.permute.xlu0 %867  ;;  %4812 = vmatprep.subr.bf16.mxu1 %v5215_v61  ;;  %4832 = vmatprep.subr.bf16.mxu0 %v5216_v11 }
  0xdd   : > { %v994_v56 = vmul.f32 %v878_v36, %v637_v59  ;;  %v992_v6 = vmul.f32 %v868_v63, %v635_v3  ;;  %v1771_v45 = vsel %vm1294_vm14, %v1769_v58, %v1770_v19  ;;  %v1774_v24 = vsel %vm1294_vm14, %v1772_v30, %v1773_v15  ;;  %v5221_v63 = vld [vmem:[%s7144_s6 + $0x1f8] sm:$0xff]  }
  0xde   : > { %4813 = vmatpush3.bf16.msra.mxu1 %v5215_v61  ;;  %v1801_v20 = vpack.c.bf16 %v1774_v24, %v1771_v45  ;;  %v1775_v3 = vrot.slane %v6219_v23, 1  ;;  %v643_v30 = vsel %vm541_vm2, %v490_v31, %v592_v5  ;;  %v1784_v58 = vrot.slane %v6258_v52, 1  ;;  %v5223_v24 = vld [vmem:[%s7144_s6 + $0x1f0] sm:$0xff]  }
  0xdf   : > { %4833 = vmatpush3.bf16.msra.mxu0 %v5216_v11  ;;  %4814 = vmatprep.subr.bf16.mxu1 %v5217_v8  ;;  %v1779_v28 = vrot.slane %v994_v56, 1  ;;  %v1776_v59 = vrot.slane %v992_v6, 1  ;;  %v350_v11 = vld [vmem:[%s5580_s16 + $0x80] sm:$0xff]  ;;  %v1781_v15 = vrot.slane %v6260_v39, 1  ;;  %v5222_v39 = vld [vmem:[%s7144_s6 + $0x188] sm:$0xff]  }
  0xe0   : > { %v898_v29 = vpop.permute.xlu1 %897  ;;  %v888_v10 = vpop.permute.xlu0 %887  ;;  %4818 = vmatprep.mubr.bf16.mxu1 %v1801_v20  ;;  %4834 = vmatprep.subr.bf16.mxu0 %v5218_v57  ;;  %v408_v31 = vmul.f32 %v6176_v44, %v350_v11 }
  0xe1   : > { %v998_v61 = vmul.f32 %v898_v29, %v641_v25  ;;  %v996_v26 = vmul.f32 %v888_v10, %v639_v13  ;;  %v1780_v9 = vsel %vm1294_vm14, %v1778_v21, %v1779_v28  ;;  %v1777_v23 = vsel %vm1294_vm14, %v1775_v3, %v1776_v59  ;;  %v5225_v59 = vld [vmem:[%s7144_s6 + $0x1e8] sm:$0xff]   ;;  %v5228_v3 = vld [vmem:[%s7144_s6 + $0x230] sm:$0xff]  }
  0xe2   : > { %4815 = vmatpush3.bf16.msra.mxu1 %v5217_v8  ;;  %v1802_v45 = vpack.c.bf16 %v1780_v9, %v1777_v23  ;;  %v466_v5 = vadd.f32 %v6151_v41, %v408_v31  ;;  %v1787_v28 = vrot.slane %v6280_v51, 1  ;;  %v1945_v21 = vpack.c.bf16 %v6095_v55, %v6068_v40  ;;  %v5233_v55 = vld [vmem:[%s7144_s6 + $0x1c8] sm:$0xff]  }
  0xe3   : > { %v1785_v19 = vrot.slane %v998_v61, 1  ;;  %v1782_v36 = vrot.slane %v996_v26, 1  ;;  %4835 = vmatpush3.bf16.msra.mxu0 %v5218_v57  ;;  %4816 = vmatprep.subr.bf16.mxu1 %v5219_v17  ;;  %v5227_v61 = vld [vmem:[%s7144_s6 + $0x1e0] sm:$0xff]   ;;  %v7180_v31 = vpack.c.bf16 %v5947_v4, %v5923_v32  ;;  %v7182_v32 = vpack.c.bf16 %v6125_v27, %v6098_v37  ;;  %v5242_v37 = vld [vmem:[%s7145_s7 + $0x70] sm:$0xff]   ;;  %v5243_v27 = vld [vmem:[%s7145_s7 + $0x28] sm:$0xff]  }
  0xe4   : > { %v918_v8 = vpop.permute.xlu1 %917  ;;  %v908_v35 = vpop.permute.xlu0 %907  ;;  %4836 = vmatprep.subr.bf16.mxu0 %v5220_v48  ;;  %vm517_vm3 = vcmp.gt.f32.partialorder %v466_v5, 0.0 }
  0xe5   : > { %v1002_v52 = vmul.f32 %v918_v8, %v645_v53  ;;  %v1000_v25 = vmul.f32 %v908_v35, %v643_v30  ;;  %v1783_v57 = vsel %vm1294_vm14, %v1781_v15, %v1782_v36  ;;  %v1786_v56 = vsel %vm1294_vm14, %v1784_v58, %v1785_v19  ;;  %v5229_v53 = vld [vmem:[%s7144_s6 + $0x1d8] sm:$0xff]   ;;  %v351_v30 = vld [vmem:[%s5580_s16 + $0x88] sm:$0x1]  ;;  %v5236_v19 = vld [vmem:[%s7144_s6 + $0x210] sm:$0xff]  }
  0xe6   : > { %4817 = vmatpush3.bf16.msra.mxu1 %v5219_v17  ;;  %v1803_v6 = vpack.c.bf16 %v1786_v56, %v1783_v57  ;;  %v1790_v17 = vrot.slane %v6278_v54, 1  ;;  %v568_v54 = vmul.f32 0.1, %v466_v5  ;;  %v5234_v58 = vld [vmem:[%s7144_s6 + $0x218] sm:$0xff]   ;;  %v409_v15 = vmul.f32 %v6176_v44, %v351_v30 }
  0xe7   : > { %4837 = vmatpush3.bf16.msra.mxu0 %v5220_v48  ;;  %4850 = vmatprep.subr.bf16.mxu1 %v5221_v63  ;;  %v1791_v13 = vrot.slane %v1002_v52, 1  ;;  %v1788_v20 = vrot.slane %v1000_v25, 1  ;;  %v5226_v48 = vld [vmem:[%s7144_s6 + $0x238] sm:$0xff]   ;;  %v7179_v35 = vpack.c.bf16 %v5925_v38, %v5901_v60 }
  0xe8   : > { %4838 = vmatprep.subr.bf16.mxu0 %v5222_v39  ;;  %v788_v26 = vpop.permute.xlu0 %787  ;;  %v619_v11 = vsel %vm517_vm3, %v466_v5, %v568_v54  ;;  %v467_v36 = vadd.f32 %v6151_v41, %v409_v15  ;;  %v5252_v54 = vld [vmem:[%s7145_s7 + $0x48] sm:$0xff]  }
  0xe9   : > { %4819 = vmatmul.mubr.bf16.vlgmr.msra.gmra.mxu1 %v1802_v45  ;;  %v1789_v29 = vsel %vm1294_vm14, %v1787_v28, %v1788_v20  ;;  %v1792_v10 = vsel %vm1294_vm14, %v1790_v17, %v1791_v13  ;;  %v6405_v40 = vmul.f32 %v788_v26, %v619_v11  ;;  %v5246_v13 = vld [vmem:[%s7145_s7 + $0x60] sm:$0xff]   ;;  %v5247_v20 = vld [vmem:[%s7145_s7 + $0x18] sm:$0xff]   ;;  %v5249_v28 = vld [vmem:[%s7145_s7 + $0x10] sm:$0xff]  }
  0xea   : > { %4822 = vmatprep.mubr.bf16.mxu1 %v1803_v6  ;;  %4851 = vmatpush3.bf16.msra.mxu1 %v5221_v63  ;;  %v1804_v51 = vpack.c.bf16 %v1792_v10, %v1789_v29  ;;  %v569_v9 = vmul.f32 0.1, %v467_v36  ;;  %vm518_vm5 = vcmp.gt.f32.partialorder %v467_v36, 0.0  ;;  %v7181_v6 = vpack.c.bf16 %v6071_v7, %v6066_v43  ;;  %v5240_v43 = vld [vmem:[%s7145_s7 + $0x78] sm:$0xff]   ;;  %v5241_v7 = vld [vmem:[%s7145_s7 + $0x30] sm:$0xff]   ;;  %v5251_v10 = vld [vmem:[%s7145_s7 + $0x8] sm:$0xff]  }
  0xeb   : > { %4839 = vmatpush3.bf16.msra.mxu0 %v5222_v39  ;;  %4852 = vmatprep.subr.bf16.mxu1 %v5223_v24  ;;  %v1946_v18 = vpack.c.bf16 %v6405_v40, %v6120_v1  ;;  %v793_v39 = vpop.permute.xlu1 %792  ;;  %v2229_v38 = vrot.slane %v6405_v40, 1  ;;  %v5248_v17 = vld [vmem:[%s7145_s7 + $0x58] sm:$0xff]   ;;  %v5250_v29 = vld [vmem:[%s7145_s7 + $0x50] sm:$0xff]   ;;  %v5254_v26 = vld [vmem:[%s7145_s7 + $0x40] sm:$0xff]  }
  0xec   : > { %4840 = vmatprep.subr.bf16.mxu0 %v5224_v34  ;;  %v838_v23 = vpop.permute.xlu0 %837  ;;  %v620_v52 = vsel %vm518_vm5, %v467_v36, %v569_v9  ;;  %v6539_v11 = vld [vmem:[%s7145_s7 + $0xf8] sm:$0xff]  }
  0xed   : > { %v977_v57 = vmul.f32 %v793_v39, %v620_v52  ;;  %7183 = vst [vmem:[#allocation7_spill] sm:$0xff] %v6539_v11 }
  0xee   : > { %4853 = vmatpush3.bf16.msra.mxu1 %v5223_v24  ;;  %v5245_v24 = vld [vmem:[%s7145_s7 + $0x20] sm:$0xff]  }
  0xef   : > { %4841 = vmatpush3.bf16.msra.mxu0 %v5224_v34  ;;  %4854 = vmatprep.subr.bf16.mxu1 %v5225_v59  ;;  %v2230_v60 = vrot.slane %v977_v57, 1  ;;  %v7150_v34 = vmov 0.0  }
  0xf0   : > { %4874 = vmatprep.subr.bf16.mxu0 %v5226_v48  ;;  %2435 = vst [vmem:[#allocation2 + $0x30] sm:$0xff] %v7150_v34  ;;  %2436 = vst [vmem:[#allocation2 + $0x38] sm:$0x3] %v7150_v34 }
  0xf1   : > { %4823 = vmatmul.mubr.bf16.gmra.mxu1 %v1804_v51  ;;  %v2231_v4 = vsel %vm1294_vm14, %v2229_v38, %v2230_v60  ;;  %2429 = vst [vmem:[#allocation2] sm:$0xff] %v7150_v34  ;;  %2430 = vst [vmem:[#allocation2 + $0x8] sm:$0x3] %v7150_v34  ;;  %v5253_v51 = vld [vmem:[%s7145_s7] sm:$0xff]  }
  0xf2   : > { %4843 = vmatmul.mubr.bf16.vlgmr.msra.gmra.mxu0 %v1944_v46  ;;  %4855 = vmatpush3.bf16.msra.mxu1 %v5225_v59  ;;  %v7178_v46 = vpack.c.bf16 %v6018_v16, %v6000_v22  ;;  %v5235_v22 = vld [vmem:[%s7144_s6 + $0x1c0] sm:$0xff]   ;;  %v2236_v45 = vpack.c.bf16 %v2231_v4, %v6163_v0  ;;  %v5244_v0 = vld [vmem:[%s7145_s7 + $0x68] sm:$0xff]   ;;  %2431 = vst [vmem:[#allocation2 + $0x10] sm:$0xff] %v7150_v34  ;;  %2432 = vst [vmem:[#allocation2 + $0x18] sm:$0x3] %v7150_v34 }
  0xf3   : > { %4866 = vmatprep.mubr.bf16.mxu1 %v2085_v47  ;;  %4846 = vmatprep.mubr.bf16.mxu0 %v1945_v21  ;;  %v360_v47 = vld [vmem:[%s5580_s16 + $0x110] sm:$0xff]  ;;  %2433 = vst [vmem:[#allocation2 + $0x20] sm:$0xff] %v7150_v34  ;;  %2434 = vst [vmem:[#allocation2 + $0x28] sm:$0x3] %v7150_v34 }
  0xf4   : > { %4875 = vmatpush3.bf16.msra.mxu0 %v5226_v48  ;;  %4856 = vmatprep.subr.bf16.mxu1 %v5227_v61  ;;  %v418_v1 = vmul.f32 %v6176_v44, %v360_v47  ;;  %v5237_v44 = vld [vmem:[%s7144_s6 + $0x208] sm:$0xff]   ;;  %2437 = vst [vmem:[#allocation2 + $0x40] sm:$0xff] %v7150_v34  ;;  %2438 = vst [vmem:[#allocation2 + $0x48] sm:$0x3] %v7150_v34 }
  0xf5   : > { %4876 = vmatprep.subr.bf16.mxu0 %v5228_v3  ;;  %2439 = vst [vmem:[#allocation2 + $0x50] sm:$0xff] %v7150_v34  ;;  %2440 = vst [vmem:[#allocation2 + $0x58] sm:$0x3] %v7150_v34 }
  0xf6   : > { %4857 = vmatpush3.bf16.msra.mxu1 %v5227_v61  ;;  %v476_v16 = vadd.f32 %v6151_v41, %v418_v1  ;;  %v5238_v41 = vld [vmem:[%s7144_s6 + $0x200] sm:$0xff]   ;;  %2441 = vst [vmem:[#allocation2 + $0x60] sm:$0xff] %v7150_v34  ;;  %2442 = vst [vmem:[#allocation2 + $0x68] sm:$0x3] %v7150_v34 }
  0xf7   : > { %4858 = vmatprep.subr.bf16.mxu1 %v5229_v53  ;;  %2443 = vst [vmem:[#allocation2 + $0x70] sm:$0xff] %v7150_v34  ;;  %2444 = vst [vmem:[#allocation2 + $0x78] sm:$0x3] %v7150_v34 }
  0xf8   : > { %4877 = vmatpush3.bf16.msra.mxu0 %v5228_v3  ;;  %v578_v63 = vmul.f32 0.1, %v476_v16  ;;  %vm527_vm4 = vcmp.gt.f32.partialorder %v476_v16, 0.0  ;;  %2445 = vst [vmem:[#allocation2 + $0x80] sm:$0xff] %v7150_v34  ;;  %2446 = vst [vmem:[#allocation2 + $0x88] sm:$0x3] %v7150_v34 }
  0xf9   : > { %4878 = vmatprep.subr.bf16.mxu0 %v5230_v42  ;;  %2448 = vst [vmem:[#allocation2 + $0x98] sm:$0x3] %v7150_v34  ;;  %v6547_v3 = vld [vmem:[%s7145_s7 + $0xb8] sm:$0xff]  }
  0xfa   : > { %4847 = vmatmul.mubr.bf16.gmra.mxu0 %v1946_v18  ;;  %4859 = vmatpush3.bf16.msra.mxu1 %v5229_v53  ;;  %v629_v8 = vsel %vm527_vm4, %v476_v16, %v578_v63  ;;  %7184 = vst [vmem:[#allocation10_spill] sm:$0xff] %v6547_v3 }
  0xfb   : > { %4890 = vmatprep.mubr.bf16.mxu0 %v7178_v46  ;;  %4860 = vmatprep.subr.bf16.mxu1 %v5231_v14  ;;  %v986_v25 = vmul.f32 %v838_v23, %v629_v8 }
  0xfc   : > { %4879 = vmatpush3.bf16.msra.mxu0 %v5230_v42 }
  0xfd   : > { %4880 = vmatprep.subr.bf16.mxu0 %v5232_v49  ;;  %v2088_v56 = vpack.c.bf16 %v986_v25, %v5945_v50  ;;  %v5239_v50 = vld [vmem:[%s7145_s7 + $0x38] sm:$0xff]  }
  0xfe   : > { %4861 = vmatpush3.bf16.msra.mxu1 %v5231_v14 }
  0xff   : > { %4862 = vmatprep.subr.bf16.mxu1 %v5233_v55 }
 0x100   : > { %4881 = vmatpush3.bf16.msra.mxu0 %v5232_v49 }
 0x101   : > { %4882 = vmatprep.subr.bf16.mxu0 %v5234_v58 }
 0x102   : > { %4863 = vmatpush3.bf16.msra.mxu1 %v5233_v55 }
 0x103   : > { %4864 = vmatprep.subr.bf16.mxu1 %v5235_v22 }
 0x104   : > { %4883 = vmatpush3.bf16.msra.mxu0 %v5234_v58 }
 0x105   : > { %4884 = vmatprep.subr.bf16.mxu0 %v5236_v19 }
 0x106   : > { %4865 = vmatpush3.bf16.msra.mxu1 %v5235_v22 }
 0x107   : > { %4898 = vmatprep.subr.bf16.mxu1 %v5240_v43 }
 0x108   : > { %4885 = vmatpush3.bf16.msra.mxu0 %v5236_v19 }
 0x109   : > { %4867 = vmatmul.mubr.bf16.vlgmr.msra.gmra.mxu1 %v7179_v35  ;;  %4886 = vmatprep.subr.bf16.mxu0 %v5237_v44 }
 0x10a   : > { %4870 = vmatprep.mubr.bf16.mxu1 %v7180_v31  ;;  %4899 = vmatpush3.bf16.msra.mxu1 %v5240_v43 }
 0x10b   : > { %4900 = vmatprep.subr.bf16.mxu1 %v5242_v37 }
 0x10c   : > { %4887 = vmatpush3.bf16.msra.mxu0 %v5237_v44 }
 0x10d   : > { %4888 = vmatprep.subr.bf16.mxu0 %v5238_v41 }
 0x10e   : > { %4901 = vmatpush3.bf16.msra.mxu1 %v5242_v37 }
 0x10f   : > { %4902 = vmatprep.subr.bf16.mxu1 %v5244_v0 }
 0x110   : > { %4889 = vmatpush3.bf16.msra.mxu0 %v5238_v41 }
 0x111   : > { %4871 = vmatmul.mubr.bf16.gmra.mxu1 %v2088_v56  ;;  %4922 = vmatprep.subr.bf16.mxu0 %v5239_v50 }
 0x112   : > { %4903 = vmatpush3.bf16.msra.mxu1 %v5244_v0 }
 0x113   : > { %4891 = vmatmul.mubr.bf16.vlgmr.msra.gmra.mxu0 %v7181_v6  ;;  %4904 = vmatprep.subr.bf16.mxu1 %v5246_v13 }
 0x114   : > { %4894 = vmatprep.mubr.bf16.mxu0 %v7182_v32  ;;  %4923 = vmatpush3.bf16.msra.mxu0 %v5239_v50 }
 0x115   : > { %4924 = vmatprep.subr.bf16.mxu0 %v5241_v7 }
 0x116   : > { %4905 = vmatpush3.bf16.msra.mxu1 %v5246_v13 }
 0x117   : > { %4906 = vmatprep.subr.bf16.mxu1 %v5248_v17 }
 0x118   : > { %4925 = vmatpush3.bf16.msra.mxu0 %v5241_v7 }
 0x119   : > { %4926 = vmatprep.subr.bf16.mxu0 %v5243_v27 }
 0x11a   : > { %4907 = vmatpush3.bf16.msra.mxu1 %v5248_v17 }
 0x11b   : > { %4895 = vmatmul.mubr.bf16.gmra.mxu0 %v2236_v45  ;;  %4908 = vmatprep.subr.bf16.mxu1 %v5250_v29 }
 0x11c   : > { %4927 = vmatpush3.bf16.msra.mxu0 %v5243_v27 }
 0x11d   : > { %4928 = vmatprep.subr.bf16.mxu0 %v5245_v24 }
 0x11e   : > { %4909 = vmatpush3.bf16.msra.mxu1 %v5250_v29 }
 0x11f   : > { %4910 = vmatprep.subr.bf16.mxu1 %v5252_v54 }
 0x120   : > { %4929 = vmatpush3.bf16.msra.mxu0 %v5245_v24 }
 0x121   : > { %4930 = vmatprep.subr.bf16.mxu0 %v5247_v20 }
 0x122   : > { %4911 = vmatpush3.bf16.msra.mxu1 %v5252_v54 }
 0x123   : > { %4912 = vmatprep.subr.bf16.mxu1 %v5254_v26 }
 0x124   : > { %4931 = vmatpush3.bf16.msra.mxu0 %v5247_v20 }
 0x125   : > { %4932 = vmatprep.subr.bf16.mxu0 %v5249_v28 }
 0x126   : > { %4913 = vmatpush3.bf16.msra.mxu1 %v5254_v26 }
 0x127   : > { %4946 = vmatprep.subr.bf16.mxu1 %v6547_v3 }
 0x128   : > { %4933 = vmatpush3.bf16.msra.mxu0 %v5249_v28 }
 0x129   : > { %4934 = vmatprep.subr.bf16.mxu0 %v5251_v10 }
 0x12c   : > { %4935 = vmatpush3.bf16.msra.mxu0 %v5251_v10 }
 0x12d   : > { %4936 = vmatprep.subr.bf16.mxu0 %v5253_v51 }
 0x130   : > { %4937 = vmatpush3.bf16.msra.mxu0 %v5253_v51 }
 0x131   : > { %4970 = vmatprep.subr.bf16.mxu0 %v6539_v11 }
 0x152   : > { %v6507_v5 = vpop.f32.mrf.mxu0 }
 0x154   : > { %v6515_v59 = vpop.f32.mrf.mxu0 }
 0x156   : > { %v6523_v48 = vpop.f32.mrf.mxu0 }
 0x158   : > { %v6531_v61 = vpop.f32.mrf.mxu0 }
 0x15a   : > { %v6541_v21 = vpop.f32.mrf.mxu0 }
 0x15c   : > { %v6549_v53 = vpop.f32.mrf.mxu0 }
 0x15e   : > { %v6552_v42 = vpop.f32.mrf.mxu0 }
 0x160   : > { %v6554_v18 = vpop.f32.mrf.mxu0 }
 0x169   : > { %v4724_v40 = vpop.f32.mrf.mxu1 }
 0x16a   : > { %v1256_v29 = vadd.f32 %v4724_v40, %v6507_v5 }
 0x16b   : > { %v1247_v14 = vpop.f32.mrf.mxu1 }
 0x16c   : > { %v1248_v54 = vadd.f32 %v1247_v14, %v6515_v59 }
 0x16d   : > { %v4725_v47 = vpop.f32.mrf.mxu1 }
 0x16e   : > { %v1259_v33 = vadd.f32 %v4725_v47, %v6523_v48 }
 0x16f   : > { %v1250_v46 = vpop.f32.mrf.mxu1 }
 0x172   : > { %v4748_v49 = vpop.f32.mrf.mxu0 }
 0x173   : > { %v1463_v51 = vadd.f32 %v4748_v49, %v1256_v29 }
 0x174   : > { %v1430_v55 = vpop.f32.mrf.mxu0 }
 0x175   : > { %v1461_v2 = vadd.f32 %v1430_v55, %v1248_v54 }
 0x176   : > { %v4749_v1 = vpop.f32.mrf.mxu0 }
 0x177   : > { %v1464_v3 = vadd.f32 %v4749_v1, %v1259_v33 }
 0x178   : > { %v1433_v15 = vpop.f32.mrf.mxu0 }
 0x179   : > { %v4728_v30 = vpop.f32.mrf.mxu1 }
 0x17a   : > { %v1272_v5 = vadd.f32 %v4728_v30, %v6541_v21 }
 0x17b   : > { %v1263_v58 = vpop.f32.mrf.mxu1 }
 0x17c   : > { %v4752_v16 = vpop.f32.mrf.mxu0  ;;  %v1264_v40 = vadd.f32 %v1263_v58, %v6549_v53 }
 0x17d   : > { %v4729_v22 = vpop.f32.mrf.mxu1  ;;  %v1467_v1 = vadd.f32 %v4752_v16, %v1272_v5 }
 0x17e   : > { %v1446_v36 = vpop.f32.mrf.mxu0  ;;  %v1275_v14 = vadd.f32 %v4729_v22, %v6552_v42 }
 0x17f   : > { %v1266_v19 = vpop.f32.mrf.mxu1 }
 0x180   : > { %v4753_v44 = vpop.f32.mrf.mxu0  ;;  %v1267_v47 = vadd.f32 %v1266_v19, %v6554_v18  ;;  %v6594_v18 = vld [vmem:[%s7142_s4] ss:$0 sm:$0xff] }
 0x181   : > { %v1468_v53 = vadd.f32 %v4753_v44, %v1275_v14 }
 0x182   : > { %v6556_v23 = vpop.f32.mrf.mxu0 }
 0x189   : > { %v4772_v63 = vpop.f32.mrf.mxu1 }
 0x18a   : > { %v1605_v62 = vadd.f32 %v4772_v63, %v1463_v51 }
 0x18b   : > { %v1572_v9 = vpop.f32.mrf.mxu1 }
 0x18c   : > { %v1603_v11 = vadd.f32 %v1572_v9, %v1461_v2 }
 0x18d   : > { %v4773_v8 = vpop.f32.mrf.mxu1 }
 0x18e   : > { %v1606_v49 = vadd.f32 %v4773_v8, %v1464_v3  ;;  %v1466_v3 = vadd.f32 %v6556_v23, %v1267_v47 }
 0x18f   : > { %v1575_v41 = vpop.f32.mrf.mxu1 }
 0x191   : > { %v4776_v39 = vpop.f32.mrf.mxu1 }
 0x192   : > { %v4796_v35 = vpop.f32.mrf.mxu0 }
 0x193   : > { %v1588_v25 = vpop.f32.mrf.mxu1 }
 0x194   : > { %v1714_v31 = vpop.f32.mrf.mxu0 }
 0x195   : > { %v4777_v56 = vpop.f32.mrf.mxu1  ;;  %v1745_v29 = vadd.f32 %v1714_v31, %v1603_v11  ;;  %v1609_v11 = vadd.f32 %v4776_v39, %v1467_v1 }
 0x196   : > { %v4797_v52 = vpop.f32.mrf.mxu0  ;;  %v1610_v16 = vadd.f32 %v4777_v56, %v1468_v53 }
 0x197   : > { %v6560_v38 = vpop.f32.mrf.mxu1  ;;  %v1748_v33 = vadd.f32 %v4797_v52, %v1606_v49 }
 0x198   : > { %v1717_v57 = vpop.f32.mrf.mxu0  ;;  %v1608_v44 = vadd.f32 %v6560_v38, %v1466_v3 }
 0x19a   : > { %v6558_v60 = vpop.f32.mrf.mxu0 }
 0x19c   : > { %v6562_v6 = vpop.f32.mrf.mxu0 }
 0x19e   : > { %v6564_v4 = vpop.f32.mrf.mxu0 }
 0x19f   : > { %v1752_v52 = vadd.f32 %v6564_v4, %v1610_v16 }
 0x1a0   : > { %v6566_v50 = vpop.f32.mrf.mxu0 }
 0x1a1   : > { %v1750_v56 = vadd.f32 %v6566_v50, %v1608_v44 }
 0x1a9   : > { %v4820_v32 = vpop.f32.mrf.mxu1 }
 0x1ab   : > { %v1904_v45 = vpop.f32.mrf.mxu1 }
 0x1ac   : > { %v1935_v2 = vadd.f32 %v1904_v45, %v1745_v29 }
 0x1ad   : > { %v4821_v43 = vpop.f32.mrf.mxu1 }
 0x1ae   : > { %v1938_v58 = vadd.f32 %v4821_v43, %v1748_v33 }
 0x1af   : > { %v1907_v37 = vpop.f32.mrf.mxu1 }
 0x1b1   : > { %v6568_v0 = vpop.f32.mrf.mxu1 }
 0x1b2   : > { %v4844_v7 = vpop.f32.mrf.mxu0 }
 0x1b3   : > { %v6570_v13 = vpop.f32.mrf.mxu1 }
 0x1b4   : > { %v2046_v27 = vpop.f32.mrf.mxu0 }
 0x1b5   : > { %v6574_v17 = vpop.f32.mrf.mxu1  ;;  %v2077_v63 = vadd.f32 %v2046_v27, %v1935_v2 }
 0x1b6   : > { %v4845_v24 = vpop.f32.mrf.mxu0  ;;  %7185 = vst [vmem:[#allocation8_spill] sm:$0xff] %v6574_v17  ;;  %v1747_v17 = vadd.f32 %v4796_v35, %v1605_v62  ;;  %v1751_v35 = vadd.f32 %v6558_v60, %v1609_v11 }
 0x1b7   : > { %v6579_v10 = vpop.f32.mrf.mxu1  ;;  %v2080_v19 = vadd.f32 %v4845_v24, %v1938_v58 }
 0x1b8   : > { %v6572_v20 = vpop.f32.mrf.mxu0  ;;  %7187 = vst [vmem:[#allocation11_spill] sm:$0xff] %v6579_v10  ;;  %v1941_v60 = vadd.f32 %v6568_v0, %v1751_v35  ;;  %v7193_v35 = vmov 0.0  }
 0x1ba   : > { %v6576_v28 = vpop.f32.mrf.mxu0 }
 0x1bb   : > { %7186 = vst [vmem:[#allocation9_spill] sm:$0xff] %v6576_v28  ;;  %v1251_v28 = vadd.f32 %v1250_v46, %v6531_v61  ;;  %v1465_v61 = vadd.f32 %v1446_v36, %v1264_v40 }
 0x1bc   : > { %v6582_v26 = vpop.f32.mrf.mxu0 }
 0x1bd   : > { %7188 = vst [vmem:[#allocation12_spill] sm:$0xff] %v6582_v26  ;;  %v1937_v26 = vadd.f32 %v4820_v32, %v1747_v17  ;;  %v1462_v48 = vadd.f32 %v1433_v15, %v1251_v28  ;;  %v1607_v42 = vadd.f32 %v1588_v25, %v1465_v61  ;;  %v7189_v45 = vld [vmem:[#allocation8_spill] sm:$0xff] }
 0x1be   : > { %v4849_v10 = vpop.f32.mrf.mxu0  ;;  %v1942_v43 = vadd.f32 %v7189_v45, %v1752_v52 }
 0x1bf   : > { %v2079_v62 = vadd.f32 %v4844_v7, %v1937_v26  ;;  %v1604_v46 = vadd.f32 %v1575_v41, %v1462_v48  ;;  %v6602_v41 = vld [vmem:[%s7143_s5] ss:$0 sm:$0xff] }
 0x1c0   : > { %v2065_v21 = vpop.f32.mrf.mxu0  ;;  %v7190_v27 = vld [vmem:[#allocation11_spill] sm:$0xff]  ;;  %v2084_v40 = vadd.f32 %v4849_v10, %v1942_v43 }
 0x1c1   : > { %v1746_v15 = vadd.f32 %v1717_v57, %v1604_v46  ;;  %v1940_v24 = vadd.f32 %v7190_v27, %v1750_v56 }
 0x1c2   : > { %v7191_v17 = vld [vmem:[#allocation9_spill] sm:$0xff] }
 0x1c3   : > { %v1936_v23 = vadd.f32 %v1907_v37, %v1746_v15  ;;  %v2083_v28 = vadd.f32 %v7191_v17, %v1941_v60  ;;  %v2082_v2 = vadd.f32 %v2065_v21, %v1940_v24  ;;  %v6623_v15 = vld [vmem:[#allocation2 + $0x8] sm:$0x3] }
 0x1c4   : > { %v7192_v54 = vld [vmem:[#allocation12_spill] sm:$0xff] }
 0x1c9   : > { %v4868_v34 = vpop.f32.mrf.mxu1 }
 0x1ca   : > { %v2221_v9 = vadd.f32 %v4868_v34, %v2079_v62  ;;  %v1749_v34 = vadd.f32 %v6562_v6, %v1607_v42  ;;  %v2078_v6 = vadd.f32 %v6572_v20, %v1936_v23 }
 0x1cb   : > { %v2188_v12 = vpop.f32.mrf.mxu1 }
 0x1cc   : > { %v2219_v36 = vadd.f32 %v2188_v12, %v2077_v63  ;;  %v1939_v38 = vadd.f32 %v6570_v13, %v1749_v34  ;;  %v6629_v34 = vrot.slane %v7193_v35, 1 }
 0x1cd   : > { %v4869_v59 = vpop.f32.mrf.mxu1 }
 0x1ce   : > { %v2222_v25 = vadd.f32 %v4869_v59, %v2080_v19  ;;  %v2081_v50 = vadd.f32 %v7192_v54, %v1939_v38 }
 0x1cf   : > { %v2191_v55 = vpop.f32.mrf.mxu1 }
 0x1d0   : > { %v2220_v51 = vadd.f32 %v2191_v55, %v2078_v6 }
 0x1d1   : > { %v4872_v30 = vpop.f32.mrf.mxu1 }
 0x1d2   : > { %v2225_v59 = vadd.f32 %v4872_v30, %v2083_v28 }
 0x1d3   : > { %v4892_v22 = vpop.f32.mrf.mxu0  ;;  %v2204_v31 = vpop.f32.mrf.mxu1 }
 0x1d4   : > { %v2369_v8 = vadd.f32 %v4892_v22, %v2221_v9  ;;  %v2223_v14 = vadd.f32 %v2204_v31, %v2081_v50 }
 0x1d5   : > { %v2336_v39 = vpop.f32.mrf.mxu0  ;;  %v4873_v0 = vpop.f32.mrf.mxu1 }
 0x1d6   : > { %v2384_v12 = vmul.f32 %v6594_v18, %v2369_v8  ;;  %v2367_v57 = vadd.f32 %v2336_v39, %v2219_v36  ;;  %v2226_v55 = vadd.f32 %v4873_v0, %v2084_v40  ;;  %v2515_v39 = vrot.slane %v6623_v15, 1 }
 0x1d7   : > { %v4893_v32 = vpop.f32.mrf.mxu0  ;;  %v2207_v62 = vpop.f32.mrf.mxu1 }
 0x1d8   : > { %v2399_v7 = vadd.f32 %v6602_v41, %v2384_v12  ;;  %v2382_v37 = vmul.f32 %v6594_v18, %v2367_v57  ;;  %v2370_v4 = vadd.f32 %v4893_v32, %v2222_v25  ;;  %v2224_v11 = vadd.f32 %v2207_v62, %v2082_v2 }
 0x1d9   : > { %v2339_v26 = vpop.f32.mrf.mxu0  ;;  %v2516_v43 = vsel %vm1294_vm14, %v6629_v34, %v2515_v39 }
 0x1da   : > { %vm2407_vm6 = vcmp.gt.f32.partialorder %v2399_v7, 0.0  ;;  %v2415_v13 = vmul.f32 0.1, %v2399_v7  ;;  %v2397_v20 = vadd.f32 %v6602_v41, %v2382_v37  ;;  %v2385_v5 = vmul.f32 %v6594_v18, %v2370_v4 }
 0x1db   : > { %v2368_v49 = vadd.f32 %v2339_v26, %v2220_v51  ;;  %v4896_v29 = vpop.f32.mrf.mxu0 }
 0x1dc   : > { %v2423_v48 = vsel %vm2407_vm6, %v2399_v7, %v2415_v13  ;;  %vm2405_vm7 = vcmp.gt.f32.partialorder %v2397_v20, 0.0  ;;  %v2413_v47 = vmul.f32 0.1, %v2397_v20  ;;  %v2400_v33 = vadd.f32 %v6602_v41, %v2385_v5 }
 0x1dd   : > { %2452 = vst [vmem:[#allocation2 + $0x31] sm:$0xff] %v2423_v48  ;;  %v2383_v1 = vmul.f32 %v6594_v18, %v2368_v49  ;;  %v2373_v61 = vadd.f32 %v4896_v29, %v2225_v59  ;;  %v2352_v46 = vpop.f32.mrf.mxu0  ;;  %v5257_v59 = vld [vmem:[%s7145_s7 + $0xf0] sm:$0xff]   ;;  %v2794_v48 = vrot.slane %v7193_v35, 2 }
 0x1de   : > { %v2421_v53 = vsel %vm2405_vm7, %v2397_v20, %v2413_v47  ;;  %vm2408_vm8 = vcmp.gt.f32.partialorder %v2400_v33, 0.0  ;;  %v2416_v10 = vmul.f32 0.1, %v2400_v33  ;;  %v2371_v30 = vadd.f32 %v2352_v46, %v2223_v14 }
 0x1df   : > { %2450 = vst [vmem:[#allocation2 + $0x11] sm:$0xff] %v2421_v53  ;;  %v2398_v58 = vadd.f32 %v6602_v41, %v2383_v1  ;;  %v2388_v63 = vmul.f32 %v6594_v18, %v2373_v61  ;;  %v4897_v9 = vpop.f32.mrf.mxu0  ;;  %v7194_v1 = vld [vmem:[#allocation7_spill] sm:$0xff]  ;;  %v5258_v53 = vld [vmem:[%s7145_s7 + $0xb0] sm:$0xff]  }
 0x1e0   : > { %v2424_v3 = vsel %vm2408_vm8, %v2400_v33, %v2416_v10  ;;  %v2386_v21 = vmul.f32 %v6594_v18, %v2371_v30  ;;  %v2374_v42 = vadd.f32 %v4897_v9, %v2226_v55 }
 0x1e1   : > { %2453 = vst [vmem:[#allocation2 + $0x41] sm:$0xff] %v2424_v3  ;;  %vm2406_vm9 = vcmp.gt.f32.partialorder %v2398_v58, 0.0  ;;  %v2414_v22 = vmul.f32 0.1, %v2398_v58  ;;  %v2403_v16 = vadd.f32 %v6602_v41, %v2388_v63  ;;  %v2355_v19 = vpop.f32.mrf.mxu0  ;;  %v2795_v63 = vrot.slane %v6623_v15, 2 }
 0x1e2   : > { %v2401_v36 = vadd.f32 %v6602_v41, %v2386_v21  ;;  %v2389_v8 = vmul.f32 %v6594_v18, %v2374_v42  ;;  %v2372_v44 = vadd.f32 %v2355_v19, %v2224_v11  ;;  %v6710_v11 = vld [vmem:[#allocation2 + $0x98] sm:$0x3] }
 0x1e3   : > { %v2422_v23 = vsel %vm2406_vm9, %v2398_v58, %v2414_v22  ;;  %vm2411_vm10 = vcmp.gt.f32.partialorder %v2403_v16, 0.0  ;;  %v2419_v31 = vmul.f32 0.1, %v2403_v16  ;;  %v5259_v58 = vld [vmem:[%s7145_s7 + $0xe8] sm:$0xff]   ;;  %v3689_v39 = vrot.slane %v6710_v11, 2 }
 0x1e4   : > { %2451 = vst [vmem:[#allocation2 + $0x21] sm:$0xff] %v2422_v23  ;;  %vm2409_vm11 = vcmp.gt.f32.partialorder %v2401_v36, 0.0  ;;  %v2417_v52 = vmul.f32 0.1, %v2401_v36  ;;  %v2404_v25 = vadd.f32 %v6602_v41, %v2389_v8  ;;  %v2387_v12 = vmul.f32 %v6594_v18, %v2372_v44  ;;  %v6645_v37 = vld [vmem:[#allocation2 + $0x30] sm:$0xff] }
 0x1e5   : > { %v2427_v57 = vsel %vm2411_vm10, %v2403_v16, %v2419_v31  ;;  %v6647_v4 = vld [vmem:[#allocation2 + $0x38] sm:$0x3]  ;;  %v2523_v54 = vrot.slane %v6645_v37, 1 }
 0x1e6   : > { %2456 = vst [vmem:[#allocation2 + $0x71] sm:$0xff] %v2427_v57  ;;  %v2425_v56 = vsel %vm2409_vm11, %v2401_v36, %v2417_v52  ;;  %vm2412_vm12 = vcmp.gt.f32.partialorder %v2404_v25, 0.0  ;;  %v2420_v60 = vmul.f32 0.1, %v2404_v25  ;;  %v2402_v38 = vadd.f32 %v6602_v41, %v2387_v12  ;;  %v6635_v6 = vld [vmem:[#allocation2 + $0x10] sm:$0xff]  ;;  %v7195_v16 = vld [vmem:[#allocation10_spill] sm:$0xff] }
 0x1e7   : > { %v6637_v32 = vld [vmem:[#allocation2 + $0x18] sm:$0x3]  ;;  %2454 = vst [vmem:[#allocation2 + $0x51] sm:$0xff] %v2425_v56  ;;  %v2478_v45 = vpack.c.bf16 %v6635_v6, %v7193_v35  ;;  %v2517_v18 = vrot.slane %v6635_v6, 1  ;;  %v2524_v50 = vrot.slane %v6647_v4, 1  ;;  %v2797_v9 = vrot.slane %v6635_v6, 2 }
 0x1e8   : > { %v2518_v7 = vrot.slane %v6637_v32, 1  ;;  %v2428_v41 = vsel %vm2412_vm12, %v2404_v25, %v2420_v60  ;;  %vm2410_vm13 = vcmp.gt.f32.partialorder %v2402_v38, 0.0  ;;  %v2418_v27 = vmul.f32 0.1, %v2402_v38  ;;  %v6655_v51 = vld [vmem:[#allocation2 + $0x40] sm:$0xff]  ;;  %v5260_v52 = vld [vmem:[%s7145_s7 + $0xa8] sm:$0xff]  }
 0x1e9   : > { %2457 = vst [vmem:[#allocation2 + $0x81] sm:$0xff] %v2428_v41  ;;  %4938 = vmatprep.mubr.bf16.mxu0 %v2478_v45  ;;  %v6657_v0 = vld [vmem:[#allocation2 + $0x48] sm:$0x3]  ;;  %v2526_v14 = vrot.slane %v6655_v51, 1  ;;  %v6682_v33 = vsel %vm1294_vm14, %v2523_v54, %v2524_v50  ;;  %v2798_v3 = vrot.slane %v6637_v32, 2  ;;  %v5261_v25 = vld [vmem:[%s7145_s7 + $0xe0] sm:$0xff]   ;;  %v2796_v12 = vsel %vm2793_vm15, %v2794_v48, %v2795_v63 }
 0x1ea   : > { %v6650_v24 = vsel %vm1294_vm14, %v2517_v18, %v2518_v7  ;;  %v2426_v17 = vsel %vm2410_vm13, %v2402_v38, %v2418_v27  ;;  %v2527_v49 = vrot.slane %v6657_v0, 1  ;;  %v6772_v7 = vsel %vm2793_vm15, %v2794_v48, %v3689_v39  ;;  %v5263_v27 = vld [vmem:[%s7145_s7 + $0xd8] sm:$0xff]   ;;  %v5265_v50 = vld [vmem:[%s7145_s7 + $0xd0] sm:$0xff]  }
 0x1eb   : > { %v2546_v28 = vpack.c.bf16 %v6650_v24, %v2516_v43  ;;  %2455 = vst [vmem:[#allocation2 + $0x61] sm:$0xff] %v2426_v17  ;;  %v6659_v26 = vld [vmem:[#allocation2 + $0x20] sm:$0xff]  ;;  %v6661_v13 = vld [vmem:[#allocation2 + $0x28] sm:$0x3]  ;;  %v6759_v32 = vsel %vm2793_vm15, %v2797_v9, %v2798_v3  ;;  %v5264_v54 = vld [vmem:[%s7145_s7 + $0x98] sm:$0xff]   ;;  %v2804_v63 = vrot.slane %v6647_v4, 2 }
 0x1ec   : > { %v6665_v20 = vpack.c.bf16 %v6645_v37, %v6659_v26  ;;  %v2520_v5 = vrot.slane %v6659_v26, 1  ;;  %v2521_v40 = vrot.slane %v6661_v13, 1  ;;  %v6715_v21 = vsel %vm1294_vm14, %v2526_v14, %v2527_v49  ;;  %v5269_v14 = vld [vmem:[%s7145_s7 + $0xc0] sm:$0xff]   ;;  %v5271_v48 = vld [vmem:[%s7145_s7 + $0x178] sm:$0xff]   ;;  %v5273_v4 = vld [vmem:[%s7145_s7 + $0x170] sm:$0xff]  }
 0x1ed   : > { %4914 = vmatprep.mubr.bf16.mxu1 %v2546_v28  ;;  %v6674_v29 = vld [vmem:[#allocation2 + $0x70] sm:$0xff]  ;;  %v6688_v62 = vld [vmem:[#allocation2 + $0x78] sm:$0x3]  ;;  %v2968_v56 = vpack.c.bf16 %v6659_v26, %v6635_v6  ;;  %v5262_v6 = vld [vmem:[%s7145_s7 + $0xa0] sm:$0xff]   ;;  %v2826_v41 = vpack.c.bf16 %v6759_v32, %v2796_v12  ;;  %v2806_v9 = vrot.slane %v6655_v51, 2  ;;  %v2807_v3 = vrot.slane %v6657_v0, 2 }
 0x1ee   : > { %4939 = vmatmul.mubr.bf16.vlgmr.msra.gmra.mxu0 %v6665_v20  ;;  %v6679_v47 = vsel %vm1294_vm14, %v2520_v5, %v2521_v40  ;;  %v6684_v2 = vld [vmem:[#allocation2 + $0x50] sm:$0xff]  ;;  %v6686_v55 = vld [vmem:[#allocation2 + $0x58] sm:$0x3]  ;;  %v2535_v22 = vrot.slane %v6674_v29, 1  ;;  %v2536_v15 = vrot.slane %v6688_v62, 1  ;;  %v5267_v40 = vld [vmem:[%s7145_s7 + $0xc8] sm:$0xff]  }
 0x1ef   : > { %4971 = vmatpush3.bf16.msra.mxu0 %v7194_v1  ;;  %v6693_v61 = vpack.c.bf16 %v6682_v33, %v6679_v47  ;;  %v6697_v46 = vpack.c.bf16 %v6684_v2, %v6655_v51  ;;  %v2529_v10 = vrot.slane %v6684_v2, 1  ;;  %v2530_v30 = vrot.slane %v6686_v55, 1  ;;  %v5266_v5 = vld [vmem:[%s7145_s7 + $0x90] sm:$0xff]   ;;  %v5270_v49 = vld [vmem:[%s7145_s7 + $0x80] sm:$0xff]  }
 0x1f0   : > { %4972 = vmatprep.subr.bf16.mxu0 %v5257_v59  ;;  %v6737_v31 = vld [vmem:[#allocation2 + $0x80] sm:$0xff]  ;;  %v6748_v57 = vld [vmem:[#allocation2 + $0x88] sm:$0x3]  ;;  %v6756_v38 = vsel %vm1294_vm14, %v2535_v22, %v2536_v15  ;;  %v2800_v1 = vrot.slane %v6659_v26, 2  ;;  %v2969_v26 = vpack.c.bf16 %v6655_v51, %v6645_v37  ;;  %v6837_v0 = vsel %vm2793_vm15, %v2806_v9, %v2807_v3  ;;  %v5295_v3 = vld [vmem:[%s7145_s7 + $0x1d8] sm:$0xff]  }
 0x1f1   : > { %4915 = vmatmul.mubr.bf16.vlgmr.msra.gmra.mxu1 %v6693_v61  ;;  %4942 = vmatprep.mubr.bf16.mxu0 %v6697_v46  ;;  %v6718_v42 = vsel %vm1294_vm14, %v2529_v10, %v2530_v30  ;;  %v3258_v43 = vrot.slane %v6737_v31, 2  ;;  %v3259_v18 = vrot.slane %v6748_v57, 2  ;;  %v2809_v10 = vrot.slane %v6684_v2, 2  ;;  %v5294_v9 = vld [vmem:[%s7145_s7 + $0x1a0] sm:$0xff]  }
 0x1f2   : > { %4947 = vmatpush3.bf16.msra.mxu1 %v7195_v16  ;;  %v6725_v19 = vpack.c.bf16 %v6718_v42, %v6715_v21  ;;  %v6727_v36 = vld [vmem:[#allocation2 + $0x60] sm:$0xff]  ;;  %v6729_v8 = vld [vmem:[#allocation2 + $0x68] sm:$0x3]  ;;  %v2810_v30 = vrot.slane %v6686_v55, 2  ;;  %v5272_v55 = vld [vmem:[%s7145_s7 + $0x138] sm:$0xff]   ;;  %v2971_v12 = vpack.c.bf16 %v6737_v31, %v6674_v29 }
 0x1f3   : > { %4973 = vmatpush3.bf16.msra.mxu0 %v5257_v59  ;;  %4948 = vmatprep.subr.bf16.mxu1 %v5258_v53  ;;  %v6733_v44 = vpack.c.bf16 %v6674_v29, %v6727_v36  ;;  %v2532_v35 = vrot.slane %v6727_v36, 1  ;;  %v2533_v23 = vrot.slane %v6729_v8, 1  ;;  %v6780_v17 = vsel %vm2793_vm15, %v3258_v43, %v3259_v18  ;;  %v5268_v59 = vld [vmem:[%s7145_s7 + $0x88] sm:$0xff]  }
 0x1f4   : > { %4918 = vmatprep.mubr.bf16.mxu1 %v6725_v19  ;;  %4974 = vmatprep.subr.bf16.mxu0 %v5259_v58  ;;  %v3692_v28 = vpack.c.bf16 %v6772_v7, %v6780_v17  ;;  %v2970_v22 = vpack.c.bf16 %v6727_v36, %v6684_v2  ;;  %v6828_v15 = vsel %vm2793_vm15, %v2809_v10, %v2810_v30  ;;  %v5274_v2 = vld [vmem:[%s7145_s7 + $0x130] sm:$0xff]   ;;  %v2813_v39 = vrot.slane %v6729_v8, 2  ;;  %v5277_v8 = vld [vmem:[%s7145_s7 + $0x160] sm:$0xff]   ;;  %v5291_v30 = vld [vmem:[%s7145_s7 + $0x1e8] sm:$0xff]  }
 0x1f5   : > { %v6753_v60 = vsel %vm1294_vm14, %v2532_v35, %v2533_v23  ;;  %v6844_v16 = vpack.c.bf16 %v6828_v15, %v6837_v0  ;;  %v5275_v35 = vld [vmem:[%s7145_s7 + $0x168] sm:$0xff]   ;;  %v2812_v23 = vrot.slane %v6727_v36, 2  ;;  %v3116_v18 = vpack.c.bf16 %v6679_v47, %v6650_v24  ;;  %v5281_v24 = vld [vmem:[%s7145_s7 + $0x150] sm:$0xff]  }
 0x1f6   : > { %4949 = vmatpush3.bf16.msra.mxu1 %v5258_v53  ;;  %4943 = vmatmul.mubr.bf16.gmra.mxu0 %v6733_v44  ;;  %v6764_v45 = vpack.c.bf16 %v6756_v38, %v6753_v60  ;;  %v2801_v53 = vrot.slane %v6661_v13, 2  ;;  %v5276_v36 = vld [vmem:[%s7145_s7 + $0x128] sm:$0xff]   ;;  %v5282_v47 = vld [vmem:[%s7145_s7 + $0x110] sm:$0xff]   ;;  %v3118_v10 = vpack.c.bf16 %v6753_v60, %v6718_v42 }
 0x1f7   : > { %4975 = vmatpush3.bf16.msra.mxu0 %v5259_v58  ;;  %4986 = vmatprep.mubr.bf16.mxu0 %v2968_v56  ;;  %v2803_v58 = vrot.slane %v6645_v37, 2  ;;  %v2814_v56 = vsel %vm2793_vm15, %v2812_v23, %v2813_v39  ;;  %v5292_v42 = vld [vmem:[%s7145_s7 + $0x1a8] sm:$0xff]   ;;  %v5310_v39 = vld [vmem:[%s7145_s7 + $0x220] sm:$0xff]  }
 0x1f8   : > { %4950 = vmatprep.subr.bf16.mxu1 %v5260_v52  ;;  %4976 = vmatprep.subr.bf16.mxu0 %v5261_v25  ;;  %v2802_v13 = vsel %vm2793_vm15, %v2800_v1, %v2801_v53  ;;  %v3117_v1 = vpack.c.bf16 %v6715_v21, %v6682_v33  ;;  %v5290_v53 = vld [vmem:[%s7145_s7 + $0x1b0] sm:$0xff]  }
 0x1f9   : > { %4919 = vmatmul.mubr.bf16.gmra.mxu1 %v6764_v45  ;;  %v6831_v37 = vsel %vm2793_vm15, %v2803_v58, %v2804_v63  ;;  %v3262_v43 = vpack.c.bf16 %v2802_v13, %v6759_v32  ;;  %v5279_v32 = vld [vmem:[%s7145_s7 + $0x158] sm:$0xff]   ;;  %v3112_v58 = vrot.slane %v6737_v31, 1  ;;  %v3113_v63 = vrot.slane %v6748_v57, 1  ;;  %v5293_v57 = vld [vmem:[%s7145_s7 + $0x1e0] sm:$0xff]  }
 0x1fa   : > { %4951 = vmatpush3.bf16.msra.mxu1 %v5260_v52  ;;  %4962 = vmatprep.mubr.bf16.mxu1 %v2826_v41  ;;  %v6834_v51 = vpack.c.bf16 %v6831_v37, %v2802_v13  ;;  %v2815_v52 = vrot.slane %v6674_v29, 2  ;;  %v5280_v41 = vld [vmem:[%s7145_s7 + $0x118] sm:$0xff]   ;;  %v5300_v13 = vld [vmem:[%s7145_s7 + $0x188] sm:$0xff]  }
 0x1fb   : > { %4977 = vmatpush3.bf16.msra.mxu0 %v5261_v25  ;;  %4952 = vmatprep.subr.bf16.mxu1 %v5262_v6  ;;  %v2816_v25 = vrot.slane %v6688_v62, 2  ;;  %v6928_v21 = vsel %vm1294_vm14, %v3112_v58, %v3113_v63 }
 0x1fc   : > { %4978 = vmatprep.subr.bf16.mxu0 %v5263_v27  ;;  %v3119_v60 = vpack.c.bf16 %v6928_v21, %v6756_v38  ;;  %v5297_v38 = vld [vmem:[%s7145_s7 + $0x1d0] sm:$0xff]  }
 0x1fd   : > { %v6866_v62 = vsel %vm2793_vm15, %v2815_v52, %v2816_v25  ;;  %v5311_v52 = vld [vmem:[%s7146_s8 + $0x18] sm:$0xff]   ;;  %v5313_v25 = vld [vmem:[%s7146_s8 + $0x10] sm:$0xff]  }
 0x1fe   : > { %4953 = vmatpush3.bf16.msra.mxu1 %v5262_v6  ;;  %v6869_v29 = vpack.c.bf16 %v6866_v62, %v2814_v56  ;;  %v5278_v6 = vld [vmem:[%s7145_s7 + $0x120] sm:$0xff]   ;;  %v3265_v33 = vpack.c.bf16 %v6780_v17, %v6866_v62  ;;  %v7198_v62 = vld [vmem:[#allocation5_spill] sm:$0xff] }
 0x1ff   : > { %4979 = vmatpush3.bf16.msra.mxu0 %v5263_v27  ;;  %4954 = vmatprep.subr.bf16.mxu1 %v5264_v54  ;;  %v5283_v27 = vld [vmem:[%s7145_s7 + $0x148] sm:$0xff]  }
 0x200   : > { %4980 = vmatprep.subr.bf16.mxu0 %v5265_v50 }
 0x202   : > { %4955 = vmatpush3.bf16.msra.mxu1 %v5264_v54  ;;  %v5284_v54 = vld [vmem:[%s7145_s7 + $0x108] sm:$0xff]  }
 0x203   : > { %4981 = vmatpush3.bf16.msra.mxu0 %v5265_v50  ;;  %4956 = vmatprep.subr.bf16.mxu1 %v5266_v5  ;;  %v5285_v50 = vld [vmem:[%s7145_s7 + $0x140] sm:$0xff]  }
 0x204   : > { %4982 = vmatprep.subr.bf16.mxu0 %v5267_v40 }
 0x206   : > { %4957 = vmatpush3.bf16.msra.mxu1 %v5266_v5  ;;  %v5286_v5 = vld [vmem:[%s7145_s7 + $0x100] sm:$0xff]  }
 0x207   : > { %4983 = vmatpush3.bf16.msra.mxu0 %v5267_v40  ;;  %4958 = vmatprep.subr.bf16.mxu1 %v5268_v59  ;;  %v5287_v40 = vld [vmem:[%s7145_s7 + $0x1f8] sm:$0xff]  }
 0x208   : > { %4984 = vmatprep.subr.bf16.mxu0 %v5269_v14 }
 0x20a   : > { %4959 = vmatpush3.bf16.msra.mxu1 %v5268_v59  ;;  %v3263_v59 = vpack.c.bf16 %v6837_v0, %v6831_v37  ;;  %v6979_v37 = vld [vmem:[%s7146_s8 + $0x30] sm:$0xff]   ;;  %v3546_v0 = vrot.slane %v6710_v11, 1 }
 0x20b   : > { %4985 = vmatpush3.bf16.msra.mxu0 %v5269_v14  ;;  %4960 = vmatprep.subr.bf16.mxu1 %v5270_v49  ;;  %v5288_v14 = vld [vmem:[%s7145_s7 + $0x1b8] sm:$0xff]  }
 0x20c   : > { %5018 = vmatprep.subr.bf16.mxu0 %v5271_v48  ;;  %v3547_v11 = vsel %vm1294_vm14, %v6629_v34, %v3546_v0  ;;  %v7196_v34 = vld [vmem:[#allocation3_spill] sm:$0xff] }
 0x20e   : > { %4961 = vmatpush3.bf16.msra.mxu1 %v5270_v49  ;;  %4987 = vmatmul.mubr.bf16.vlgmr.msra.gmra.mxu0 %v2969_v26  ;;  %v5289_v49 = vld [vmem:[%s7145_s7 + $0x1f0] sm:$0xff]  }
 0x20f   : > { %4990 = vmatprep.mubr.bf16.mxu0 %v2970_v22  ;;  %5019 = vmatpush3.bf16.msra.mxu0 %v5271_v48  ;;  %v3264_v48 = vpack.c.bf16 %v2814_v56, %v6828_v15  ;;  %v5298_v26 = vld [vmem:[%s7145_s7 + $0x190] sm:$0xff]   ;;  %v6970_v22 = vld [vmem:[%s7146_s8 + $0x38] sm:$0xff]   ;;  %v5316_v56 = vld [vmem:[%s7145_s7 + $0x208] sm:$0xff]  }
 0x210   : > { %4994 = vmatprep.subr.bf16.mxu1 %v5272_v55  ;;  %5020 = vmatprep.subr.bf16.mxu0 %v5273_v4  ;;  %v5304_v15 = vld [vmem:[%s7145_s7 + $0x238] sm:$0xff]  }
 0x211   : > { %4963 = vmatmul.mubr.bf16.vlgmr.msra.gmra.mxu1 %v6834_v51 }
 0x212   : > { %4966 = vmatprep.mubr.bf16.mxu1 %v6844_v16  ;;  %4995 = vmatpush3.bf16.msra.mxu1 %v5272_v55  ;;  %v5301_v55 = vld [vmem:[%s7145_s7 + $0x1c0] sm:$0xff]  }
 0x213   : > { %5021 = vmatpush3.bf16.msra.mxu0 %v5273_v4  ;;  %4996 = vmatprep.subr.bf16.mxu1 %v5274_v2  ;;  %v5302_v4 = vld [vmem:[%s7145_s7 + $0x180] sm:$0xff]  }
 0x214   : > { %5022 = vmatprep.subr.bf16.mxu0 %v5275_v35 }
 0x216   : > { %4991 = vmatmul.mubr.bf16.gmra.mxu0 %v2971_v12  ;;  %4997 = vmatpush3.bf16.msra.mxu1 %v5274_v2  ;;  %v5306_v2 = vld [vmem:[%s7145_s7 + $0x230] sm:$0xff]  }
 0x217   : > { %5023 = vmatpush3.bf16.msra.mxu0 %v5275_v35  ;;  %5034 = vmatprep.mubr.bf16.mxu0 %v3262_v43  ;;  %v5307_v35 = vld [vmem:[%s7146_s8 + $0x28] sm:$0xff]   ;;  %v5314_v12 = vld [vmem:[%s7145_s7 + $0x210] sm:$0xff]  }
 0x218   : > { %4998 = vmatprep.subr.bf16.mxu1 %v5276_v36  ;;  %5024 = vmatprep.subr.bf16.mxu0 %v5277_v8  ;;  %v7197_v43 = vld [vmem:[#allocation4_spill] sm:$0xff] }
 0x219   : > { %4967 = vmatmul.mubr.bf16.gmra.mxu1 %v6869_v29 }
 0x21a   : > { %4999 = vmatpush3.bf16.msra.mxu1 %v5276_v36  ;;  %5010 = vmatprep.mubr.bf16.mxu1 %v3116_v18  ;;  %v5317_v36 = vld [vmem:[%s7146_s8] sm:$0xff]  }
 0x21b   : > { %5025 = vmatpush3.bf16.msra.mxu0 %v5277_v8  ;;  %5000 = vmatprep.subr.bf16.mxu1 %v5278_v6  ;;  %v5318_v8 = vld [vmem:[%s7145_s7 + $0x200] sm:$0xff]  }
 0x21c   : > { %5026 = vmatprep.subr.bf16.mxu0 %v5279_v32 }
 0x21e   : > { %5001 = vmatpush3.bf16.msra.mxu1 %v5278_v6 }
 0x21f   : > { %5027 = vmatpush3.bf16.msra.mxu0 %v5279_v32  ;;  %5002 = vmatprep.subr.bf16.mxu1 %v5280_v41 }
 0x220   : > { %5028 = vmatprep.subr.bf16.mxu0 %v5281_v24 }
 0x222   : > { %5003 = vmatpush3.bf16.msra.mxu1 %v5280_v41 }
 0x223   : > { %5029 = vmatpush3.bf16.msra.mxu0 %v5281_v24  ;;  %5004 = vmatprep.subr.bf16.mxu1 %v5282_v47 }
 0x224   : > { %5030 = vmatprep.subr.bf16.mxu0 %v5283_v27 }
 0x226   : > { %5005 = vmatpush3.bf16.msra.mxu1 %v5282_v47 }
 0x227   : > { %5031 = vmatpush3.bf16.msra.mxu0 %v5283_v27  ;;  %5006 = vmatprep.subr.bf16.mxu1 %v5284_v54 }
 0x228   : > { %5032 = vmatprep.subr.bf16.mxu0 %v5285_v50 }
 0x22a   : > { %5007 = vmatpush3.bf16.msra.mxu1 %v5284_v54 }
 0x22b   : > { %5033 = vmatpush3.bf16.msra.mxu0 %v5285_v50  ;;  %5008 = vmatprep.subr.bf16.mxu1 %v5286_v5 }
 0x22c   : > { %5066 = vmatprep.subr.bf16.mxu0 %v5287_v40 }
 0x22e   : > { %5009 = vmatpush3.bf16.msra.mxu1 %v5286_v5  ;;  %5035 = vmatmul.mubr.bf16.vlgmr.msra.gmra.mxu0 %v3263_v59 }
 0x22f   : > { %5038 = vmatprep.mubr.bf16.mxu0 %v3264_v48  ;;  %5067 = vmatpush3.bf16.msra.mxu0 %v5287_v40 }
 0x230   : > { %5042 = vmatprep.subr.bf16.mxu1 %v5288_v14  ;;  %5068 = vmatprep.subr.bf16.mxu0 %v5289_v49 }
 0x231   : > { %5011 = vmatmul.mubr.bf16.vlgmr.msra.gmra.mxu1 %v3117_v1 }
 0x232   : > { %5014 = vmatprep.mubr.bf16.mxu1 %v3118_v10  ;;  %5043 = vmatpush3.bf16.msra.mxu1 %v5288_v14 }
 0x233   : > { %5069 = vmatpush3.bf16.msra.mxu0 %v5289_v49  ;;  %5044 = vmatprep.subr.bf16.mxu1 %v5290_v53 }
 0x234   : > { %5070 = vmatprep.subr.bf16.mxu0 %v5291_v30 }
 0x236   : > { %5039 = vmatmul.mubr.bf16.gmra.mxu0 %v3265_v33  ;;  %5045 = vmatpush3.bf16.msra.mxu1 %v5290_v53 }
 0x237   : > { %5071 = vmatpush3.bf16.msra.mxu0 %v5291_v30  ;;  %5082 = vmatprep.mubr.bf16.mxu0 %v6693_v61  ;;  %v5296_v61 = vld [vmem:[%s7145_s7 + $0x198] sm:$0xff]  }
 0x238   : > { %5046 = vmatprep.subr.bf16.mxu1 %v5292_v42  ;;  %5072 = vmatprep.subr.bf16.mxu0 %v5293_v57 }
 0x239   : > { %5015 = vmatmul.mubr.bf16.gmra.mxu1 %v3119_v60 }
 0x23a   : > { %5047 = vmatpush3.bf16.msra.mxu1 %v5292_v42  ;;  %5058 = vmatprep.mubr.bf16.mxu1 %v6665_v20  ;;  %v5299_v20 = vld [vmem:[%s7145_s7 + $0x1c8] sm:$0xff]  }
 0x23b   : > { %5073 = vmatpush3.bf16.msra.mxu0 %v5293_v57  ;;  %5048 = vmatprep.subr.bf16.mxu1 %v5294_v9 }
 0x23c   : > { %5074 = vmatprep.subr.bf16.mxu0 %v5295_v3 }
 0x23e   : > { %5049 = vmatpush3.bf16.msra.mxu1 %v5294_v9 }
 0x23f   : > { %5075 = vmatpush3.bf16.msra.mxu0 %v5295_v3  ;;  %5050 = vmatprep.subr.bf16.mxu1 %v5296_v61 }
 0x240   : > { %5076 = vmatprep.subr.bf16.mxu0 %v5297_v38 }
 0x242   : > { %5051 = vmatpush3.bf16.msra.mxu1 %v5296_v61 }
 0x243   : > { %5077 = vmatpush3.bf16.msra.mxu0 %v5297_v38  ;;  %5052 = vmatprep.subr.bf16.mxu1 %v5298_v26 }
 0x244   : > { %5078 = vmatprep.subr.bf16.mxu0 %v5299_v20 }
 0x246   : > { %5053 = vmatpush3.bf16.msra.mxu1 %v5298_v26 }
 0x247   : > { %5079 = vmatpush3.bf16.msra.mxu0 %v5299_v20  ;;  %5054 = vmatprep.subr.bf16.mxu1 %v5300_v13 }
 0x248   : > { %5080 = vmatprep.subr.bf16.mxu0 %v5301_v55 }
 0x24a   : > { %5055 = vmatpush3.bf16.msra.mxu1 %v5300_v13 }
 0x24b   : > { %5081 = vmatpush3.bf16.msra.mxu0 %v5301_v55  ;;  %5056 = vmatprep.subr.bf16.mxu1 %v5302_v4 }
 0x24c   : > { %5114 = vmatprep.subr.bf16.mxu0 %v6970_v22 }
 0x24e   : > { %5057 = vmatpush3.bf16.msra.mxu1 %v5302_v4  ;;  %5083 = vmatmul.mubr.bf16.vlgmr.msra.gmra.mxu0 %v6725_v19  ;;  %v3549_v19 = vpack.c.bf16 %v3547_v11, %v6928_v21 }
 0x24f   : > { %5086 = vmatprep.mubr.bf16.mxu0 %v6764_v45  ;;  %5115 = vmatpush3.bf16.msra.mxu0 %v6970_v22  ;;  %v5308_v45 = vld [vmem:[%s7145_s7 + $0x228] sm:$0xff]  }
 0x250   : > { %5090 = vmatprep.subr.bf16.mxu1 %v5304_v15  ;;  %5116 = vmatprep.subr.bf16.mxu0 %v6979_v37 }
 0x251   : > { %5059 = vmatmul.mubr.bf16.vlgmr.msra.gmra.mxu1 %v6697_v46  ;;  %v5309_v46 = vld [vmem:[%s7146_s8 + $0x20] sm:$0xff]  }
 0x252   : > { %5062 = vmatprep.mubr.bf16.mxu1 %v6733_v44  ;;  %5091 = vmatpush3.bf16.msra.mxu1 %v5304_v15  ;;  %v5321_v44 = vld [vmem:[#allocation2] sm:$0xff] }
 0x253   : > { %5117 = vmatpush3.bf16.msra.mxu0 %v6979_v37  ;;  %5092 = vmatprep.subr.bf16.mxu1 %v5306_v2  ;;  %v3404_v23 = vpack.c.bf16 %v5321_v44, %v6737_v31  ;;  %v5312_v31 = vld [vmem:[%s7145_s7 + $0x218] sm:$0xff]  }
 0x254   : > { %5118 = vmatprep.subr.bf16.mxu0 %v5307_v35 }
 0x256   : > { %5087 = vmatmul.mubr.bf16.gmra.mxu0 %v3549_v19  ;;  %5093 = vmatpush3.bf16.msra.mxu1 %v5306_v2 }
 0x257   : > { %5119 = vmatpush3.bf16.msra.mxu0 %v5307_v35  ;;  %5130 = vmatprep.mubr.bf16.mxu0 %v7196_v34 }
 0x258   : > { %5094 = vmatprep.subr.bf16.mxu1 %v5308_v45  ;;  %5120 = vmatprep.subr.bf16.mxu0 %v5309_v46 }
 0x259   : > { %5063 = vmatmul.mubr.bf16.gmra.mxu1 %v3404_v23 }
 0x25a   : > { %5095 = vmatpush3.bf16.msra.mxu1 %v5308_v45  ;;  %5106 = vmatprep.mubr.bf16.mxu1 %v6834_v51  ;;  %v5315_v51 = vld [vmem:[%s7146_s8 + $0x8] sm:$0xff]  }
 0x25b   : > { %5121 = vmatpush3.bf16.msra.mxu0 %v5309_v46  ;;  %5096 = vmatprep.subr.bf16.mxu1 %v5310_v39 }
 0x25c   : > { %5122 = vmatprep.subr.bf16.mxu0 %v5311_v52 }
 0x25e   : > { %5097 = vmatpush3.bf16.msra.mxu1 %v5310_v39 }
 0x25f   : > { %5123 = vmatpush3.bf16.msra.mxu0 %v5311_v52  ;;  %5098 = vmatprep.subr.bf16.mxu1 %v5312_v31 }
 0x260   : > { %5124 = vmatprep.subr.bf16.mxu0 %v5313_v25 }
 0x262   : > { %5099 = vmatpush3.bf16.msra.mxu1 %v5312_v31 }
 0x263   : > { %5125 = vmatpush3.bf16.msra.mxu0 %v5313_v25  ;;  %5100 = vmatprep.subr.bf16.mxu1 %v5314_v12 }
 0x264   : > { %5126 = vmatprep.subr.bf16.mxu0 %v5315_v51 }
 0x266   : > { %5101 = vmatpush3.bf16.msra.mxu1 %v5314_v12 }
 0x267   : > { %5127 = vmatpush3.bf16.msra.mxu0 %v5315_v51  ;;  %5102 = vmatprep.subr.bf16.mxu1 %v5316_v56 }
 0x268   : > { %5128 = vmatprep.subr.bf16.mxu0 %v5317_v36 }
 0x26a   : > { %5103 = vmatpush3.bf16.msra.mxu1 %v5316_v56 }
 0x26b   : > { %5129 = vmatpush3.bf16.msra.mxu0 %v5317_v36  ;;  %5104 = vmatprep.subr.bf16.mxu1 %v5318_v8 }
 0x26e   : > { %5105 = vmatpush3.bf16.msra.mxu1 %v5318_v8  ;;  %5131 = vmatmul.mubr.bf16.vlgmr.msra.gmra.mxu0 %v7197_v43 }
 0x26f   : > { %5138 = vmatprep.subr.bf16.mxu1 %v6970_v22 }
 0x271   : > { %5107 = vmatmul.mubr.bf16.vlgmr.msra.gmra.mxu1 %v6844_v16  ;;  %v7199_v16 = vld [vmem:[#allocation6_spill] sm:$0xff] }
 0x272   : > { %5110 = vmatprep.mubr.bf16.mxu1 %v6869_v29  ;;  %5146 = vmatpush3.bf16.msra.mxu1 %v6970_v22 }
 0x273   : > { %5139 = vmatprep.subr.bf16.mxu1 %v6979_v37 }
 0x276   : > { %5147 = vmatpush3.bf16.msra.mxu1 %v6979_v37 }
 0x277   : > { %5140 = vmatprep.subr.bf16.mxu1 %v5307_v35 }
 0x279   : > { %5111 = vmatmul.mubr.bf16.gmra.mxu1 %v3692_v28 }
 0x27a   : > { %5148 = vmatpush3.bf16.msra.mxu1 %v5307_v35  ;;  %5134 = vmatprep.mubr.bf16.mxu1 %v7198_v62 }
 0x27b   : > { %5141 = vmatprep.subr.bf16.mxu1 %v5309_v46 }
 0x27e   : > { %5149 = vmatpush3.bf16.msra.mxu1 %v5309_v46 }
 0x27f   : > { %5142 = vmatprep.subr.bf16.mxu1 %v5311_v52 }
 0x282   : > { %5150 = vmatpush3.bf16.msra.mxu1 %v5311_v52 }
 0x283   : > { %5143 = vmatprep.subr.bf16.mxu1 %v5313_v25 }
 0x286   : > { %5151 = vmatpush3.bf16.msra.mxu1 %v5313_v25 }
 0x287   : > { %5144 = vmatprep.subr.bf16.mxu1 %v5315_v51 }
 0x28a   : > { %5152 = vmatpush3.bf16.msra.mxu1 %v5315_v51 }
 0x28b   : > { %5145 = vmatprep.subr.bf16.mxu1 %v5317_v36 }
 0x28e   : > { %5153 = vmatpush3.bf16.msra.mxu1 %v5317_v36 }
 0x291   : > { %5135 = vmatmul.mubr.bf16.vlgmr.msra.gmra.mxu1 %v7199_v16 }
 0x2ae   : > { %v4940_v29 = vpop.f32.mrf.mxu0 }
 0x2b0   : > { %v2762_v6 = vpop.f32.mrf.mxu0 }
 0x2b1   : > { %v4916_v18 = vpop.f32.mrf.mxu1 }
 0x2b2   : > { %v4941_v7 = vpop.f32.mrf.mxu0  ;;  %v2771_v36 = vadd.f32 %v4940_v29, %v4916_v18 }
 0x2b3   : > { %v2649_v17 = vpop.f32.mrf.mxu1 }
 0x2b4   : > { %v2765_v28 = vpop.f32.mrf.mxu0  ;;  %v2763_v43 = vadd.f32 %v2762_v6, %v2649_v17 }
 0x2b5   : > { %v4917_v32 = vpop.f32.mrf.mxu1 }
 0x2b6   : > { %v4944_v41 = vpop.f32.mrf.mxu0 }
 0x2b7   : > { %v2652_v24 = vpop.f32.mrf.mxu1 }
 0x2b8   : > { %v2778_v47 = vpop.f32.mrf.mxu0 }
 0x2b9   : > { %v4920_v27 = vpop.f32.mrf.mxu1 }
 0x2ba   : > { %v7046_v54 = vadd.f32 %v4944_v41, %v4920_v27  ;;  %v4945_v50 = vpop.f32.mrf.mxu0  ;;  %v2774_v41 = vadd.f32 %v4941_v7, %v4917_v32 }
 0x2bb   : > { %v2665_v5 = vpop.f32.mrf.mxu1 }
 0x2bc   : > { %v7048_v40 = vadd.f32 %v2778_v47, %v2665_v5  ;;  %v2781_v49 = vpop.f32.mrf.mxu0 }
 0x2bd   : > { %v4921_v59 = vpop.f32.mrf.mxu1 }
 0x2be   : > { %v7050_v14 = vadd.f32 %v4945_v50, %v4921_v59  ;;  %v2766_v50 = vadd.f32 %v2765_v28, %v2652_v24 }
 0x2bf   : > { %v2668_v48 = vpop.f32.mrf.mxu1 }
 0x2c0   : > { %v7052_v1 = vadd.f32 %v2781_v49, %v2668_v48 }
 0x2ce   : > { %v4988_v53 = vpop.f32.mrf.mxu0 }
 0x2d0   : > { %v3071_v30 = vpop.f32.mrf.mxu0 }
 0x2d1   : > { %v4964_v10 = vpop.f32.mrf.mxu1 }
 0x2d2   : > { %v4989_v63 = vpop.f32.mrf.mxu0  ;;  %v2962_v62 = vadd.f32 %v4964_v10, %v2771_v36 }
 0x2d3   : > { %v2929_v58 = vpop.f32.mrf.mxu1 }
 0x2d4   : > { %v3074_v21 = vpop.f32.mrf.mxu0  ;;  %v2960_v47 = vadd.f32 %v2929_v58, %v2763_v43  ;;  %v3104_v59 = vadd.f32 %v4988_v53, %v2962_v62 }
 0x2d5   : > { %v4965_v33 = vpop.f32.mrf.mxu1 }
 0x2d6   : > { %v7054_v57 = vpop.f32.mrf.mxu0  ;;  %v2963_v5 = vadd.f32 %v4965_v33, %v2774_v41 }
 0x2d7   : > { %v2932_v42 = vpop.f32.mrf.mxu1 }
 0x2d8   : > { %v7058_v9 = vpop.f32.mrf.mxu0  ;;  %v2961_v48 = vadd.f32 %v2932_v42, %v2766_v50  ;;  %v3105_v29 = vadd.f32 %v4989_v63, %v2963_v5 }
 0x2d9   : > { %v7056_v60 = vpop.f32.mrf.mxu1 }
 0x2da   : > { %v7062_v61 = vpop.f32.mrf.mxu0  ;;  %v3103_v17 = vadd.f32 %v3074_v21, %v2961_v48  ;;  %v2966_v41 = vadd.f32 %v7056_v60, %v7046_v54 }
 0x2db   : > { %v7060_v3 = vpop.f32.mrf.mxu1 }
 0x2dc   : > { %v7066_v26 = vpop.f32.mrf.mxu0  ;;  %v3108_v50 = vadd.f32 %v7054_v57, %v2966_v41 }
 0x2dd   : > { %v7064_v38 = vpop.f32.mrf.mxu1 }
 0x2df   : > { %v7068_v13 = vpop.f32.mrf.mxu1 }
 0x2e0   : > { %v2965_v5 = vadd.f32 %v7068_v13, %v7052_v1 }
 0x2ee   : > { %v5036_v20 = vpop.f32.mrf.mxu0 }
 0x2f0   : > { %v3365_v4 = vpop.f32.mrf.mxu0 }
 0x2f1   : > { %v5012_v55 = vpop.f32.mrf.mxu1 }
 0x2f2   : > { %v5037_v15 = vpop.f32.mrf.mxu0 }
 0x2f3   : > { %v3219_v22 = vpop.f32.mrf.mxu1 }
 0x2f4   : > { %v3368_v0 = vpop.f32.mrf.mxu0 }
 0x2f5   : > { %v5013_v37 = vpop.f32.mrf.mxu1 }
 0x2f6   : > { %v7070_v35 = vpop.f32.mrf.mxu0  ;;  %v3253_v18 = vadd.f32 %v5013_v37, %v3105_v29 }
 0x2f7   : > { %v3222_v2 = vpop.f32.mrf.mxu1 }
 0x2f8   : > { %v7074_v19 = vpop.f32.mrf.mxu0  ;;  %v3251_v10 = vadd.f32 %v3222_v2, %v3103_v17  ;;  %v3399_v33 = vadd.f32 %v5037_v15, %v3253_v18 }
 0x2f9   : > { %v7072_v11 = vpop.f32.mrf.mxu1  ;;  %7200 = vst [vmem:[#allocation8_spill] sm:$0xff] %v7074_v19 }
 0x2fa   : > { %v7078_v46 = vpop.f32.mrf.mxu0  ;;  %v3397_v36 = vadd.f32 %v3368_v0, %v3251_v10 }
 0x2fb   : > { %v7076_v45 = vpop.f32.mrf.mxu1  ;;  %7201 = vst [vmem:[#allocation11_spill] sm:$0xff] %v7078_v46  ;;  %v3102_v46 = vadd.f32 %v3071_v30, %v2960_v47  ;;  %v2967_v47 = vadd.f32 %v7064_v38, %v7050_v14 }
 0x2fc   : > { %v7082_v44 = vpop.f32.mrf.mxu0 }
 0x2fd   : > { %v7080_v34 = vpop.f32.mrf.mxu1  ;;  %7202 = vst [vmem:[#allocation9_spill] sm:$0xff] %v7082_v44  ;;  %v3252_v44 = vadd.f32 %v5012_v55, %v3104_v59  ;;  %v3256_v59 = vadd.f32 %v7072_v11, %v3108_v50  ;;  %v3109_v54 = vadd.f32 %v7062_v61, %v2967_v47 }
 0x2ff   : > { %v7084_v39 = vpop.f32.mrf.mxu1  ;;  %v3398_v7 = vadd.f32 %v5036_v20, %v3252_v44  ;;  %v3402_v14 = vadd.f32 %v7070_v35, %v3256_v59 }
 0x300   : > { %7203 = vst [vmem:[#allocation12_spill] sm:$0xff] %v7084_v39  ;;  %v3250_v39 = vadd.f32 %v3219_v22, %v3102_v46  ;;  %v7205_v1 = vld [vmem:[#allocation8_spill] sm:$0xff] }
 0x302   : > { %v3396_v28 = vadd.f32 %v3365_v4, %v3250_v39 }
 0x304   : > { %v7207_v61 = vld [vmem:[#allocation9_spill] sm:$0xff] }
 0x307   : > { %v7204_v57 = vld [vmem:[#allocation12_spill] sm:$0xff] }
 0x30e   : > { %v5084_v23 = vpop.f32.mrf.mxu0 }
 0x310   : > { %v3649_v31 = vpop.f32.mrf.mxu0 }
 0x311   : > { %v5060_v52 = vpop.f32.mrf.mxu1 }
 0x312   : > { %v5085_v12 = vpop.f32.mrf.mxu0  ;;  %v3537_v58 = vadd.f32 %v5060_v52, %v3398_v7 }
 0x313   : > { %v3504_v25 = vpop.f32.mrf.mxu1 }
 0x314   : > { %v3652_v56 = vpop.f32.mrf.mxu0  ;;  %v3535_v53 = vadd.f32 %v3504_v25, %v3396_v28  ;;  %v3682_v63 = vadd.f32 %v5084_v23, %v3537_v58 }
 0x315   : > { %v5061_v51 = vpop.f32.mrf.mxu1 }
 0x316   : > { %v7086_v16 = vpop.f32.mrf.mxu0  ;;  %v3538_v30 = vadd.f32 %v5061_v51, %v3399_v33  ;;  %v3680_v21 = vadd.f32 %v3649_v31, %v3535_v53 }
 0x317   : > { %v3507_v8 = vpop.f32.mrf.mxu1 }
 0x318   : > { %v7090_v49 = vpop.f32.mrf.mxu0  ;;  %v3536_v43 = vadd.f32 %v3507_v8, %v3397_v36  ;;  %v3683_v0 = vadd.f32 %v5085_v12, %v3538_v30  ;;  %v2964_v12 = vadd.f32 %v7060_v3, %v7048_v40  ;;  %v3257_v40 = vadd.f32 %v7080_v34, %v3109_v54 }
 0x319   : > { %v7088_v27 = vpop.f32.mrf.mxu1  ;;  %v3107_v3 = vadd.f32 %v7066_v26, %v2965_v5 }
 0x31a   : > { %v7092_v6 = vpop.f32.mrf.mxu0  ;;  %v3681_v52 = vadd.f32 %v3652_v56, %v3536_v43  ;;  %v3106_v48 = vadd.f32 %v7058_v9, %v2964_v12  ;;  %v3541_v18 = vadd.f32 %v7088_v27, %v3402_v14  ;;  %v7206_v9 = vld [vmem:[#allocation11_spill] sm:$0xff] }
 0x31b   : > { %v3520_v19 = vpop.f32.mrf.mxu1  ;;  %v3255_v38 = vadd.f32 %v7204_v57, %v3107_v3 }
 0x31c   : > { %v7094_v24 = vpop.f32.mrf.mxu0  ;;  %v3254_v29 = vadd.f32 %v7076_v45, %v3106_v48  ;;  %v3403_v45 = vadd.f32 %v7206_v9, %v3257_v40  ;;  %v3686_v34 = vadd.f32 %v7086_v16, %v3541_v18 }
 0x31d   : > { %v5065_v32 = vpop.f32.mrf.mxu1  ;;  %v3401_v10 = vadd.f32 %v7207_v61, %v3255_v38 }
 0x31e   : > { %v3400_v13 = vadd.f32 %v7205_v1, %v3254_v29  ;;  %v3542_v7 = vadd.f32 %v5065_v32, %v3403_v45 }
 0x31f   : > { %v3523_v55 = vpop.f32.mrf.mxu1 }
 0x320   : > { %v3539_v17 = vadd.f32 %v3520_v19, %v3400_v13  ;;  %v3540_v58 = vadd.f32 %v3523_v55, %v3401_v10  ;;  %v3687_v19 = vadd.f32 %v7092_v6, %v3542_v7 }
 0x322   : > { %v3684_v28 = vadd.f32 %v7090_v49, %v3539_v17  ;;  %v3685_v32 = vadd.f32 %v7094_v24, %v3540_v58 }
 0x32e   : > { %v5132_v42 = vpop.f32.mrf.mxu0 }
 0x330   : > { %v3929_v22 = vpop.f32.mrf.mxu0 }
 0x331   : > { %v5108_v46 = vpop.f32.mrf.mxu1 }
 0x332   : > { %v3825_v37 = vadd.f32 %v5108_v46, %v3682_v63  ;;  %v5133_v2 = vpop.f32.mrf.mxu0 }
 0x333   : > { %v3792_v20 = vpop.f32.mrf.mxu1 }
 0x334   : > { %v3962_v4 = vadd.f32 %v5132_v42, %v3825_v37  ;;  %v3823_v15 = vadd.f32 %v3792_v20, %v3680_v21  ;;  %v3932_v8 = vpop.f32.mrf.mxu0 }
 0x335   : > { %v5109_v44 = vpop.f32.mrf.mxu1 }
 0x336   : > { %3970 = vst [vmem:[%s7100_s24 + $0x10] sm:$0xff] %v3962_v4  ;;  %v3960_v23 = vadd.f32 %v3929_v22, %v3823_v15  ;;  %v3826_v39 = vadd.f32 %v5109_v44, %v3683_v0 }
 0x337   : > { %v3795_v31 = vpop.f32.mrf.mxu1 }
 0x338   : > { %3968 = vst [vmem:[%s7100_s24] sm:$0xff] %v3960_v23  ;;  %v3963_v25 = vadd.f32 %v5133_v2, %v3826_v39  ;;  %v3824_v51 = vadd.f32 %v3795_v31, %v3681_v52 }
 0x339   : > { %v5112_v56 = vpop.f32.mrf.mxu1 }
 0x33a   : > { %3971 = vst [vmem:[%s7100_s24 + $0x18] sm:$0xff] %v3963_v25  ;;  %v3961_v62 = vadd.f32 %v3932_v8, %v3824_v51  ;;  %v3829_v35 = vadd.f32 %v5112_v56, %v3686_v34 }
 0x33b   : > { %v3808_v60 = vpop.f32.mrf.mxu1 }
 0x33c   : > { %3969 = vst [vmem:[%s7100_s24 + $0x8] sm:$0xff] %v3961_v62  ;;  %v3827_v53 = vadd.f32 %v3808_v60, %v3684_v28 }
 0x33d   : > { %v5113_v11 = vpop.f32.mrf.mxu1 }
 0x33e   : > { %v3830_v30 = vadd.f32 %v5113_v11, %v3687_v19 }
 0x33f   : > { %v3811_v26 = vpop.f32.mrf.mxu1 }
 0x340   : > { %v3828_v63 = vadd.f32 %v3811_v26, %v3685_v32 }
 0x351   : > { %v5136_v27 = vpop.f32.mrf.mxu1 }
 0x352   : > { %v3966_v33 = vadd.f32 %v5136_v27, %v3829_v35 }
 0x353   : > { %v3945_v42 = vpop.f32.mrf.mxu1 }
 0x354   : > { %3974 = vst [vmem:[%s7100_s24 + $0x30] sm:$0xff] %v3966_v33  ;;  %v3964_v36 = vadd.f32 %v3945_v42, %v3827_v53 }
 0x355   : > { %v5137_v16 = vpop.f32.mrf.mxu1 }
 0x356   : > { %3972 = vst [vmem:[%s7100_s24 + $0x20] sm:$0xff] %v3964_v36  ;;  %v3967_v55 = vadd.f32 %v5137_v16, %v3830_v30 }
 0x357   : > { %v3948_v22 = vpop.f32.mrf.mxu1 }
 0x358   : > { %3975 = vst [vmem:[%s7100_s24 + $0x38] sm:$0xff] %v3967_v55  ;;  %v3965_v46 = vadd.f32 %v3948_v22, %v3828_v63 }
 0x35a   : > { %3973 = vst [vmem:[%s7100_s24 + $0x28] sm:$0xff] %v3965_v46 }
 0x35b PF: > { %s19_s30 = sadd.s32 1, %s5328_s30  }
 0x35c   : > { %p16_p4 = scmp.ge.s32.totalorder %s19_s30, 4  }
 0x35e   :  { %18 = sbr.rel (!%p16_p4) target bundleno = 1 (0x1), region = 103 }

</bundles_post_ra>
